<compile_context>
chip_gen: v6e
topology: v6e:2x2x1
jax: 0.10.0
libtpu: 0.0.40
codegen_flags: <defaults>
</compile_context>

<pallas_src>
import math

import jax
import jax.numpy as jnp
from jax import lax
from jax.experimental import pallas as pl
from jax.experimental.pallas import tpu as pltpu

# ----- hyperparameters (FullTransformerModel constructor args) -----
EMBED_DIM = 32
NUM_HEADS = 4
NUM_LAYERS = 2
RNN_HIDDEN = 16
RNN_LAYERS = 2
FF_DIM = 2048          # nn.TransformerEncoderLayer default dim_feedforward
SEQ_LEN = 8            # length of Is / hklss / qs sequences
NUM_TOKENS = 5
NUM_STREAMS = 3        # Is, hklss, qs
LN_EPS = 1e-5

H3 = NUM_STREAMS * RNN_HIDDEN   # 48 : valid width of the concatenated hidden
H3P = 64                        # per-gate group width, padded 48 -> 64 lanes
G4P = 4 * H3P                   # 256: grouped gates [i|f|o|g] x 3 streams (+pad)
_GATE_PERM = (0, 1, 3, 2)       # torch gate order [i|f|g|o] -> kernel [i|f|o|g]


# --------------------------------------------------------------------------
# Shared math helpers
# --------------------------------------------------------------------------
def _dot(a, b):
    """MXU matmul: bf16 operands, f32 accumulation (single-pass on all chips)."""
    return jnp.dot(a.astype(jnp.bfloat16), b.astype(jnp.bfloat16),
                   preferred_element_type=jnp.float32)


def _ln_fused(x, g, b):
    """LayerNorm with one-pass stats: sum(x) and sum(x*x) are independent, so
    the serial chain is one reduction instead of reduce->center->reduce."""
    inv_n = 1.0 / x.shape[-1]
    s1 = jnp.sum(x, axis=-1, keepdims=True)
    s2 = jnp.sum(x * x, axis=-1, keepdims=True)
    mu = s1 * inv_n
    var = s2 * inv_n - mu * mu
    return (x - mu) * lax.rsqrt(var + LN_EPS) * g + b


def _ln_ref(x, g, b):
    mu = jnp.mean(x, axis=-1, keepdims=True)
    var = jnp.mean((x - mu) ** 2, axis=-1, keepdims=True)
    return (x - mu) * lax.rsqrt(var + LN_EPS) * g + b


# --------------------------------------------------------------------------
# Fused kernel: embeddings + all encoder layers + output head (single step)
# --------------------------------------------------------------------------
def _fused_kernel(disp_ref, fsv_ref, xs_ref,
                  disp_w_ref, disp_b_ref, fs_w_ref, fs_b_ref,
                  wih0_ref, wih_bd_ref, whh_bd_ref, b_grp_ref,
                  fc_bd_ref, fc_b3_ref,
                  wqkv_ref, bqkv_ref, wo_ref, bo_ref,
                  ln1g_ref, ln1b_ref, w1_ref, b1_ref, w2_ref, b2_ref,
                  ln2g_ref, ln2b_ref,
                  out_w_ref, out_b_ref,
                  o_ref):
    E = EMBED_DIM
    bf16 = jnp.bfloat16

    # ---------------- embeddings ----------------
    disp_e = _dot(disp_ref[...], disp_w_ref[...]) + disp_b_ref[...]          # (1,E)
    fs_e = fsv_ref[...] * fs_w_ref[...] + fs_b_ref[...]                      # (1,E) VPU

    # Batched 3-stream LSTM; gate groups [i|f|o|g], each padded to 64 lanes.
    prev_hs = None
    h = jnp.zeros((1, H3P), jnp.float32)
    for l in range(RNN_LAYERS):                                              # static
        whh_l = whh_bd_ref[l]                                                # (H3P,G4P)
        if l == 0:
            # input->gate for all timesteps & streams (+ bias) in one matmul
            ih_l = _dot(xs_ref[...], wih0_ref[...]) + b_grp_ref[0]           # (T,G4P)
        else:
            x_l = jnp.concatenate(prev_hs, axis=0)                           # (T,H3P)
            ih_l = _dot(x_l, wih_bd_ref[l - 1]) + b_grp_ref[l]               # (T,G4P)
        h = jnp.zeros((1, H3P), jnp.float32)
        c = jnp.zeros((1, H3P), jnp.float32)
        keep = l < RNN_LAYERS - 1
        hs = []
        for t in range(SEQ_LEN):                                             # static
            gates = ih_l[t:t + 1, :] + _dot(h, whh_l)                        # (1,G4P)
            sig = jax.nn.sigmoid(gates[:, 0:3 * H3P])    # i|f|o in one EUP pass
            i_g = sig[:, 0:H3P]
            f_g = sig[:, H3P:2 * H3P]
            o_g = sig[:, 2 * H3P:3 * H3P]
            g_g = jnp.tanh(gates[:, 3 * H3P:4 * H3P])
            c = f_g * c + i_g * g_g
            h = o_g * jnp.tanh(c)
            if keep:
                hs.append(h)                                                 # vregs only
        prev_hs = hs
    # shared fc applied to all 3 final hidden states with one block-diag matmul
    emb = _dot(h, fc_bd_ref[...]) + fc_b3_ref[...]                           # (1,3E)

    x = jnp.concatenate([disp_e,
                         emb[:, 0:E],          # Is embedding
                         emb[:, E:2 * E],      # hklss embedding
                         fs_e,
                         emb[:, 2 * E:3 * E]], # qs embedding
                        axis=0)                                              # (5,E)

    # ---------------- encoder layers (statically unrolled) ----------------
    hd = E // NUM_HEADS
    scale = 1.0 / math.sqrt(hd)
    for l in range(NUM_LAYERS):                                              # static
        qkv = _dot(x, wqkv_ref[l]) + bqkv_ref[l]                             # (5,3E)
        q_bf = (qkv[:, 0:E] * scale).astype(bf16)
        k_bf = qkv[:, E:2 * E].astype(bf16)
        v_bf = qkv[:, 2 * E:3 * E].astype(bf16)
        wo_l = wo_ref[l]                                                     # (E,E)
        attn = jnp.zeros((NUM_TOKENS, E), jnp.float32)
        for hh in range(NUM_HEADS):                                          # static
            sl = slice(hh * hd, (hh + 1) * hd)
            scores = lax.dot_general(q_bf[:, sl], k_bf[:, sl],
                                     (((1,), (1,)), ((), ())),
                                     preferred_element_type=jnp.float32)    # (5,5)
            m = jnp.max(scores, axis=-1, keepdims=True)
            p = jnp.exp(scores - m)
            p = p * pl.reciprocal(jnp.sum(p, axis=-1, keepdims=True), approx=True)
            head = _dot(p, v_bf[:, sl])                                      # (5,hd)
            # accumulate each head straight through the out-proj (no lane concat)
            attn = attn + _dot(head, wo_l[sl, :])
        attn = attn + bo_ref[l]

        x = _ln_fused(x + attn, ln1g_ref[l], ln1b_ref[l])
        hdn = jnp.maximum(_dot(x, w1_ref[l]) + b1_ref[l], 0.0)               # (5,FF)
        ff = _dot(hdn, w2_ref[l]) + b2_ref[l]
        x = _ln_fused(x + ff, ln2g_ref[l], ln2b_ref[l])

    # ---------------- token mean + Linear(E, 6) ----------------
    tok_mean = jnp.mean(x, axis=0, keepdims=True)                            # (1,E)
    o_ref[...] = _dot(tok_mean, out_w_ref[...]) + out_b_ref[...]


# --------------------------------------------------------------------------
# pallas_call wrapper
# --------------------------------------------------------------------------
_CONST_KEYS = ("disp_w", "disp_b", "fs_w", "fs_b", "wih0", "wih_bd", "whh_bd",
               "b_grp", "fc_bd", "fc_b3")
_LAYER_KEYS = ("wqkv", "bqkv", "wo", "bo", "ln1g", "ln1b",
               "w1", "b1", "w2", "b2", "ln2g", "ln2b")
_OUT_KEYS = ("out_w", "out_b")


def _full_spec(arr):
    n = arr.ndim
    return pl.BlockSpec(arr.shape, lambda i, n=n: (0,) * n)


def fused_forward(packed, disp, fsv, xs):
    operands = ((disp, fsv, xs)
                + tuple(packed[k] for k in _CONST_KEYS)
                + tuple(packed[k] for k in _LAYER_KEYS)
                + tuple(packed[k] for k in _OUT_KEYS))
    return pl.pallas_call(
        _fused_kernel,
        out_shape=jax.ShapeDtypeStruct((1, 6), jnp.float32),
        grid=(1,),
        in_specs=[_full_spec(a) for a in operands],
        out_specs=pl.BlockSpec((1, 6), lambda i: (0, 0)),
        compiler_params=pltpu.CompilerParams(
            dimension_semantics=("arbitrary",)),
    )(*operands)


@jax.jit
def forward(packed, disp_tensor, Is, hklss, fs, qs):
    disp = disp_tensor.reshape(1, 6)
    fsv = fs.reshape(1, 1)
    xs = jnp.stack([Is, hklss, qs], axis=1)          # (T, 3): streams Is, hklss, qs
    return fused_forward(packed, disp, fsv, xs)


# --------------------------------------------------------------------------
# Parameters (logical, per-stream / per-layer) + packing for the kernel
# --------------------------------------------------------------------------
def _normal(key, shape, scale=0.2):
    return scale * jax.random.normal(key, shape, jnp.float32)


def init_params(key):
    keys = iter(jax.random.split(key, 96))
    H, E = RNN_HIDDEN, EMBED_DIM

    def lstm_params():
        layers = []
        for l in range(RNN_LAYERS):
            in_dim = 1 if l == 0 else H
            layers.append((_normal(next(keys), (in_dim, 4 * H)),   # W_ih^T  [i|f|g|o]
                           _normal(next(keys), (H, 4 * H)),        # W_hh^T
                           _normal(next(keys), (1, 4 * H))))       # b_ih + b_hh
        return layers

    params = {
        "disp_w": _normal(next(keys), (6, E)),
        "disp_b": _normal(next(keys), (1, E)),
        "fs_w": _normal(next(keys), (1, E)),
        "fs_b": _normal(next(keys), (1, E)),
        "fc_w": _normal(next(keys), (H, E)),
        "fc_b": _normal(next(keys), (1, E)),
        "lstm": [lstm_params() for _ in range(NUM_STREAMS)],       # Is, hklss, qs
        "out_w": _normal(next(keys), (E, 6)),
        "out_b": _normal(next(keys), (1, 6)),
    }
    enc = []
    for _ in range(NUM_LAYERS):
        enc.append((
            _normal(next(keys), (E, 3 * E)),                 # in_proj weight (E,3E)
            _normal(next(keys), (1, 3 * E)),                 # in_proj bias
            _normal(next(keys), (E, E)),                     # out_proj weight
            _normal(next(keys), (1, E)),                     # out_proj bias
            jnp.ones((1, E), jnp.float32),                   # LN1 gamma
            jnp.zeros((1, E), jnp.float32),                  # LN1 beta
            _normal(next(keys), (E, FF_DIM), scale=0.05),    # linear1 weight
            _normal(next(keys), (1, FF_DIM), scale=0.05),    # linear1 bias
            _normal(next(keys), (FF_DIM, E), scale=0.05),    # linear2 weight
            _normal(next(keys), (1, E), scale=0.05),         # linear2 bias
            jnp.ones((1, E), jnp.float32),                   # LN2 gamma
            jnp.zeros((1, E), jnp.float32),                  # LN2 beta
        ))
    params["enc"] = enc
    return params


def pack_params(p):
    """Pack logical params into the batched / block-diagonal kernel operands.

    Gate layout change vs v1 (per review): torch gate order [i|f|g|o] is
    remapped to [i|f|o|g] and every gate group is padded from 48 to 64 lanes
    so gate slices are 64-lane aligned and the 3 sigmoid gates are contiguous.
    Padding columns/rows are exact zeros, so padded hidden/cell lanes stay 0.
    """
    H, E = RNN_HIDDEN, EMBED_DIM

    def group_cols(w, s):
        # w: (rows, 4H) with torch gate-major cols [i|f|g|o].  Place stream s's
        # columns into the padded grouped layout [i|f|o|g] x 64 lanes each.
        out = jnp.zeros((w.shape[0], G4P), jnp.float32)
        for gi in range(4):
            gn = _GATE_PERM[gi]
            out = out.at[:, gn * H3P + s * H: gn * H3P + (s + 1) * H].set(
                w[:, gi * H:(gi + 1) * H])
        return out

    wih0 = jnp.zeros((NUM_STREAMS, G4P), jnp.float32)
    wih_bd = jnp.zeros((max(RNN_LAYERS - 1, 1), H3P, G4P), jnp.float32)
    whh_bd = jnp.zeros((RNN_LAYERS, H3P, G4P), jnp.float32)
    b_grp = jnp.zeros((RNN_LAYERS, 1, G4P), jnp.float32)
    for s in range(NUM_STREAMS):
        for l, (wih, whh, b) in enumerate(p["lstm"][s]):
            if l == 0:
                wih0 = wih0.at[s, :].set(group_cols(wih, s)[0])
            else:
                wih_bd = wih_bd.at[l - 1, s * H:(s + 1) * H, :].set(group_cols(wih, s))
            whh_bd = whh_bd.at[l, s * H:(s + 1) * H, :].set(group_cols(whh, s))
            b_grp = b_grp.at[l].add(group_cols(b, s))
    fc_bd = jnp.zeros((H3P, NUM_STREAMS * E), jnp.float32)
    for s in range(NUM_STREAMS):
        fc_bd = fc_bd.at[s * H:(s + 1) * H, s * E:(s + 1) * E].set(p["fc_w"])
    fc_b3 = jnp.tile(p["fc_b"], (1, NUM_STREAMS))

    bf16 = jnp.bfloat16
    packed = {
        "disp_w": p["disp_w"].astype(bf16), "disp_b": p["disp_b"],
        "fs_w": p["fs_w"], "fs_b": p["fs_b"],
        "wih0": wih0.astype(bf16), "wih_bd": wih_bd.astype(bf16),
        "whh_bd": whh_bd.astype(bf16), "b_grp": b_grp,
        "fc_bd": fc_bd.astype(bf16), "fc_b3": fc_b3,
        "out_w": p["out_w"].astype(bf16), "out_b": p["out_b"],
    }
    bf16_layer = {"wqkv", "wo", "w1", "w2"}
    for idx, name in enumerate(_LAYER_KEYS):
        w = jnp.stack([layer[idx] for layer in p["enc"]], axis=0)
        packed[name] = w.astype(bf16) if name in bf16_layer else w
    return packed


# --------------------------------------------------------------------------
# Pure-JAX reference (same math, same bf16-operand matmuls) for self-check
# --------------------------------------------------------------------------
def _ref_lstm_last_hidden(x_seq, layers):
    H = RNN_HIDDEN
    inp = x_seq                                      # (T, in_dim)
    h = None
    for (wih, whh, b) in layers:
        h = jnp.zeros((1, H), jnp.float32)
        c = jnp.zeros((1, H), jnp.float32)
        outs = []
        for t in range(inp.shape[0]):
            gates = _dot(inp[t:t + 1], wih) + _dot(h, whh) + b
            i_g = jax.nn.sigmoid(gates[:, 0:H])
            f_g = jax.nn.sigmoid(gates[:, H:2 * H])
            g_g = jnp.tanh(gates[:, 2 * H:3 * H])
            o_g = jax.nn.sigmoid(gates[:, 3 * H:4 * H])
            c = f_g * c + i_g * g_g
            h = o_g * jnp.tanh(c)
            outs.append(h)
        inp = jnp.concatenate(outs, axis=0)
    return h


def _ref_encoder_layer(x, layer):
    (wqkv, bqkv, wo, bo, ln1g, ln1b, w1, b1, w2, b2, ln2g, ln2b) = layer
    E = x.shape[1]
    hd = E // NUM_HEADS
    scale = 1.0 / math.sqrt(hd)
    qkv = _dot(x, wqkv) + bqkv
    q, k, v = qkv[:, 0:E], qkv[:, E:2 * E], qkv[:, 2 * E:3 * E]
    heads = []
    for h in range(NUM_HEADS):
        sl = slice(h * hd, (h + 1) * hd)
        scores = _dot(q[:, sl] * scale, k[:, sl].T)
        heads.append(_dot(jax.nn.softmax(scores, axis=-1), v[:, sl]))
    attn = _dot(jnp.concatenate(heads, axis=-1), wo) + bo
    x = _ln_ref(x + attn, ln1g, ln1b)
    ff = _dot(jnp.maximum(_dot(x, w1) + b1, 0.0), w2) + b2
    return _ln_ref(x + ff, ln2g, ln2b)


def reference_forward(params, disp_tensor, Is, hklss, fs, qs):
    disp_e = _dot(disp_tensor.reshape(1, 6), params["disp_w"]) + params["disp_b"]
    fs_e = fs.reshape(1, 1) * params["fs_w"] + params["fs_b"]
    embs = []
    for s, seq in enumerate((Is, hklss, qs)):
        h_last = _ref_lstm_last_hidden(seq.reshape(-1, 1), params["lstm"][s])
        embs.append(_dot(h_last, params["fc_w"]) + params["fc_b"])
    x = jnp.concatenate([disp_e, embs[0], embs[1], fs_e, embs[2]], axis=0)
    for layer in params["enc"]:
        x = _ref_encoder_layer(x, layer)
    return _dot(jnp.mean(x, axis=0, keepdims=True), params["out_w"]) + params["out_b"]


# --------------------------------------------------------------------------
if __name__ == "__main__":
    key = jax.random.PRNGKey(0)
    pkey, dkey = jax.random.split(key)
    params = init_params(pkey)
    packed = pack_params(params)

    k1, k2, k3, k4, k5 = jax.random.split(dkey, 5)
    # Unbatched inputs, as implied by stack(dim=0).unsqueeze(1) in the module.
    disp_tensor = jax.random.normal(k1, (6,), jnp.float32)
    Is = jax.random.normal(k2, (SEQ_LEN,), jnp.float32)
    hklss = jax.random.normal(k3, (SEQ_LEN,), jnp.float32)
    fs = jax.random.normal(k4, (), jnp.float32)
    qs = jax.random.normal(k5, (SEQ_LEN,), jnp.float32)

    out = jax.block_until_ready(forward(packed, disp_tensor, Is, hklss, fs, qs))
    ref = reference_forward(params, disp_tensor, Is, hklss, fs, qs)

    assert out.shape == (1, 6), out.shape
    assert jnp.allclose(out, ref, rtol=1e-2, atol=1e-2), (out, ref)
    print("KERNEL_OK")
</pallas_src>

<mosaic_0001>
module attributes {stable_mosaic.version = 11 : i64} {
  func.func @_fused_kernel(%arg0: i32, %arg1: memref<1x6xf32, #tpu.memory_space<vmem>>, %arg2: memref<1x1xf32, #tpu.memory_space<vmem>>, %arg3: memref<8x3xf32, #tpu.memory_space<vmem>>, %arg4: memref<6x32xbf16, #tpu.memory_space<vmem>>, %arg5: memref<1x32xf32, #tpu.memory_space<vmem>>, %arg6: memref<1x32xf32, #tpu.memory_space<vmem>>, %arg7: memref<1x32xf32, #tpu.memory_space<vmem>>, %arg8: memref<3x256xbf16, #tpu.memory_space<vmem>>, %arg9: memref<1x64x256xbf16, #tpu.memory_space<vmem>>, %arg10: memref<2x64x256xbf16, #tpu.memory_space<vmem>>, %arg11: memref<2x1x256xf32, #tpu.memory_space<vmem>>, %arg12: memref<64x96xbf16, #tpu.memory_space<vmem>>, %arg13: memref<1x96xf32, #tpu.memory_space<vmem>>, %arg14: memref<2x32x96xbf16, #tpu.memory_space<vmem>>, %arg15: memref<2x1x96xf32, #tpu.memory_space<vmem>>, %arg16: memref<2x32x32xbf16, #tpu.memory_space<vmem>>, %arg17: memref<2x1x32xf32, #tpu.memory_space<vmem>>, %arg18: memref<2x1x32xf32, #tpu.memory_space<vmem>>, %arg19: memref<2x1x32xf32, #tpu.memory_space<vmem>>, %arg20: memref<2x32x2048xbf16, #tpu.memory_space<vmem>>, %arg21: memref<2x1x2048xf32, #tpu.memory_space<vmem>>, %arg22: memref<2x2048x32xbf16, #tpu.memory_space<vmem>>, %arg23: memref<2x1x32xf32, #tpu.memory_space<vmem>>, %arg24: memref<2x1x32xf32, #tpu.memory_space<vmem>>, %arg25: memref<2x1x32xf32, #tpu.memory_space<vmem>>, %arg26: memref<32x6xbf16, #tpu.memory_space<vmem>>, %arg27: memref<1x6xf32, #tpu.memory_space<vmem>>, %arg28: memref<1x6xf32, #tpu.memory_space<vmem>>) attributes {dimension_semantics = [#tpu.dimension_semantics<arbitrary>], iteration_bounds = array<i64: 1>, scalar_prefetch = 0 : i64, scratch_operands = 0 : i64, tpu.core_type = #tpu.core_type<tc>, window_params = [{pipeline_mode = #tpu.pipeline_mode<synchronous>, transform_indices = @transform_0, window_bounds = array<i64: 1, 6>}, {pipeline_mode = #tpu.pipeline_mode<synchronous>, transform_indices = @transform_1, window_bounds = array<i64: 1, 1>}, {pipeline_mode = #tpu.pipeline_mode<synchronous>, transform_indices = @transform_2, window_bounds = array<i64: 8, 3>}, {pipeline_mode = #tpu.pipeline_mode<synchronous>, transform_indices = @transform_3, window_bounds = array<i64: 6, 32>}, {pipeline_mode = #tpu.pipeline_mode<synchronous>, transform_indices = @transform_4, window_bounds = array<i64: 1, 32>}, {pipeline_mode = #tpu.pipeline_mode<synchronous>, transform_indices = @transform_5, window_bounds = array<i64: 1, 32>}, {pipeline_mode = #tpu.pipeline_mode<synchronous>, transform_indices = @transform_6, window_bounds = array<i64: 1, 32>}, {pipeline_mode = #tpu.pipeline_mode<synchronous>, transform_indices = @transform_7, window_bounds = array<i64: 3, 256>}, {pipeline_mode = #tpu.pipeline_mode<synchronous>, transform_indices = @transform_8, window_bounds = array<i64: 1, 64, 256>}, {pipeline_mode = #tpu.pipeline_mode<synchronous>, transform_indices = @transform_9, window_bounds = array<i64: 2, 64, 256>}, {pipeline_mode = #tpu.pipeline_mode<synchronous>, transform_indices = @transform_10, window_bounds = array<i64: 2, 1, 256>}, {pipeline_mode = #tpu.pipeline_mode<synchronous>, transform_indices = @transform_11, window_bounds = array<i64: 64, 96>}, {pipeline_mode = #tpu.pipeline_mode<synchronous>, transform_indices = @transform_12, window_bounds = array<i64: 1, 96>}, {pipeline_mode = #tpu.pipeline_mode<synchronous>, transform_indices = @transform_13, window_bounds = array<i64: 2, 32, 96>}, {pipeline_mode = #tpu.pipeline_mode<synchronous>, transform_indices = @transform_14, window_bounds = array<i64: 2, 1, 96>}, {pipeline_mode = #tpu.pipeline_mode<synchronous>, transform_indices = @transform_15, window_bounds = array<i64: 2, 32, 32>}, {pipeline_mode = #tpu.pipeline_mode<synchronous>, transform_indices = @transform_16, window_bounds = array<i64: 2, 1, 32>}, {pipeline_mode = #tpu.pipeline_mode<synchronous>, transform_indices = @transform_17, window_bounds = array<i64: 2, 1, 32>}, {pipeline_mode = #tpu.pipeline_mode<synchronous>, transform_indices = @transform_18, window_bounds = array<i64: 2, 1, 32>}, {pipeline_mode = #tpu.pipeline_mode<synchronous>, transform_indices = @transform_19, window_bounds = array<i64: 2, 32, 2048>}, {pipeline_mode = #tpu.pipeline_mode<synchronous>, transform_indices = @transform_20, window_bounds = array<i64: 2, 1, 2048>}, {pipeline_mode = #tpu.pipeline_mode<synchronous>, transform_indices = @transform_21, window_bounds = array<i64: 2, 2048, 32>}, {pipeline_mode = #tpu.pipeline_mode<synchronous>, transform_indices = @transform_22, window_bounds = array<i64: 2, 1, 32>}, {pipeline_mode = #tpu.pipeline_mode<synchronous>, transform_indices = @transform_23, window_bounds = array<i64: 2, 1, 32>}, {pipeline_mode = #tpu.pipeline_mode<synchronous>, transform_indices = @transform_24, window_bounds = array<i64: 2, 1, 32>}, {pipeline_mode = #tpu.pipeline_mode<synchronous>, transform_indices = @transform_25, window_bounds = array<i64: 32, 6>}, {pipeline_mode = #tpu.pipeline_mode<synchronous>, transform_indices = @transform_26, window_bounds = array<i64: 1, 6>}, {pipeline_mode = #tpu.pipeline_mode<synchronous>, transform_indices = @transform_27, window_bounds = array<i64: 1, 6>}]} {
    %c0 = arith.constant 0 : index
    %c0_0 = arith.constant 0 : index
    %0 = vector.load %arg1[%c0, %c0_0] : memref<1x6xf32, #tpu.memory_space<vmem>>, vector<1x6xf32>
    %c0_1 = arith.constant 0 : index
    %c0_2 = arith.constant 0 : index
    %1 = vector.load %arg4[%c0_1, %c0_2] : memref<6x32xbf16, #tpu.memory_space<vmem>>, vector<6x32xbf16>
    %2 = arith.truncf %0 : vector<1x6xf32> to vector<1x6xbf16>
    %cst = arith.constant dense<0.000000e+00> : vector<1x32xf32>
    %3 = tpu.matmul %2, %1, %cst {dimension_numbers = #tpu.dot_dimension_numbers<[1], [0], [0], [1], [0, 0, 1, 1], [], []>} : vector<1x6xbf16>, vector<6x32xbf16>, vector<1x32xf32> -> vector<1x32xf32>
    %c0_3 = arith.constant 0 : index
    %c0_4 = arith.constant 0 : index
    %4 = vector.load %arg5[%c0_3, %c0_4] : memref<1x32xf32, #tpu.memory_space<vmem>>, vector<1x32xf32>
    %5 = arith.addf %3, %4 : vector<1x32xf32>
    %c0_5 = arith.constant 0 : index
    %c0_6 = arith.constant 0 : index
    %6 = vector.load %arg2[%c0_5, %c0_6] : memref<1x1xf32, #tpu.memory_space<vmem>>, vector<1x1xf32>
    %c0_7 = arith.constant 0 : index
    %c0_8 = arith.constant 0 : index
    %7 = vector.load %arg6[%c0_7, %c0_8] : memref<1x32xf32, #tpu.memory_space<vmem>>, vector<1x32xf32>
    %8 = vector.broadcast %6 : vector<1x1xf32> to vector<1x32xf32>
    %9 = arith.mulf %8, %7 : vector<1x32xf32>
    %c0_9 = arith.constant 0 : index
    %c0_10 = arith.constant 0 : index
    %10 = vector.load %arg7[%c0_9, %c0_10] : memref<1x32xf32, #tpu.memory_space<vmem>>, vector<1x32xf32>
    %11 = arith.addf %9, %10 : vector<1x32xf32>
    %c0_11 = arith.constant 0 : index
    %c0_12 = arith.constant 0 : index
    %c0_13 = arith.constant 0 : index
    %12 = vector.load %arg10[%c0_11, %c0_12, %c0_13] : memref<2x64x256xbf16, #tpu.memory_space<vmem>>, vector<1x64x256xbf16>
    %13 = vector.shape_cast %12 : vector<1x64x256xbf16> to vector<64x256xbf16>
    %c0_14 = arith.constant 0 : index
    %c0_15 = arith.constant 0 : index
    %14 = vector.load %arg3[%c0_14, %c0_15] : memref<8x3xf32, #tpu.memory_space<vmem>>, vector<8x3xf32>
    %c0_16 = arith.constant 0 : index
    %c0_17 = arith.constant 0 : index
    %15 = vector.load %arg8[%c0_16, %c0_17] : memref<3x256xbf16, #tpu.memory_space<vmem>>, vector<3x256xbf16>
    %16 = arith.truncf %14 : vector<8x3xf32> to vector<8x3xbf16>
    %cst_18 = arith.constant dense<0.000000e+00> : vector<8x256xf32>
    %17 = tpu.matmul %16, %15, %cst_18 {dimension_numbers = #tpu.dot_dimension_numbers<[1], [0], [0], [1], [0, 0, 1, 1], [], []>} : vector<8x3xbf16>, vector<3x256xbf16>, vector<8x256xf32> -> vector<8x256xf32>
    %c0_19 = arith.constant 0 : index
    %c0_20 = arith.constant 0 : index
    %c0_21 = arith.constant 0 : index
    %18 = vector.load %arg11[%c0_19, %c0_20, %c0_21] : memref<2x1x256xf32, #tpu.memory_space<vmem>>, vector<1x1x256xf32>
    %19 = vector.shape_cast %18 : vector<1x1x256xf32> to vector<1x256xf32>
    %20 = vector.broadcast %19 : vector<1x256xf32> to vector<8x256xf32>
    %21 = arith.addf %17, %20 : vector<8x256xf32>
    %cst_22 = arith.constant 0.000000e+00 : f32
    %22 = vector.broadcast %cst_22 : f32 to vector<1x64xf32>
    %cst_23 = arith.constant 0.000000e+00 : f32
    %23 = vector.broadcast %cst_23 : f32 to vector<1x64xf32>
    %24 = vector.extract_strided_slice %21 {offsets = [0, 0], sizes = [1, 256], strides = [1, 1]} : vector<8x256xf32> to vector<1x256xf32>
    %25 = arith.truncf %22 : vector<1x64xf32> to vector<1x64xbf16>
    %cst_24 = arith.constant dense<0.000000e+00> : vector<1x256xf32>
    %26 = tpu.matmul %25, %13, %cst_24 {dimension_numbers = #tpu.dot_dimension_numbers<[1], [0], [0], [1], [0, 0, 1, 1], [], []>} : vector<1x64xbf16>, vector<64x256xbf16>, vector<1x256xf32> -> vector<1x256xf32>
    %27 = arith.addf %24, %26 : vector<1x256xf32>
    %28 = vector.extract_strided_slice %27 {offsets = [0, 0], sizes = [1, 192], strides = [1, 1]} : vector<1x256xf32> to vector<1x192xf32>
    %29 = arith.negf %28 : vector<1x192xf32>
    %30 = math.exp %29 : vector<1x192xf32>
    %cst_25 = arith.constant 1.000000e+00 : f32
    %31 = vector.broadcast %cst_25 : f32 to vector<1x192xf32>
    %32 = arith.addf %31, %30 : vector<1x192xf32>
    %33 = arith.divf %31, %32 : vector<1x192xf32>
    %34 = vector.extract_strided_slice %33 {offsets = [0, 0], sizes = [1, 64], strides = [1, 1]} : vector<1x192xf32> to vector<1x64xf32>
    %35 = vector.extract_strided_slice %33 {offsets = [0, 64], sizes = [1, 64], strides = [1, 1]} : vector<1x192xf32> to vector<1x64xf32>
    %36 = vector.extract_strided_slice %33 {offsets = [0, 128], sizes = [1, 64], strides = [1, 1]} : vector<1x192xf32> to vector<1x64xf32>
    %37 = vector.extract_strided_slice %27 {offsets = [0, 192], sizes = [1, 64], strides = [1, 1]} : vector<1x256xf32> to vector<1x64xf32>
    %38 = math.tanh %37 : vector<1x64xf32>
    %39 = arith.mulf %35, %23 : vector<1x64xf32>
    %40 = arith.mulf %34, %38 : vector<1x64xf32>
    %41 = arith.addf %39, %40 : vector<1x64xf32>
    %42 = math.tanh %41 : vector<1x64xf32>
    %43 = arith.mulf %36, %42 : vector<1x64xf32>
    %44 = vector.extract_strided_slice %21 {offsets = [1, 0], sizes = [1, 256], strides = [1, 1]} : vector<8x256xf32> to vector<1x256xf32>
    %45 = arith.truncf %43 : vector<1x64xf32> to vector<1x64xbf16>
    %cst_26 = arith.constant dense<0.000000e+00> : vector<1x256xf32>
    %46 = tpu.matmul %45, %13, %cst_26 {dimension_numbers = #tpu.dot_dimension_numbers<[1], [0], [0], [1], [0, 0, 1, 1], [], []>} : vector<1x64xbf16>, vector<64x256xbf16>, vector<1x256xf32> -> vector<1x256xf32>
    %47 = arith.addf %44, %46 : vector<1x256xf32>
    %48 = vector.extract_strided_slice %47 {offsets = [0, 0], sizes = [1, 192], strides = [1, 1]} : vector<1x256xf32> to vector<1x192xf32>
    %49 = arith.negf %48 : vector<1x192xf32>
    %50 = math.exp %49 : vector<1x192xf32>
    %cst_27 = arith.constant 1.000000e+00 : f32
    %51 = vector.broadcast %cst_27 : f32 to vector<1x192xf32>
    %52 = arith.addf %51, %50 : vector<1x192xf32>
    %53 = arith.divf %51, %52 : vector<1x192xf32>
    %54 = vector.extract_strided_slice %53 {offsets = [0, 0], sizes = [1, 64], strides = [1, 1]} : vector<1x192xf32> to vector<1x64xf32>
    %55 = vector.extract_strided_slice %53 {offsets = [0, 64], sizes = [1, 64], strides = [1, 1]} : vector<1x192xf32> to vector<1x64xf32>
    %56 = vector.extract_strided_slice %53 {offsets = [0, 128], sizes = [1, 64], strides = [1, 1]} : vector<1x192xf32> to vector<1x64xf32>
    %57 = vector.extract_strided_slice %47 {offsets = [0, 192], sizes = [1, 64], strides = [1, 1]} : vector<1x256xf32> to vector<1x64xf32>
    %58 = math.tanh %57 : vector<1x64xf32>
    %59 = arith.mulf %55, %41 : vector<1x64xf32>
    %60 = arith.mulf %54, %58 : vector<1x64xf32>
    %61 = arith.addf %59, %60 : vector<1x64xf32>
    %62 = math.tanh %61 : vector<1x64xf32>
    %63 = arith.mulf %56, %62 : vector<1x64xf32>
    %64 = vector.extract_strided_slice %21 {offsets = [2, 0], sizes = [1, 256], strides = [1, 1]} : vector<8x256xf32> to vector<1x256xf32>
    %65 = arith.truncf %63 : vector<1x64xf32> to vector<1x64xbf16>
    %cst_28 = arith.constant dense<0.000000e+00> : vector<1x256xf32>
    %66 = tpu.matmul %65, %13, %cst_28 {dimension_numbers = #tpu.dot_dimension_numbers<[1], [0], [0], [1], [0, 0, 1, 1], [], []>} : vector<1x64xbf16>, vector<64x256xbf16>, vector<1x256xf32> -> vector<1x256xf32>
    %67 = arith.addf %64, %66 : vector<1x256xf32>
    %68 = vector.extract_strided_slice %67 {offsets = [0, 0], sizes = [1, 192], strides = [1, 1]} : vector<1x256xf32> to vector<1x192xf32>
    %69 = arith.negf %68 : vector<1x192xf32>
    %70 = math.exp %69 : vector<1x192xf32>
    %cst_29 = arith.constant 1.000000e+00 : f32
    %71 = vector.broadcast %cst_29 : f32 to vector<1x192xf32>
    %72 = arith.addf %71, %70 : vector<1x192xf32>
    %73 = arith.divf %71, %72 : vector<1x192xf32>
    %74 = vector.extract_strided_slice %73 {offsets = [0, 0], sizes = [1, 64], strides = [1, 1]} : vector<1x192xf32> to vector<1x64xf32>
    %75 = vector.extract_strided_slice %73 {offsets = [0, 64], sizes = [1, 64], strides = [1, 1]} : vector<1x192xf32> to vector<1x64xf32>
    %76 = vector.extract_strided_slice %73 {offsets = [0, 128], sizes = [1, 64], strides = [1, 1]} : vector<1x192xf32> to vector<1x64xf32>
    %77 = vector.extract_strided_slice %67 {offsets = [0, 192], sizes = [1, 64], strides = [1, 1]} : vector<1x256xf32> to vector<1x64xf32>
    %78 = math.tanh %77 : vector<1x64xf32>
    %79 = arith.mulf %75, %61 : vector<1x64xf32>
    %80 = arith.mulf %74, %78 : vector<1x64xf32>
    %81 = arith.addf %79, %80 : vector<1x64xf32>
    %82 = math.tanh %81 : vector<1x64xf32>
    %83 = arith.mulf %76, %82 : vector<1x64xf32>
    %84 = vector.extract_strided_slice %21 {offsets = [3, 0], sizes = [1, 256], strides = [1, 1]} : vector<8x256xf32> to vector<1x256xf32>
    %85 = arith.truncf %83 : vector<1x64xf32> to vector<1x64xbf16>
    %cst_30 = arith.constant dense<0.000000e+00> : vector<1x256xf32>
    %86 = tpu.matmul %85, %13, %cst_30 {dimension_numbers = #tpu.dot_dimension_numbers<[1], [0], [0], [1], [0, 0, 1, 1], [], []>} : vector<1x64xbf16>, vector<64x256xbf16>, vector<1x256xf32> -> vector<1x256xf32>
    %87 = arith.addf %84, %86 : vector<1x256xf32>
    %88 = vector.extract_strided_slice %87 {offsets = [0, 0], sizes = [1, 192], strides = [1, 1]} : vector<1x256xf32> to vector<1x192xf32>
    %89 = arith.negf %88 : vector<1x192xf32>
    %90 = math.exp %89 : vector<1x192xf32>
    %cst_31 = arith.constant 1.000000e+00 : f32
    %91 = vector.broadcast %cst_31 : f32 to vector<1x192xf32>
    %92 = arith.addf %91, %90 : vector<1x192xf32>
    %93 = arith.divf %91, %92 : vector<1x192xf32>
    %94 = vector.extract_strided_slice %93 {offsets = [0, 0], sizes = [1, 64], strides = [1, 1]} : vector<1x192xf32> to vector<1x64xf32>
    %95 = vector.extract_strided_slice %93 {offsets = [0, 64], sizes = [1, 64], strides = [1, 1]} : vector<1x192xf32> to vector<1x64xf32>
    %96 = vector.extract_strided_slice %93 {offsets = [0, 128], sizes = [1, 64], strides = [1, 1]} : vector<1x192xf32> to vector<1x64xf32>
    %97 = vector.extract_strided_slice %87 {offsets = [0, 192], sizes = [1, 64], strides = [1, 1]} : vector<1x256xf32> to vector<1x64xf32>
    %98 = math.tanh %97 : vector<1x64xf32>
    %99 = arith.mulf %95, %81 : vector<1x64xf32>
    %100 = arith.mulf %94, %98 : vector<1x64xf32>
    %101 = arith.addf %99, %100 : vector<1x64xf32>
    %102 = math.tanh %101 : vector<1x64xf32>
    %103 = arith.mulf %96, %102 : vector<1x64xf32>
    %104 = vector.extract_strided_slice %21 {offsets = [4, 0], sizes = [1, 256], strides = [1, 1]} : vector<8x256xf32> to vector<1x256xf32>
    %105 = arith.truncf %103 : vector<1x64xf32> to vector<1x64xbf16>
    %cst_32 = arith.constant dense<0.000000e+00> : vector<1x256xf32>
    %106 = tpu.matmul %105, %13, %cst_32 {dimension_numbers = #tpu.dot_dimension_numbers<[1], [0], [0], [1], [0, 0, 1, 1], [], []>} : vector<1x64xbf16>, vector<64x256xbf16>, vector<1x256xf32> -> vector<1x256xf32>
    %107 = arith.addf %104, %106 : vector<1x256xf32>
    %108 = vector.extract_strided_slice %107 {offsets = [0, 0], sizes = [1, 192], strides = [1, 1]} : vector<1x256xf32> to vector<1x192xf32>
    %109 = arith.negf %108 : vector<1x192xf32>
    %110 = math.exp %109 : vector<1x192xf32>
    %cst_33 = arith.constant 1.000000e+00 : f32
    %111 = vector.broadcast %cst_33 : f32 to vector<1x192xf32>
    %112 = arith.addf %111, %110 : vector<1x192xf32>
    %113 = arith.divf %111, %112 : vector<1x192xf32>
    %114 = vector.extract_strided_slice %113 {offsets = [0, 0], sizes = [1, 64], strides = [1, 1]} : vector<1x192xf32> to vector<1x64xf32>
    %115 = vector.extract_strided_slice %113 {offsets = [0, 64], sizes = [1, 64], strides = [1, 1]} : vector<1x192xf32> to vector<1x64xf32>
    %116 = vector.extract_strided_slice %113 {offsets = [0, 128], sizes = [1, 64], strides = [1, 1]} : vector<1x192xf32> to vector<1x64xf32>
    %117 = vector.extract_strided_slice %107 {offsets = [0, 192], sizes = [1, 64], strides = [1, 1]} : vector<1x256xf32> to vector<1x64xf32>
    %118 = math.tanh %117 : vector<1x64xf32>
    %119 = arith.mulf %115, %101 : vector<1x64xf32>
    %120 = arith.mulf %114, %118 : vector<1x64xf32>
    %121 = arith.addf %119, %120 : vector<1x64xf32>
    %122 = math.tanh %121 : vector<1x64xf32>
    %123 = arith.mulf %116, %122 : vector<1x64xf32>
    %124 = vector.extract_strided_slice %21 {offsets = [5, 0], sizes = [1, 256], strides = [1, 1]} : vector<8x256xf32> to vector<1x256xf32>
    %125 = arith.truncf %123 : vector<1x64xf32> to vector<1x64xbf16>
    %cst_34 = arith.constant dense<0.000000e+00> : vector<1x256xf32>
    %126 = tpu.matmul %125, %13, %cst_34 {dimension_numbers = #tpu.dot_dimension_numbers<[1], [0], [0], [1], [0, 0, 1, 1], [], []>} : vector<1x64xbf16>, vector<64x256xbf16>, vector<1x256xf32> -> vector<1x256xf32>
    %127 = arith.addf %124, %126 : vector<1x256xf32>
    %128 = vector.extract_strided_slice %127 {offsets = [0, 0], sizes = [1, 192], strides = [1, 1]} : vector<1x256xf32> to vector<1x192xf32>
    %129 = arith.negf %128 : vector<1x192xf32>
    %130 = math.exp %129 : vector<1x192xf32>
    %cst_35 = arith.constant 1.000000e+00 : f32
    %131 = vector.broadcast %cst_35 : f32 to vector<1x192xf32>
    %132 = arith.addf %131, %130 : vector<1x192xf32>
    %133 = arith.divf %131, %132 : vector<1x192xf32>
    %134 = vector.extract_strided_slice %133 {offsets = [0, 0], sizes = [1, 64], strides = [1, 1]} : vector<1x192xf32> to vector<1x64xf32>
    %135 = vector.extract_strided_slice %133 {offsets = [0, 64], sizes = [1, 64], strides = [1, 1]} : vector<1x192xf32> to vector<1x64xf32>
    %136 = vector.extract_strided_slice %133 {offsets = [0, 128], sizes = [1, 64], strides = [1, 1]} : vector<1x192xf32> to vector<1x64xf32>
    %137 = vector.extract_strided_slice %127 {offsets = [0, 192], sizes = [1, 64], strides = [1, 1]} : vector<1x256xf32> to vector<1x64xf32>
    %138 = math.tanh %137 : vector<1x64xf32>
    %139 = arith.mulf %135, %121 : vector<1x64xf32>
    %140 = arith.mulf %134, %138 : vector<1x64xf32>
    %141 = arith.addf %139, %140 : vector<1x64xf32>
    %142 = math.tanh %141 : vector<1x64xf32>
    %143 = arith.mulf %136, %142 : vector<1x64xf32>
    %144 = vector.extract_strided_slice %21 {offsets = [6, 0], sizes = [1, 256], strides = [1, 1]} : vector<8x256xf32> to vector<1x256xf32>
    %145 = arith.truncf %143 : vector<1x64xf32> to vector<1x64xbf16>
    %cst_36 = arith.constant dense<0.000000e+00> : vector<1x256xf32>
    %146 = tpu.matmul %145, %13, %cst_36 {dimension_numbers = #tpu.dot_dimension_numbers<[1], [0], [0], [1], [0, 0, 1, 1], [], []>} : vector<1x64xbf16>, vector<64x256xbf16>, vector<1x256xf32> -> vector<1x256xf32>
    %147 = arith.addf %144, %146 : vector<1x256xf32>
    %148 = vector.extract_strided_slice %147 {offsets = [0, 0], sizes = [1, 192], strides = [1, 1]} : vector<1x256xf32> to vector<1x192xf32>
    %149 = arith.negf %148 : vector<1x192xf32>
    %150 = math.exp %149 : vector<1x192xf32>
    %cst_37 = arith.constant 1.000000e+00 : f32
    %151 = vector.broadcast %cst_37 : f32 to vector<1x192xf32>
    %152 = arith.addf %151, %150 : vector<1x192xf32>
    %153 = arith.divf %151, %152 : vector<1x192xf32>
    %154 = vector.extract_strided_slice %153 {offsets = [0, 0], sizes = [1, 64], strides = [1, 1]} : vector<1x192xf32> to vector<1x64xf32>
    %155 = vector.extract_strided_slice %153 {offsets = [0, 64], sizes = [1, 64], strides = [1, 1]} : vector<1x192xf32> to vector<1x64xf32>
    %156 = vector.extract_strided_slice %153 {offsets = [0, 128], sizes = [1, 64], strides = [1, 1]} : vector<1x192xf32> to vector<1x64xf32>
    %157 = vector.extract_strided_slice %147 {offsets = [0, 192], sizes = [1, 64], strides = [1, 1]} : vector<1x256xf32> to vector<1x64xf32>
    %158 = math.tanh %157 : vector<1x64xf32>
    %159 = arith.mulf %155, %141 : vector<1x64xf32>
    %160 = arith.mulf %154, %158 : vector<1x64xf32>
    %161 = arith.addf %159, %160 : vector<1x64xf32>
    %162 = math.tanh %161 : vector<1x64xf32>
    %163 = arith.mulf %156, %162 : vector<1x64xf32>
    %164 = vector.extract_strided_slice %21 {offsets = [7, 0], sizes = [1, 256], strides = [1, 1]} : vector<8x256xf32> to vector<1x256xf32>
    %165 = arith.truncf %163 : vector<1x64xf32> to vector<1x64xbf16>
    %cst_38 = arith.constant dense<0.000000e+00> : vector<1x256xf32>
    %166 = tpu.matmul %165, %13, %cst_38 {dimension_numbers = #tpu.dot_dimension_numbers<[1], [0], [0], [1], [0, 0, 1, 1], [], []>} : vector<1x64xbf16>, vector<64x256xbf16>, vector<1x256xf32> -> vector<1x256xf32>
    %167 = arith.addf %164, %166 : vector<1x256xf32>
    %168 = vector.extract_strided_slice %167 {offsets = [0, 0], sizes = [1, 192], strides = [1, 1]} : vector<1x256xf32> to vector<1x192xf32>
    %169 = arith.negf %168 : vector<1x192xf32>
    %170 = math.exp %169 : vector<1x192xf32>
    %cst_39 = arith.constant 1.000000e+00 : f32
    %171 = vector.broadcast %cst_39 : f32 to vector<1x192xf32>
    %172 = arith.addf %171, %170 : vector<1x192xf32>
    %173 = arith.divf %171, %172 : vector<1x192xf32>
    %174 = vector.extract_strided_slice %173 {offsets = [0, 0], sizes = [1, 64], strides = [1, 1]} : vector<1x192xf32> to vector<1x64xf32>
    %175 = vector.extract_strided_slice %173 {offsets = [0, 64], sizes = [1, 64], strides = [1, 1]} : vector<1x192xf32> to vector<1x64xf32>
    %176 = vector.extract_strided_slice %173 {offsets = [0, 128], sizes = [1, 64], strides = [1, 1]} : vector<1x192xf32> to vector<1x64xf32>
    %177 = vector.extract_strided_slice %167 {offsets = [0, 192], sizes = [1, 64], strides = [1, 1]} : vector<1x256xf32> to vector<1x64xf32>
    %178 = math.tanh %177 : vector<1x64xf32>
    %179 = arith.mulf %175, %161 : vector<1x64xf32>
    %180 = arith.mulf %174, %178 : vector<1x64xf32>
    %181 = arith.addf %179, %180 : vector<1x64xf32>
    %182 = math.tanh %181 : vector<1x64xf32>
    %183 = arith.mulf %176, %182 : vector<1x64xf32>
    %c1 = arith.constant 1 : index
    %c0_40 = arith.constant 0 : index
    %c0_41 = arith.constant 0 : index
    %184 = vector.load %arg10[%c1, %c0_40, %c0_41] : memref<2x64x256xbf16, #tpu.memory_space<vmem>>, vector<1x64x256xbf16>
    %185 = vector.shape_cast %184 : vector<1x64x256xbf16> to vector<64x256xbf16>
    %186 = tpu.concatenate %43, %63, %83, %103, %123, %143, %163, %183 in 0 : vector<1x64xf32>, vector<1x64xf32>, vector<1x64xf32>, vector<1x64xf32>, vector<1x64xf32>, vector<1x64xf32>, vector<1x64xf32>, vector<1x64xf32> -> vector<8x64xf32>
    %c0_42 = arith.constant 0 : index
    %c0_43 = arith.constant 0 : index
    %c0_44 = arith.constant 0 : index
    %187 = vector.load %arg9[%c0_42, %c0_43, %c0_44] : memref<1x64x256xbf16, #tpu.memory_space<vmem>>, vector<1x64x256xbf16>
    %188 = vector.shape_cast %187 : vector<1x64x256xbf16> to vector<64x256xbf16>
    %189 = arith.truncf %186 : vector<8x64xf32> to vector<8x64xbf16>
    %cst_45 = arith.constant dense<0.000000e+00> : vector<8x256xf32>
    %190 = tpu.matmul %189, %188, %cst_45 {dimension_numbers = #tpu.dot_dimension_numbers<[1], [0], [0], [1], [0, 0, 1, 1], [], []>} : vector<8x64xbf16>, vector<64x256xbf16>, vector<8x256xf32> -> vector<8x256xf32>
    %c1_46 = arith.constant 1 : index
    %c0_47 = arith.constant 0 : index
    %c0_48 = arith.constant 0 : index
    %191 = vector.load %arg11[%c1_46, %c0_47, %c0_48] : memref<2x1x256xf32, #tpu.memory_space<vmem>>, vector<1x1x256xf32>
    %192 = vector.shape_cast %191 : vector<1x1x256xf32> to vector<1x256xf32>
    %193 = vector.broadcast %192 : vector<1x256xf32> to vector<8x256xf32>
    %194 = arith.addf %190, %193 : vector<8x256xf32>
    %cst_49 = arith.constant 0.000000e+00 : f32
    %195 = vector.broadcast %cst_49 : f32 to vector<1x64xf32>
    %cst_50 = arith.constant 0.000000e+00 : f32
    %196 = vector.broadcast %cst_50 : f32 to vector<1x64xf32>
    %197 = vector.extract_strided_slice %194 {offsets = [0, 0], sizes = [1, 256], strides = [1, 1]} : vector<8x256xf32> to vector<1x256xf32>
    %198 = arith.truncf %195 : vector<1x64xf32> to vector<1x64xbf16>
    %cst_51 = arith.constant dense<0.000000e+00> : vector<1x256xf32>
    %199 = tpu.matmul %198, %185, %cst_51 {dimension_numbers = #tpu.dot_dimension_numbers<[1], [0], [0], [1], [0, 0, 1, 1], [], []>} : vector<1x64xbf16>, vector<64x256xbf16>, vector<1x256xf32> -> vector<1x256xf32>
    %200 = arith.addf %197, %199 : vector<1x256xf32>
    %201 = vector.extract_strided_slice %200 {offsets = [0, 0], sizes = [1, 192], strides = [1, 1]} : vector<1x256xf32> to vector<1x192xf32>
    %202 = arith.negf %201 : vector<1x192xf32>
    %203 = math.exp %202 : vector<1x192xf32>
    %cst_52 = arith.constant 1.000000e+00 : f32
    %204 = vector.broadcast %cst_52 : f32 to vector<1x192xf32>
    %205 = arith.addf %204, %203 : vector<1x192xf32>
    %206 = arith.divf %204, %205 : vector<1x192xf32>
    %207 = vector.extract_strided_slice %206 {offsets = [0, 0], sizes = [1, 64], strides = [1, 1]} : vector<1x192xf32> to vector<1x64xf32>
    %208 = vector.extract_strided_slice %206 {offsets = [0, 64], sizes = [1, 64], strides = [1, 1]} : vector<1x192xf32> to vector<1x64xf32>
    %209 = vector.extract_strided_slice %206 {offsets = [0, 128], sizes = [1, 64], strides = [1, 1]} : vector<1x192xf32> to vector<1x64xf32>
    %210 = vector.extract_strided_slice %200 {offsets = [0, 192], sizes = [1, 64], strides = [1, 1]} : vector<1x256xf32> to vector<1x64xf32>
    %211 = math.tanh %210 : vector<1x64xf32>
    %212 = arith.mulf %208, %196 : vector<1x64xf32>
    %213 = arith.mulf %207, %211 : vector<1x64xf32>
    %214 = arith.addf %212, %213 : vector<1x64xf32>
    %215 = math.tanh %214 : vector<1x64xf32>
    %216 = arith.mulf %209, %215 : vector<1x64xf32>
    %217 = vector.extract_strided_slice %194 {offsets = [1, 0], sizes = [1, 256], strides = [1, 1]} : vector<8x256xf32> to vector<1x256xf32>
    %218 = arith.truncf %216 : vector<1x64xf32> to vector<1x64xbf16>
    %cst_53 = arith.constant dense<0.000000e+00> : vector<1x256xf32>
    %219 = tpu.matmul %218, %185, %cst_53 {dimension_numbers = #tpu.dot_dimension_numbers<[1], [0], [0], [1], [0, 0, 1, 1], [], []>} : vector<1x64xbf16>, vector<64x256xbf16>, vector<1x256xf32> -> vector<1x256xf32>
    %220 = arith.addf %217, %219 : vector<1x256xf32>
    %221 = vector.extract_strided_slice %220 {offsets = [0, 0], sizes = [1, 192], strides = [1, 1]} : vector<1x256xf32> to vector<1x192xf32>
    %222 = arith.negf %221 : vector<1x192xf32>
    %223 = math.exp %222 : vector<1x192xf32>
    %cst_54 = arith.constant 1.000000e+00 : f32
    %224 = vector.broadcast %cst_54 : f32 to vector<1x192xf32>
    %225 = arith.addf %224, %223 : vector<1x192xf32>
    %226 = arith.divf %224, %225 : vector<1x192xf32>
    %227 = vector.extract_strided_slice %226 {offsets = [0, 0], sizes = [1, 64], strides = [1, 1]} : vector<1x192xf32> to vector<1x64xf32>
    %228 = vector.extract_strided_slice %226 {offsets = [0, 64], sizes = [1, 64], strides = [1, 1]} : vector<1x192xf32> to vector<1x64xf32>
    %229 = vector.extract_strided_slice %226 {offsets = [0, 128], sizes = [1, 64], strides = [1, 1]} : vector<1x192xf32> to vector<1x64xf32>
    %230 = vector.extract_strided_slice %220 {offsets = [0, 192], sizes = [1, 64], strides = [1, 1]} : vector<1x256xf32> to vector<1x64xf32>
    %231 = math.tanh %230 : vector<1x64xf32>
    %232 = arith.mulf %228, %214 : vector<1x64xf32>
    %233 = arith.mulf %227, %231 : vector<1x64xf32>
    %234 = arith.addf %232, %233 : vector<1x64xf32>
    %235 = math.tanh %234 : vector<1x64xf32>
    %236 = arith.mulf %229, %235 : vector<1x64xf32>
    %237 = vector.extract_strided_slice %194 {offsets = [2, 0], sizes = [1, 256], strides = [1, 1]} : vector<8x256xf32> to vector<1x256xf32>
    %238 = arith.truncf %236 : vector<1x64xf32> to vector<1x64xbf16>
    %cst_55 = arith.constant dense<0.000000e+00> : vector<1x256xf32>
    %239 = tpu.matmul %238, %185, %cst_55 {dimension_numbers = #tpu.dot_dimension_numbers<[1], [0], [0], [1], [0, 0, 1, 1], [], []>} : vector<1x64xbf16>, vector<64x256xbf16>, vector<1x256xf32> -> vector<1x256xf32>
    %240 = arith.addf %237, %239 : vector<1x256xf32>
    %241 = vector.extract_strided_slice %240 {offsets = [0, 0], sizes = [1, 192], strides = [1, 1]} : vector<1x256xf32> to vector<1x192xf32>
    %242 = arith.negf %241 : vector<1x192xf32>
    %243 = math.exp %242 : vector<1x192xf32>
    %cst_56 = arith.constant 1.000000e+00 : f32
    %244 = vector.broadcast %cst_56 : f32 to vector<1x192xf32>
    %245 = arith.addf %244, %243 : vector<1x192xf32>
    %246 = arith.divf %244, %245 : vector<1x192xf32>
    %247 = vector.extract_strided_slice %246 {offsets = [0, 0], sizes = [1, 64], strides = [1, 1]} : vector<1x192xf32> to vector<1x64xf32>
    %248 = vector.extract_strided_slice %246 {offsets = [0, 64], sizes = [1, 64], strides = [1, 1]} : vector<1x192xf32> to vector<1x64xf32>
    %249 = vector.extract_strided_slice %246 {offsets = [0, 128], sizes = [1, 64], strides = [1, 1]} : vector<1x192xf32> to vector<1x64xf32>
    %250 = vector.extract_strided_slice %240 {offsets = [0, 192], sizes = [1, 64], strides = [1, 1]} : vector<1x256xf32> to vector<1x64xf32>
    %251 = math.tanh %250 : vector<1x64xf32>
    %252 = arith.mulf %248, %234 : vector<1x64xf32>
    %253 = arith.mulf %247, %251 : vector<1x64xf32>
    %254 = arith.addf %252, %253 : vector<1x64xf32>
    %255 = math.tanh %254 : vector<1x64xf32>
    %256 = arith.mulf %249, %255 : vector<1x64xf32>
    %257 = vector.extract_strided_slice %194 {offsets = [3, 0], sizes = [1, 256], strides = [1, 1]} : vector<8x256xf32> to vector<1x256xf32>
    %258 = arith.truncf %256 : vector<1x64xf32> to vector<1x64xbf16>
    %cst_57 = arith.constant dense<0.000000e+00> : vector<1x256xf32>
    %259 = tpu.matmul %258, %185, %cst_57 {dimension_numbers = #tpu.dot_dimension_numbers<[1], [0], [0], [1], [0, 0, 1, 1], [], []>} : vector<1x64xbf16>, vector<64x256xbf16>, vector<1x256xf32> -> vector<1x256xf32>
    %260 = arith.addf %257, %259 : vector<1x256xf32>
    %261 = vector.extract_strided_slice %260 {offsets = [0, 0], sizes = [1, 192], strides = [1, 1]} : vector<1x256xf32> to vector<1x192xf32>
    %262 = arith.negf %261 : vector<1x192xf32>
    %263 = math.exp %262 : vector<1x192xf32>
    %cst_58 = arith.constant 1.000000e+00 : f32
    %264 = vector.broadcast %cst_58 : f32 to vector<1x192xf32>
    %265 = arith.addf %264, %263 : vector<1x192xf32>
    %266 = arith.divf %264, %265 : vector<1x192xf32>
    %267 = vector.extract_strided_slice %266 {offsets = [0, 0], sizes = [1, 64], strides = [1, 1]} : vector<1x192xf32> to vector<1x64xf32>
    %268 = vector.extract_strided_slice %266 {offsets = [0, 64], sizes = [1, 64], strides = [1, 1]} : vector<1x192xf32> to vector<1x64xf32>
    %269 = vector.extract_strided_slice %266 {offsets = [0, 128], sizes = [1, 64], strides = [1, 1]} : vector<1x192xf32> to vector<1x64xf32>
    %270 = vector.extract_strided_slice %260 {offsets = [0, 192], sizes = [1, 64], strides = [1, 1]} : vector<1x256xf32> to vector<1x64xf32>
    %271 = math.tanh %270 : vector<1x64xf32>
    %272 = arith.mulf %268, %254 : vector<1x64xf32>
    %273 = arith.mulf %267, %271 : vector<1x64xf32>
    %274 = arith.addf %272, %273 : vector<1x64xf32>
    %275 = math.tanh %274 : vector<1x64xf32>
    %276 = arith.mulf %269, %275 : vector<1x64xf32>
    %277 = vector.extract_strided_slice %194 {offsets = [4, 0], sizes = [1, 256], strides = [1, 1]} : vector<8x256xf32> to vector<1x256xf32>
    %278 = arith.truncf %276 : vector<1x64xf32> to vector<1x64xbf16>
    %cst_59 = arith.constant dense<0.000000e+00> : vector<1x256xf32>
    %279 = tpu.matmul %278, %185, %cst_59 {dimension_numbers = #tpu.dot_dimension_numbers<[1], [0], [0], [1], [0, 0, 1, 1], [], []>} : vector<1x64xbf16>, vector<64x256xbf16>, vector<1x256xf32> -> vector<1x256xf32>
    %280 = arith.addf %277, %279 : vector<1x256xf32>
    %281 = vector.extract_strided_slice %280 {offsets = [0, 0], sizes = [1, 192], strides = [1, 1]} : vector<1x256xf32> to vector<1x192xf32>
    %282 = arith.negf %281 : vector<1x192xf32>
    %283 = math.exp %282 : vector<1x192xf32>
    %cst_60 = arith.constant 1.000000e+00 : f32
    %284 = vector.broadcast %cst_60 : f32 to vector<1x192xf32>
    %285 = arith.addf %284, %283 : vector<1x192xf32>
    %286 = arith.divf %284, %285 : vector<1x192xf32>
    %287 = vector.extract_strided_slice %286 {offsets = [0, 0], sizes = [1, 64], strides = [1, 1]} : vector<1x192xf32> to vector<1x64xf32>
    %288 = vector.extract_strided_slice %286 {offsets = [0, 64], sizes = [1, 64], strides = [1, 1]} : vector<1x192xf32> to vector<1x64xf32>
    %289 = vector.extract_strided_slice %286 {offsets = [0, 128], sizes = [1, 64], strides = [1, 1]} : vector<1x192xf32> to vector<1x64xf32>
    %290 = vector.extract_strided_slice %280 {offsets = [0, 192], sizes = [1, 64], strides = [1, 1]} : vector<1x256xf32> to vector<1x64xf32>
    %291 = math.tanh %290 : vector<1x64xf32>
    %292 = arith.mulf %288, %274 : vector<1x64xf32>
    %293 = arith.mulf %287, %291 : vector<1x64xf32>
    %294 = arith.addf %292, %293 : vector<1x64xf32>
    %295 = math.tanh %294 : vector<1x64xf32>
    %296 = arith.mulf %289, %295 : vector<1x64xf32>
    %297 = vector.extract_strided_slice %194 {offsets = [5, 0], sizes = [1, 256], strides = [1, 1]} : vector<8x256xf32> to vector<1x256xf32>
    %298 = arith.truncf %296 : vector<1x64xf32> to vector<1x64xbf16>
    %cst_61 = arith.constant dense<0.000000e+00> : vector<1x256xf32>
    %299 = tpu.matmul %298, %185, %cst_61 {dimension_numbers = #tpu.dot_dimension_numbers<[1], [0], [0], [1], [0, 0, 1, 1], [], []>} : vector<1x64xbf16>, vector<64x256xbf16>, vector<1x256xf32> -> vector<1x256xf32>
    %300 = arith.addf %297, %299 : vector<1x256xf32>
    %301 = vector.extract_strided_slice %300 {offsets = [0, 0], sizes = [1, 192], strides = [1, 1]} : vector<1x256xf32> to vector<1x192xf32>
    %302 = arith.negf %301 : vector<1x192xf32>
    %303 = math.exp %302 : vector<1x192xf32>
    %cst_62 = arith.constant 1.000000e+00 : f32
    %304 = vector.broadcast %cst_62 : f32 to vector<1x192xf32>
    %305 = arith.addf %304, %303 : vector<1x192xf32>
    %306 = arith.divf %304, %305 : vector<1x192xf32>
    %307 = vector.extract_strided_slice %306 {offsets = [0, 0], sizes = [1, 64], strides = [1, 1]} : vector<1x192xf32> to vector<1x64xf32>
    %308 = vector.extract_strided_slice %306 {offsets = [0, 64], sizes = [1, 64], strides = [1, 1]} : vector<1x192xf32> to vector<1x64xf32>
    %309 = vector.extract_strided_slice %306 {offsets = [0, 128], sizes = [1, 64], strides = [1, 1]} : vector<1x192xf32> to vector<1x64xf32>
    %310 = vector.extract_strided_slice %300 {offsets = [0, 192], sizes = [1, 64], strides = [1, 1]} : vector<1x256xf32> to vector<1x64xf32>
    %311 = math.tanh %310 : vector<1x64xf32>
    %312 = arith.mulf %308, %294 : vector<1x64xf32>
    %313 = arith.mulf %307, %311 : vector<1x64xf32>
    %314 = arith.addf %312, %313 : vector<1x64xf32>
    %315 = math.tanh %314 : vector<1x64xf32>
    %316 = arith.mulf %309, %315 : vector<1x64xf32>
    %317 = vector.extract_strided_slice %194 {offsets = [6, 0], sizes = [1, 256], strides = [1, 1]} : vector<8x256xf32> to vector<1x256xf32>
    %318 = arith.truncf %316 : vector<1x64xf32> to vector<1x64xbf16>
    %cst_63 = arith.constant dense<0.000000e+00> : vector<1x256xf32>
    %319 = tpu.matmul %318, %185, %cst_63 {dimension_numbers = #tpu.dot_dimension_numbers<[1], [0], [0], [1], [0, 0, 1, 1], [], []>} : vector<1x64xbf16>, vector<64x256xbf16>, vector<1x256xf32> -> vector<1x256xf32>
    %320 = arith.addf %317, %319 : vector<1x256xf32>
    %321 = vector.extract_strided_slice %320 {offsets = [0, 0], sizes = [1, 192], strides = [1, 1]} : vector<1x256xf32> to vector<1x192xf32>
    %322 = arith.negf %321 : vector<1x192xf32>
    %323 = math.exp %322 : vector<1x192xf32>
    %cst_64 = arith.constant 1.000000e+00 : f32
    %324 = vector.broadcast %cst_64 : f32 to vector<1x192xf32>
    %325 = arith.addf %324, %323 : vector<1x192xf32>
    %326 = arith.divf %324, %325 : vector<1x192xf32>
    %327 = vector.extract_strided_slice %326 {offsets = [0, 0], sizes = [1, 64], strides = [1, 1]} : vector<1x192xf32> to vector<1x64xf32>
    %328 = vector.extract_strided_slice %326 {offsets = [0, 64], sizes = [1, 64], strides = [1, 1]} : vector<1x192xf32> to vector<1x64xf32>
    %329 = vector.extract_strided_slice %326 {offsets = [0, 128], sizes = [1, 64], strides = [1, 1]} : vector<1x192xf32> to vector<1x64xf32>
    %330 = vector.extract_strided_slice %320 {offsets = [0, 192], sizes = [1, 64], strides = [1, 1]} : vector<1x256xf32> to vector<1x64xf32>
    %331 = math.tanh %330 : vector<1x64xf32>
    %332 = arith.mulf %328, %314 : vector<1x64xf32>
    %333 = arith.mulf %327, %331 : vector<1x64xf32>
    %334 = arith.addf %332, %333 : vector<1x64xf32>
    %335 = math.tanh %334 : vector<1x64xf32>
    %336 = arith.mulf %329, %335 : vector<1x64xf32>
    %337 = vector.extract_strided_slice %194 {offsets = [7, 0], sizes = [1, 256], strides = [1, 1]} : vector<8x256xf32> to vector<1x256xf32>
    %338 = arith.truncf %336 : vector<1x64xf32> to vector<1x64xbf16>
    %cst_65 = arith.constant dense<0.000000e+00> : vector<1x256xf32>
    %339 = tpu.matmul %338, %185, %cst_65 {dimension_numbers = #tpu.dot_dimension_numbers<[1], [0], [0], [1], [0, 0, 1, 1], [], []>} : vector<1x64xbf16>, vector<64x256xbf16>, vector<1x256xf32> -> vector<1x256xf32>
    %340 = arith.addf %337, %339 : vector<1x256xf32>
    %341 = vector.extract_strided_slice %340 {offsets = [0, 0], sizes = [1, 192], strides = [1, 1]} : vector<1x256xf32> to vector<1x192xf32>
    %342 = arith.negf %341 : vector<1x192xf32>
    %343 = math.exp %342 : vector<1x192xf32>
    %cst_66 = arith.constant 1.000000e+00 : f32
    %344 = vector.broadcast %cst_66 : f32 to vector<1x192xf32>
    %345 = arith.addf %344, %343 : vector<1x192xf32>
    %346 = arith.divf %344, %345 : vector<1x192xf32>
    %347 = vector.extract_strided_slice %346 {offsets = [0, 0], sizes = [1, 64], strides = [1, 1]} : vector<1x192xf32> to vector<1x64xf32>
    %348 = vector.extract_strided_slice %346 {offsets = [0, 64], sizes = [1, 64], strides = [1, 1]} : vector<1x192xf32> to vector<1x64xf32>
    %349 = vector.extract_strided_slice %346 {offsets = [0, 128], sizes = [1, 64], strides = [1, 1]} : vector<1x192xf32> to vector<1x64xf32>
    %350 = vector.extract_strided_slice %340 {offsets = [0, 192], sizes = [1, 64], strides = [1, 1]} : vector<1x256xf32> to vector<1x64xf32>
    %351 = math.tanh %350 : vector<1x64xf32>
    %352 = arith.mulf %348, %334 : vector<1x64xf32>
    %353 = arith.mulf %347, %351 : vector<1x64xf32>
    %354 = arith.addf %352, %353 : vector<1x64xf32>
    %355 = math.tanh %354 : vector<1x64xf32>
    %356 = arith.mulf %349, %355 : vector<1x64xf32>
    %c0_67 = arith.constant 0 : index
    %c0_68 = arith.constant 0 : index
    %357 = vector.load %arg12[%c0_67, %c0_68] : memref<64x96xbf16, #tpu.memory_space<vmem>>, vector<64x96xbf16>
    %358 = arith.truncf %356 : vector<1x64xf32> to vector<1x64xbf16>
    %cst_69 = arith.constant dense<0.000000e+00> : vector<1x96xf32>
    %359 = tpu.matmul %358, %357, %cst_69 {dimension_numbers = #tpu.dot_dimension_numbers<[1], [0], [0], [1], [0, 0, 1, 1], [], []>} : vector<1x64xbf16>, vector<64x96xbf16>, vector<1x96xf32> -> vector<1x96xf32>
    %c0_70 = arith.constant 0 : index
    %c0_71 = arith.constant 0 : index
    %360 = vector.load %arg13[%c0_70, %c0_71] : memref<1x96xf32, #tpu.memory_space<vmem>>, vector<1x96xf32>
    %361 = arith.addf %359, %360 : vector<1x96xf32>
    %362 = vector.extract_strided_slice %361 {offsets = [0, 0], sizes = [1, 32], strides = [1, 1]} : vector<1x96xf32> to vector<1x32xf32>
    %363 = vector.extract_strided_slice %361 {offsets = [0, 32], sizes = [1, 32], strides = [1, 1]} : vector<1x96xf32> to vector<1x32xf32>
    %364 = vector.extract_strided_slice %361 {offsets = [0, 64], sizes = [1, 32], strides = [1, 1]} : vector<1x96xf32> to vector<1x32xf32>
    %365 = tpu.concatenate %5, %362, %363, %11, %364 in 0 : vector<1x32xf32>, vector<1x32xf32>, vector<1x32xf32>, vector<1x32xf32>, vector<1x32xf32> -> vector<5x32xf32>
    %c0_72 = arith.constant 0 : index
    %c0_73 = arith.constant 0 : index
    %c0_74 = arith.constant 0 : index
    %366 = vector.load %arg14[%c0_72, %c0_73, %c0_74] : memref<2x32x96xbf16, #tpu.memory_space<vmem>>, vector<1x32x96xbf16>
    %367 = vector.shape_cast %366 : vector<1x32x96xbf16> to vector<32x96xbf16>
    %368 = arith.truncf %365 : vector<5x32xf32> to vector<5x32xbf16>
    %cst_75 = arith.constant dense<0.000000e+00> : vector<5x96xf32>
    %369 = tpu.matmul %368, %367, %cst_75 {dimension_numbers = #tpu.dot_dimension_numbers<[1], [0], [0], [1], [0, 0, 1, 1], [], []>} : vector<5x32xbf16>, vector<32x96xbf16>, vector<5x96xf32> -> vector<5x96xf32>
    %c0_76 = arith.constant 0 : index
    %c0_77 = arith.constant 0 : index
    %c0_78 = arith.constant 0 : index
    %370 = vector.load %arg15[%c0_76, %c0_77, %c0_78] : memref<2x1x96xf32, #tpu.memory_space<vmem>>, vector<1x1x96xf32>
    %371 = vector.shape_cast %370 : vector<1x1x96xf32> to vector<1x96xf32>
    %372 = vector.broadcast %371 : vector<1x96xf32> to vector<5x96xf32>
    %373 = arith.addf %369, %372 : vector<5x96xf32>
    %374 = vector.extract_strided_slice %373 {offsets = [0, 0], sizes = [5, 32], strides = [1, 1]} : vector<5x96xf32> to vector<5x32xf32>
    %cst_79 = arith.constant 0.353553385 : f32
    %375 = vector.broadcast %cst_79 : f32 to vector<5x32xf32>
    %376 = arith.mulf %374, %375 : vector<5x32xf32>
    %377 = arith.truncf %376 : vector<5x32xf32> to vector<5x32xbf16>
    %378 = vector.extract_strided_slice %373 {offsets = [0, 32], sizes = [5, 32], strides = [1, 1]} : vector<5x96xf32> to vector<5x32xf32>
    %379 = arith.truncf %378 : vector<5x32xf32> to vector<5x32xbf16>
    %380 = vector.extract_strided_slice %373 {offsets = [0, 64], sizes = [5, 32], strides = [1, 1]} : vector<5x96xf32> to vector<5x32xf32>
    %381 = arith.truncf %380 : vector<5x32xf32> to vector<5x32xbf16>
    %c0_80 = arith.constant 0 : index
    %c0_81 = arith.constant 0 : index
    %c0_82 = arith.constant 0 : index
    %382 = vector.load %arg16[%c0_80, %c0_81, %c0_82] : memref<2x32x32xbf16, #tpu.memory_space<vmem>>, vector<1x32x32xbf16>
    %383 = vector.shape_cast %382 : vector<1x32x32xbf16> to vector<32x32xbf16>
    %cst_83 = arith.constant 0.000000e+00 : f32
    %384 = vector.broadcast %cst_83 : f32 to vector<5x32xf32>
    %385 = vector.extract_strided_slice %377 {offsets = [0, 0], sizes = [5, 8], strides = [1, 1]} : vector<5x32xbf16> to vector<5x8xbf16>
    %386 = vector.extract_strided_slice %379 {offsets = [0, 0], sizes = [5, 8], strides = [1, 1]} : vector<5x32xbf16> to vector<5x8xbf16>
    %cst_84 = arith.constant dense<0.000000e+00> : vector<5x5xf32>
    %387 = tpu.matmul %385, %386, %cst_84 {dimension_numbers = #tpu.dot_dimension_numbers<[1], [1], [0], [0], [0, 0, 1, 0], [], []>} : vector<5x8xbf16>, vector<5x8xbf16>, vector<5x5xf32> -> vector<5x5xf32>
    %cst_85 = arith.constant dense<0xFF800000> : vector<5xf32>
    %388 = vector.multi_reduction <maximumf>, %387, %cst_85 [1] : vector<5x5xf32> to vector<5xf32>
    %389 = vector.shape_cast %388 : vector<5xf32> to vector<5x1xf32>
    %390 = vector.broadcast %389 : vector<5x1xf32> to vector<5x5xf32>
    %391 = arith.subf %387, %390 : vector<5x5xf32>
    %392 = math.exp %391 : vector<5x5xf32>
    %cst_86 = arith.constant dense<0.000000e+00> : vector<5xf32>
    %393 = vector.multi_reduction <add>, %392, %cst_86 [1] : vector<5x5xf32> to vector<5xf32>
    %394 = vector.shape_cast %393 : vector<5xf32> to vector<5x1xf32>
    %395 = tpu.reciprocal %394 {approx = true} : vector<5x1xf32> -> vector<5x1xf32>
    %396 = vector.broadcast %395 : vector<5x1xf32> to vector<5x5xf32>
    %397 = arith.mulf %392, %396 : vector<5x5xf32>
    %398 = vector.extract_strided_slice %381 {offsets = [0, 0], sizes = [5, 8], strides = [1, 1]} : vector<5x32xbf16> to vector<5x8xbf16>
    %399 = arith.truncf %397 : vector<5x5xf32> to vector<5x5xbf16>
    %cst_87 = arith.constant dense<0.000000e+00> : vector<5x8xf32>
    %400 = tpu.matmul %399, %398, %cst_87 {dimension_numbers = #tpu.dot_dimension_numbers<[1], [0], [0], [1], [0, 0, 1, 1], [], []>} : vector<5x5xbf16>, vector<5x8xbf16>, vector<5x8xf32> -> vector<5x8xf32>
    %401 = vector.extract_strided_slice %383 {offsets = [0, 0], sizes = [8, 32], strides = [1, 1]} : vector<32x32xbf16> to vector<8x32xbf16>
    %402 = arith.truncf %400 : vector<5x8xf32> to vector<5x8xbf16>
    %cst_88 = arith.constant dense<0.000000e+00> : vector<5x32xf32>
    %403 = tpu.matmul %402, %401, %cst_88 {dimension_numbers = #tpu.dot_dimension_numbers<[1], [0], [0], [1], [0, 0, 1, 1], [], []>} : vector<5x8xbf16>, vector<8x32xbf16>, vector<5x32xf32> -> vector<5x32xf32>
    %404 = arith.addf %384, %403 : vector<5x32xf32>
    %405 = vector.extract_strided_slice %377 {offsets = [0, 8], sizes = [5, 8], strides = [1, 1]} : vector<5x32xbf16> to vector<5x8xbf16>
    %406 = vector.extract_strided_slice %379 {offsets = [0, 8], sizes = [5, 8], strides = [1, 1]} : vector<5x32xbf16> to vector<5x8xbf16>
    %cst_89 = arith.constant dense<0.000000e+00> : vector<5x5xf32>
    %407 = tpu.matmul %405, %406, %cst_89 {dimension_numbers = #tpu.dot_dimension_numbers<[1], [1], [0], [0], [0, 0, 1, 0], [], []>} : vector<5x8xbf16>, vector<5x8xbf16>, vector<5x5xf32> -> vector<5x5xf32>
    %cst_90 = arith.constant dense<0xFF800000> : vector<5xf32>
    %408 = vector.multi_reduction <maximumf>, %407, %cst_90 [1] : vector<5x5xf32> to vector<5xf32>
    %409 = vector.shape_cast %408 : vector<5xf32> to vector<5x1xf32>
    %410 = vector.broadcast %409 : vector<5x1xf32> to vector<5x5xf32>
    %411 = arith.subf %407, %410 : vector<5x5xf32>
    %412 = math.exp %411 : vector<5x5xf32>
    %cst_91 = arith.constant dense<0.000000e+00> : vector<5xf32>
    %413 = vector.multi_reduction <add>, %412, %cst_91 [1] : vector<5x5xf32> to vector<5xf32>
    %414 = vector.shape_cast %413 : vector<5xf32> to vector<5x1xf32>
    %415 = tpu.reciprocal %414 {approx = true} : vector<5x1xf32> -> vector<5x1xf32>
    %416 = vector.broadcast %415 : vector<5x1xf32> to vector<5x5xf32>
    %417 = arith.mulf %412, %416 : vector<5x5xf32>
    %418 = vector.extract_strided_slice %381 {offsets = [0, 8], sizes = [5, 8], strides = [1, 1]} : vector<5x32xbf16> to vector<5x8xbf16>
    %419 = arith.truncf %417 : vector<5x5xf32> to vector<5x5xbf16>
    %cst_92 = arith.constant dense<0.000000e+00> : vector<5x8xf32>
    %420 = tpu.matmul %419, %418, %cst_92 {dimension_numbers = #tpu.dot_dimension_numbers<[1], [0], [0], [1], [0, 0, 1, 1], [], []>} : vector<5x5xbf16>, vector<5x8xbf16>, vector<5x8xf32> -> vector<5x8xf32>
    %421 = vector.extract_strided_slice %383 {offsets = [8, 0], sizes = [8, 32], strides = [1, 1]} : vector<32x32xbf16> to vector<8x32xbf16>
    %422 = arith.truncf %420 : vector<5x8xf32> to vector<5x8xbf16>
    %cst_93 = arith.constant dense<0.000000e+00> : vector<5x32xf32>
    %423 = tpu.matmul %422, %421, %cst_93 {dimension_numbers = #tpu.dot_dimension_numbers<[1], [0], [0], [1], [0, 0, 1, 1], [], []>} : vector<5x8xbf16>, vector<8x32xbf16>, vector<5x32xf32> -> vector<5x32xf32>
    %424 = arith.addf %404, %423 : vector<5x32xf32>
    %425 = vector.extract_strided_slice %377 {offsets = [0, 16], sizes = [5, 8], strides = [1, 1]} : vector<5x32xbf16> to vector<5x8xbf16>
    %426 = vector.extract_strided_slice %379 {offsets = [0, 16], sizes = [5, 8], strides = [1, 1]} : vector<5x32xbf16> to vector<5x8xbf16>
    %cst_94 = arith.constant dense<0.000000e+00> : vector<5x5xf32>
    %427 = tpu.matmul %425, %426, %cst_94 {dimension_numbers = #tpu.dot_dimension_numbers<[1], [1], [0], [0], [0, 0, 1, 0], [], []>} : vector<5x8xbf16>, vector<5x8xbf16>, vector<5x5xf32> -> vector<5x5xf32>
    %cst_95 = arith.constant dense<0xFF800000> : vector<5xf32>
    %428 = vector.multi_reduction <maximumf>, %427, %cst_95 [1] : vector<5x5xf32> to vector<5xf32>
    %429 = vector.shape_cast %428 : vector<5xf32> to vector<5x1xf32>
    %430 = vector.broadcast %429 : vector<5x1xf32> to vector<5x5xf32>
    %431 = arith.subf %427, %430 : vector<5x5xf32>
    %432 = math.exp %431 : vector<5x5xf32>
    %cst_96 = arith.constant dense<0.000000e+00> : vector<5xf32>
    %433 = vector.multi_reduction <add>, %432, %cst_96 [1] : vector<5x5xf32> to vector<5xf32>
    %434 = vector.shape_cast %433 : vector<5xf32> to vector<5x1xf32>
    %435 = tpu.reciprocal %434 {approx = true} : vector<5x1xf32> -> vector<5x1xf32>
    %436 = vector.broadcast %435 : vector<5x1xf32> to vector<5x5xf32>
    %437 = arith.mulf %432, %436 : vector<5x5xf32>
    %438 = vector.extract_strided_slice %381 {offsets = [0, 16], sizes = [5, 8], strides = [1, 1]} : vector<5x32xbf16> to vector<5x8xbf16>
    %439 = arith.truncf %437 : vector<5x5xf32> to vector<5x5xbf16>
    %cst_97 = arith.constant dense<0.000000e+00> : vector<5x8xf32>
    %440 = tpu.matmul %439, %438, %cst_97 {dimension_numbers = #tpu.dot_dimension_numbers<[1], [0], [0], [1], [0, 0, 1, 1], [], []>} : vector<5x5xbf16>, vector<5x8xbf16>, vector<5x8xf32> -> vector<5x8xf32>
    %441 = vector.extract_strided_slice %383 {offsets = [16, 0], sizes = [8, 32], strides = [1, 1]} : vector<32x32xbf16> to vector<8x32xbf16>
    %442 = arith.truncf %440 : vector<5x8xf32> to vector<5x8xbf16>
    %cst_98 = arith.constant dense<0.000000e+00> : vector<5x32xf32>
    %443 = tpu.matmul %442, %441, %cst_98 {dimension_numbers = #tpu.dot_dimension_numbers<[1], [0], [0], [1], [0, 0, 1, 1], [], []>} : vector<5x8xbf16>, vector<8x32xbf16>, vector<5x32xf32> -> vector<5x32xf32>
    %444 = arith.addf %424, %443 : vector<5x32xf32>
    %445 = vector.extract_strided_slice %377 {offsets = [0, 24], sizes = [5, 8], strides = [1, 1]} : vector<5x32xbf16> to vector<5x8xbf16>
    %446 = vector.extract_strided_slice %379 {offsets = [0, 24], sizes = [5, 8], strides = [1, 1]} : vector<5x32xbf16> to vector<5x8xbf16>
    %cst_99 = arith.constant dense<0.000000e+00> : vector<5x5xf32>
    %447 = tpu.matmul %445, %446, %cst_99 {dimension_numbers = #tpu.dot_dimension_numbers<[1], [1], [0], [0], [0, 0, 1, 0], [], []>} : vector<5x8xbf16>, vector<5x8xbf16>, vector<5x5xf32> -> vector<5x5xf32>
    %cst_100 = arith.constant dense<0xFF800000> : vector<5xf32>
    %448 = vector.multi_reduction <maximumf>, %447, %cst_100 [1] : vector<5x5xf32> to vector<5xf32>
    %449 = vector.shape_cast %448 : vector<5xf32> to vector<5x1xf32>
    %450 = vector.broadcast %449 : vector<5x1xf32> to vector<5x5xf32>
    %451 = arith.subf %447, %450 : vector<5x5xf32>
    %452 = math.exp %451 : vector<5x5xf32>
    %cst_101 = arith.constant dense<0.000000e+00> : vector<5xf32>
    %453 = vector.multi_reduction <add>, %452, %cst_101 [1] : vector<5x5xf32> to vector<5xf32>
    %454 = vector.shape_cast %453 : vector<5xf32> to vector<5x1xf32>
    %455 = tpu.reciprocal %454 {approx = true} : vector<5x1xf32> -> vector<5x1xf32>
    %456 = vector.broadcast %455 : vector<5x1xf32> to vector<5x5xf32>
    %457 = arith.mulf %452, %456 : vector<5x5xf32>
    %458 = vector.extract_strided_slice %381 {offsets = [0, 24], sizes = [5, 8], strides = [1, 1]} : vector<5x32xbf16> to vector<5x8xbf16>
    %459 = arith.truncf %457 : vector<5x5xf32> to vector<5x5xbf16>
    %cst_102 = arith.constant dense<0.000000e+00> : vector<5x8xf32>
    %460 = tpu.matmul %459, %458, %cst_102 {dimension_numbers = #tpu.dot_dimension_numbers<[1], [0], [0], [1], [0, 0, 1, 1], [], []>} : vector<5x5xbf16>, vector<5x8xbf16>, vector<5x8xf32> -> vector<5x8xf32>
    %461 = vector.extract_strided_slice %383 {offsets = [24, 0], sizes = [8, 32], strides = [1, 1]} : vector<32x32xbf16> to vector<8x32xbf16>
    %462 = arith.truncf %460 : vector<5x8xf32> to vector<5x8xbf16>
    %cst_103 = arith.constant dense<0.000000e+00> : vector<5x32xf32>
    %463 = tpu.matmul %462, %461, %cst_103 {dimension_numbers = #tpu.dot_dimension_numbers<[1], [0], [0], [1], [0, 0, 1, 1], [], []>} : vector<5x8xbf16>, vector<8x32xbf16>, vector<5x32xf32> -> vector<5x32xf32>
    %464 = arith.addf %444, %463 : vector<5x32xf32>
    %c0_104 = arith.constant 0 : index
    %c0_105 = arith.constant 0 : index
    %c0_106 = arith.constant 0 : index
    %465 = vector.load %arg17[%c0_104, %c0_105, %c0_106] : memref<2x1x32xf32, #tpu.memory_space<vmem>>, vector<1x1x32xf32>
    %466 = vector.shape_cast %465 : vector<1x1x32xf32> to vector<1x32xf32>
    %467 = vector.broadcast %466 : vector<1x32xf32> to vector<5x32xf32>
    %468 = arith.addf %464, %467 : vector<5x32xf32>
    %469 = arith.addf %365, %468 : vector<5x32xf32>
    %c0_107 = arith.constant 0 : index
    %c0_108 = arith.constant 0 : index
    %c0_109 = arith.constant 0 : index
    %470 = vector.load %arg18[%c0_107, %c0_108, %c0_109] : memref<2x1x32xf32, #tpu.memory_space<vmem>>, vector<1x1x32xf32>
    %471 = vector.shape_cast %470 : vector<1x1x32xf32> to vector<1x32xf32>
    %c0_110 = arith.constant 0 : index
    %c0_111 = arith.constant 0 : index
    %c0_112 = arith.constant 0 : index
    %472 = vector.load %arg19[%c0_110, %c0_111, %c0_112] : memref<2x1x32xf32, #tpu.memory_space<vmem>>, vector<1x1x32xf32>
    %473 = vector.shape_cast %472 : vector<1x1x32xf32> to vector<1x32xf32>
    %cst_113 = arith.constant dense<0.000000e+00> : vector<5xf32>
    %474 = vector.multi_reduction <add>, %469, %cst_113 [1] : vector<5x32xf32> to vector<5xf32>
    %475 = vector.shape_cast %474 : vector<5xf32> to vector<5x1xf32>
    %476 = arith.mulf %469, %469 : vector<5x32xf32>
    %cst_114 = arith.constant dense<0.000000e+00> : vector<5xf32>
    %477 = vector.multi_reduction <add>, %476, %cst_114 [1] : vector<5x32xf32> to vector<5xf32>
    %478 = vector.shape_cast %477 : vector<5xf32> to vector<5x1xf32>
    %cst_115 = arith.constant 3.125000e-02 : f32
    %479 = vector.broadcast %cst_115 : f32 to vector<5x1xf32>
    %480 = arith.mulf %475, %479 : vector<5x1xf32>
    %cst_116 = arith.constant 3.125000e-02 : f32
    %481 = vector.broadcast %cst_116 : f32 to vector<5x1xf32>
    %482 = arith.mulf %478, %481 : vector<5x1xf32>
    %483 = arith.mulf %480, %480 : vector<5x1xf32>
    %484 = arith.subf %482, %483 : vector<5x1xf32>
    %485 = vector.broadcast %480 : vector<5x1xf32> to vector<5x32xf32>
    %486 = arith.subf %469, %485 : vector<5x32xf32>
    %cst_117 = arith.constant 9.99999974E-6 : f32
    %487 = vector.broadcast %cst_117 : f32 to vector<5x1xf32>
    %488 = arith.addf %484, %487 : vector<5x1xf32>
    %489 = math.rsqrt %488 : vector<5x1xf32>
    %490 = vector.broadcast %489 : vector<5x1xf32> to vector<5x32xf32>
    %491 = arith.mulf %486, %490 : vector<5x32xf32>
    %492 = vector.broadcast %471 : vector<1x32xf32> to vector<5x32xf32>
    %493 = arith.mulf %491, %492 : vector<5x32xf32>
    %494 = vector.broadcast %473 : vector<1x32xf32> to vector<5x32xf32>
    %495 = arith.addf %493, %494 : vector<5x32xf32>
    %c0_118 = arith.constant 0 : index
    %c0_119 = arith.constant 0 : index
    %c0_120 = arith.constant 0 : index
    %496 = vector.load %arg20[%c0_118, %c0_119, %c0_120] : memref<2x32x2048xbf16, #tpu.memory_space<vmem>>, vector<1x32x2048xbf16>
    %497 = vector.shape_cast %496 : vector<1x32x2048xbf16> to vector<32x2048xbf16>
    %498 = arith.truncf %495 : vector<5x32xf32> to vector<5x32xbf16>
    %cst_121 = arith.constant dense<0.000000e+00> : vector<5x2048xf32>
    %499 = tpu.matmul %498, %497, %cst_121 {dimension_numbers = #tpu.dot_dimension_numbers<[1], [0], [0], [1], [0, 0, 1, 1], [], []>} : vector<5x32xbf16>, vector<32x2048xbf16>, vector<5x2048xf32> -> vector<5x2048xf32>
    %c0_122 = arith.constant 0 : index
    %c0_123 = arith.constant 0 : index
    %c0_124 = arith.constant 0 : index
    %500 = vector.load %arg21[%c0_122, %c0_123, %c0_124] : memref<2x1x2048xf32, #tpu.memory_space<vmem>>, vector<1x1x2048xf32>
    %501 = vector.shape_cast %500 : vector<1x1x2048xf32> to vector<1x2048xf32>
    %502 = vector.broadcast %501 : vector<1x2048xf32> to vector<5x2048xf32>
    %503 = arith.addf %499, %502 : vector<5x2048xf32>
    %cst_125 = arith.constant 0.000000e+00 : f32
    %504 = vector.broadcast %cst_125 : f32 to vector<5x2048xf32>
    %505 = arith.maximumf %503, %504 : vector<5x2048xf32>
    %c0_126 = arith.constant 0 : index
    %c0_127 = arith.constant 0 : index
    %c0_128 = arith.constant 0 : index
    %506 = vector.load %arg22[%c0_126, %c0_127, %c0_128] : memref<2x2048x32xbf16, #tpu.memory_space<vmem>>, vector<1x2048x32xbf16>
    %507 = vector.shape_cast %506 : vector<1x2048x32xbf16> to vector<2048x32xbf16>
    %508 = arith.truncf %505 : vector<5x2048xf32> to vector<5x2048xbf16>
    %cst_129 = arith.constant dense<0.000000e+00> : vector<5x32xf32>
    %509 = tpu.matmul %508, %507, %cst_129 {dimension_numbers = #tpu.dot_dimension_numbers<[1], [0], [0], [1], [0, 0, 1, 1], [], []>} : vector<5x2048xbf16>, vector<2048x32xbf16>, vector<5x32xf32> -> vector<5x32xf32>
    %c0_130 = arith.constant 0 : index
    %c0_131 = arith.constant 0 : index
    %c0_132 = arith.constant 0 : index
    %510 = vector.load %arg23[%c0_130, %c0_131, %c0_132] : memref<2x1x32xf32, #tpu.memory_space<vmem>>, vector<1x1x32xf32>
    %511 = vector.shape_cast %510 : vector<1x1x32xf32> to vector<1x32xf32>
    %512 = vector.broadcast %511 : vector<1x32xf32> to vector<5x32xf32>
    %513 = arith.addf %509, %512 : vector<5x32xf32>
    %514 = arith.addf %495, %513 : vector<5x32xf32>
    %c0_133 = arith.constant 0 : index
    %c0_134 = arith.constant 0 : index
    %c0_135 = arith.constant 0 : index
    %515 = vector.load %arg24[%c0_133, %c0_134, %c0_135] : memref<2x1x32xf32, #tpu.memory_space<vmem>>, vector<1x1x32xf32>
    %516 = vector.shape_cast %515 : vector<1x1x32xf32> to vector<1x32xf32>
    %c0_136 = arith.constant 0 : index
    %c0_137 = arith.constant 0 : index
    %c0_138 = arith.constant 0 : index
    %517 = vector.load %arg25[%c0_136, %c0_137, %c0_138] : memref<2x1x32xf32, #tpu.memory_space<vmem>>, vector<1x1x32xf32>
    %518 = vector.shape_cast %517 : vector<1x1x32xf32> to vector<1x32xf32>
    %cst_139 = arith.constant dense<0.000000e+00> : vector<5xf32>
    %519 = vector.multi_reduction <add>, %514, %cst_139 [1] : vector<5x32xf32> to vector<5xf32>
    %520 = vector.shape_cast %519 : vector<5xf32> to vector<5x1xf32>
    %521 = arith.mulf %514, %514 : vector<5x32xf32>
    %cst_140 = arith.constant dense<0.000000e+00> : vector<5xf32>
    %522 = vector.multi_reduction <add>, %521, %cst_140 [1] : vector<5x32xf32> to vector<5xf32>
    %523 = vector.shape_cast %522 : vector<5xf32> to vector<5x1xf32>
    %cst_141 = arith.constant 3.125000e-02 : f32
    %524 = vector.broadcast %cst_141 : f32 to vector<5x1xf32>
    %525 = arith.mulf %520, %524 : vector<5x1xf32>
    %cst_142 = arith.constant 3.125000e-02 : f32
    %526 = vector.broadcast %cst_142 : f32 to vector<5x1xf32>
    %527 = arith.mulf %523, %526 : vector<5x1xf32>
    %528 = arith.mulf %525, %525 : vector<5x1xf32>
    %529 = arith.subf %527, %528 : vector<5x1xf32>
    %530 = vector.broadcast %525 : vector<5x1xf32> to vector<5x32xf32>
    %531 = arith.subf %514, %530 : vector<5x32xf32>
    %cst_143 = arith.constant 9.99999974E-6 : f32
    %532 = vector.broadcast %cst_143 : f32 to vector<5x1xf32>
    %533 = arith.addf %529, %532 : vector<5x1xf32>
    %534 = math.rsqrt %533 : vector<5x1xf32>
    %535 = vector.broadcast %534 : vector<5x1xf32> to vector<5x32xf32>
    %536 = arith.mulf %531, %535 : vector<5x32xf32>
    %537 = vector.broadcast %516 : vector<1x32xf32> to vector<5x32xf32>
    %538 = arith.mulf %536, %537 : vector<5x32xf32>
    %539 = vector.broadcast %518 : vector<1x32xf32> to vector<5x32xf32>
    %540 = arith.addf %538, %539 : vector<5x32xf32>
    %c1_144 = arith.constant 1 : index
    %c0_145 = arith.constant 0 : index
    %c0_146 = arith.constant 0 : index
    %541 = vector.load %arg14[%c1_144, %c0_145, %c0_146] : memref<2x32x96xbf16, #tpu.memory_space<vmem>>, vector<1x32x96xbf16>
    %542 = vector.shape_cast %541 : vector<1x32x96xbf16> to vector<32x96xbf16>
    %543 = arith.truncf %540 : vector<5x32xf32> to vector<5x32xbf16>
    %cst_147 = arith.constant dense<0.000000e+00> : vector<5x96xf32>
    %544 = tpu.matmul %543, %542, %cst_147 {dimension_numbers = #tpu.dot_dimension_numbers<[1], [0], [0], [1], [0, 0, 1, 1], [], []>} : vector<5x32xbf16>, vector<32x96xbf16>, vector<5x96xf32> -> vector<5x96xf32>
    %c1_148 = arith.constant 1 : index
    %c0_149 = arith.constant 0 : index
    %c0_150 = arith.constant 0 : index
    %545 = vector.load %arg15[%c1_148, %c0_149, %c0_150] : memref<2x1x96xf32, #tpu.memory_space<vmem>>, vector<1x1x96xf32>
    %546 = vector.shape_cast %545 : vector<1x1x96xf32> to vector<1x96xf32>
    %547 = vector.broadcast %546 : vector<1x96xf32> to vector<5x96xf32>
    %548 = arith.addf %544, %547 : vector<5x96xf32>
    %549 = vector.extract_strided_slice %548 {offsets = [0, 0], sizes = [5, 32], strides = [1, 1]} : vector<5x96xf32> to vector<5x32xf32>
    %cst_151 = arith.constant 0.353553385 : f32
    %550 = vector.broadcast %cst_151 : f32 to vector<5x32xf32>
    %551 = arith.mulf %549, %550 : vector<5x32xf32>
    %552 = arith.truncf %551 : vector<5x32xf32> to vector<5x32xbf16>
    %553 = vector.extract_strided_slice %548 {offsets = [0, 32], sizes = [5, 32], strides = [1, 1]} : vector<5x96xf32> to vector<5x32xf32>
    %554 = arith.truncf %553 : vector<5x32xf32> to vector<5x32xbf16>
    %555 = vector.extract_strided_slice %548 {offsets = [0, 64], sizes = [5, 32], strides = [1, 1]} : vector<5x96xf32> to vector<5x32xf32>
    %556 = arith.truncf %555 : vector<5x32xf32> to vector<5x32xbf16>
    %c1_152 = arith.constant 1 : index
    %c0_153 = arith.constant 0 : index
    %c0_154 = arith.constant 0 : index
    %557 = vector.load %arg16[%c1_152, %c0_153, %c0_154] : memref<2x32x32xbf16, #tpu.memory_space<vmem>>, vector<1x32x32xbf16>
    %558 = vector.shape_cast %557 : vector<1x32x32xbf16> to vector<32x32xbf16>
    %cst_155 = arith.constant 0.000000e+00 : f32
    %559 = vector.broadcast %cst_155 : f32 to vector<5x32xf32>
    %560 = vector.extract_strided_slice %552 {offsets = [0, 0], sizes = [5, 8], strides = [1, 1]} : vector<5x32xbf16> to vector<5x8xbf16>
    %561 = vector.extract_strided_slice %554 {offsets = [0, 0], sizes = [5, 8], strides = [1, 1]} : vector<5x32xbf16> to vector<5x8xbf16>
    %cst_156 = arith.constant dense<0.000000e+00> : vector<5x5xf32>
    %562 = tpu.matmul %560, %561, %cst_156 {dimension_numbers = #tpu.dot_dimension_numbers<[1], [1], [0], [0], [0, 0, 1, 0], [], []>} : vector<5x8xbf16>, vector<5x8xbf16>, vector<5x5xf32> -> vector<5x5xf32>
    %cst_157 = arith.constant dense<0xFF800000> : vector<5xf32>
    %563 = vector.multi_reduction <maximumf>, %562, %cst_157 [1] : vector<5x5xf32> to vector<5xf32>
    %564 = vector.shape_cast %563 : vector<5xf32> to vector<5x1xf32>
    %565 = vector.broadcast %564 : vector<5x1xf32> to vector<5x5xf32>
    %566 = arith.subf %562, %565 : vector<5x5xf32>
    %567 = math.exp %566 : vector<5x5xf32>
    %cst_158 = arith.constant dense<0.000000e+00> : vector<5xf32>
    %568 = vector.multi_reduction <add>, %567, %cst_158 [1] : vector<5x5xf32> to vector<5xf32>
    %569 = vector.shape_cast %568 : vector<5xf32> to vector<5x1xf32>
    %570 = tpu.reciprocal %569 {approx = true} : vector<5x1xf32> -> vector<5x1xf32>
    %571 = vector.broadcast %570 : vector<5x1xf32> to vector<5x5xf32>
    %572 = arith.mulf %567, %571 : vector<5x5xf32>
    %573 = vector.extract_strided_slice %556 {offsets = [0, 0], sizes = [5, 8], strides = [1, 1]} : vector<5x32xbf16> to vector<5x8xbf16>
    %574 = arith.truncf %572 : vector<5x5xf32> to vector<5x5xbf16>
    %cst_159 = arith.constant dense<0.000000e+00> : vector<5x8xf32>
    %575 = tpu.matmul %574, %573, %cst_159 {dimension_numbers = #tpu.dot_dimension_numbers<[1], [0], [0], [1], [0, 0, 1, 1], [], []>} : vector<5x5xbf16>, vector<5x8xbf16>, vector<5x8xf32> -> vector<5x8xf32>
    %576 = vector.extract_strided_slice %558 {offsets = [0, 0], sizes = [8, 32], strides = [1, 1]} : vector<32x32xbf16> to vector<8x32xbf16>
    %577 = arith.truncf %575 : vector<5x8xf32> to vector<5x8xbf16>
    %cst_160 = arith.constant dense<0.000000e+00> : vector<5x32xf32>
    %578 = tpu.matmul %577, %576, %cst_160 {dimension_numbers = #tpu.dot_dimension_numbers<[1], [0], [0], [1], [0, 0, 1, 1], [], []>} : vector<5x8xbf16>, vector<8x32xbf16>, vector<5x32xf32> -> vector<5x32xf32>
    %579 = arith.addf %559, %578 : vector<5x32xf32>
    %580 = vector.extract_strided_slice %552 {offsets = [0, 8], sizes = [5, 8], strides = [1, 1]} : vector<5x32xbf16> to vector<5x8xbf16>
    %581 = vector.extract_strided_slice %554 {offsets = [0, 8], sizes = [5, 8], strides = [1, 1]} : vector<5x32xbf16> to vector<5x8xbf16>
    %cst_161 = arith.constant dense<0.000000e+00> : vector<5x5xf32>
    %582 = tpu.matmul %580, %581, %cst_161 {dimension_numbers = #tpu.dot_dimension_numbers<[1], [1], [0], [0], [0, 0, 1, 0], [], []>} : vector<5x8xbf16>, vector<5x8xbf16>, vector<5x5xf32> -> vector<5x5xf32>
    %cst_162 = arith.constant dense<0xFF800000> : vector<5xf32>
    %583 = vector.multi_reduction <maximumf>, %582, %cst_162 [1] : vector<5x5xf32> to vector<5xf32>
    %584 = vector.shape_cast %583 : vector<5xf32> to vector<5x1xf32>
    %585 = vector.broadcast %584 : vector<5x1xf32> to vector<5x5xf32>
    %586 = arith.subf %582, %585 : vector<5x5xf32>
    %587 = math.exp %586 : vector<5x5xf32>
    %cst_163 = arith.constant dense<0.000000e+00> : vector<5xf32>
    %588 = vector.multi_reduction <add>, %587, %cst_163 [1] : vector<5x5xf32> to vector<5xf32>
    %589 = vector.shape_cast %588 : vector<5xf32> to vector<5x1xf32>
    %590 = tpu.reciprocal %589 {approx = true} : vector<5x1xf32> -> vector<5x1xf32>
    %591 = vector.broadcast %590 : vector<5x1xf32> to vector<5x5xf32>
    %592 = arith.mulf %587, %591 : vector<5x5xf32>
    %593 = vector.extract_strided_slice %556 {offsets = [0, 8], sizes = [5, 8], strides = [1, 1]} : vector<5x32xbf16> to vector<5x8xbf16>
    %594 = arith.truncf %592 : vector<5x5xf32> to vector<5x5xbf16>
    %cst_164 = arith.constant dense<0.000000e+00> : vector<5x8xf32>
    %595 = tpu.matmul %594, %593, %cst_164 {dimension_numbers = #tpu.dot_dimension_numbers<[1], [0], [0], [1], [0, 0, 1, 1], [], []>} : vector<5x5xbf16>, vector<5x8xbf16>, vector<5x8xf32> -> vector<5x8xf32>
    %596 = vector.extract_strided_slice %558 {offsets = [8, 0], sizes = [8, 32], strides = [1, 1]} : vector<32x32xbf16> to vector<8x32xbf16>
    %597 = arith.truncf %595 : vector<5x8xf32> to vector<5x8xbf16>
    %cst_165 = arith.constant dense<0.000000e+00> : vector<5x32xf32>
    %598 = tpu.matmul %597, %596, %cst_165 {dimension_numbers = #tpu.dot_dimension_numbers<[1], [0], [0], [1], [0, 0, 1, 1], [], []>} : vector<5x8xbf16>, vector<8x32xbf16>, vector<5x32xf32> -> vector<5x32xf32>
    %599 = arith.addf %579, %598 : vector<5x32xf32>
    %600 = vector.extract_strided_slice %552 {offsets = [0, 16], sizes = [5, 8], strides = [1, 1]} : vector<5x32xbf16> to vector<5x8xbf16>
    %601 = vector.extract_strided_slice %554 {offsets = [0, 16], sizes = [5, 8], strides = [1, 1]} : vector<5x32xbf16> to vector<5x8xbf16>
    %cst_166 = arith.constant dense<0.000000e+00> : vector<5x5xf32>
    %602 = tpu.matmul %600, %601, %cst_166 {dimension_numbers = #tpu.dot_dimension_numbers<[1], [1], [0], [0], [0, 0, 1, 0], [], []>} : vector<5x8xbf16>, vector<5x8xbf16>, vector<5x5xf32> -> vector<5x5xf32>
    %cst_167 = arith.constant dense<0xFF800000> : vector<5xf32>
    %603 = vector.multi_reduction <maximumf>, %602, %cst_167 [1] : vector<5x5xf32> to vector<5xf32>
    %604 = vector.shape_cast %603 : vector<5xf32> to vector<5x1xf32>
    %605 = vector.broadcast %604 : vector<5x1xf32> to vector<5x5xf32>
    %606 = arith.subf %602, %605 : vector<5x5xf32>
    %607 = math.exp %606 : vector<5x5xf32>
    %cst_168 = arith.constant dense<0.000000e+00> : vector<5xf32>
    %608 = vector.multi_reduction <add>, %607, %cst_168 [1] : vector<5x5xf32> to vector<5xf32>
    %609 = vector.shape_cast %608 : vector<5xf32> to vector<5x1xf32>
    %610 = tpu.reciprocal %609 {approx = true} : vector<5x1xf32> -> vector<5x1xf32>
    %611 = vector.broadcast %610 : vector<5x1xf32> to vector<5x5xf32>
    %612 = arith.mulf %607, %611 : vector<5x5xf32>
    %613 = vector.extract_strided_slice %556 {offsets = [0, 16], sizes = [5, 8], strides = [1, 1]} : vector<5x32xbf16> to vector<5x8xbf16>
    %614 = arith.truncf %612 : vector<5x5xf32> to vector<5x5xbf16>
    %cst_169 = arith.constant dense<0.000000e+00> : vector<5x8xf32>
    %615 = tpu.matmul %614, %613, %cst_169 {dimension_numbers = #tpu.dot_dimension_numbers<[1], [0], [0], [1], [0, 0, 1, 1], [], []>} : vector<5x5xbf16>, vector<5x8xbf16>, vector<5x8xf32> -> vector<5x8xf32>
    %616 = vector.extract_strided_slice %558 {offsets = [16, 0], sizes = [8, 32], strides = [1, 1]} : vector<32x32xbf16> to vector<8x32xbf16>
    %617 = arith.truncf %615 : vector<5x8xf32> to vector<5x8xbf16>
    %cst_170 = arith.constant dense<0.000000e+00> : vector<5x32xf32>
    %618 = tpu.matmul %617, %616, %cst_170 {dimension_numbers = #tpu.dot_dimension_numbers<[1], [0], [0], [1], [0, 0, 1, 1], [], []>} : vector<5x8xbf16>, vector<8x32xbf16>, vector<5x32xf32> -> vector<5x32xf32>
    %619 = arith.addf %599, %618 : vector<5x32xf32>
    %620 = vector.extract_strided_slice %552 {offsets = [0, 24], sizes = [5, 8], strides = [1, 1]} : vector<5x32xbf16> to vector<5x8xbf16>
    %621 = vector.extract_strided_slice %554 {offsets = [0, 24], sizes = [5, 8], strides = [1, 1]} : vector<5x32xbf16> to vector<5x8xbf16>
    %cst_171 = arith.constant dense<0.000000e+00> : vector<5x5xf32>
    %622 = tpu.matmul %620, %621, %cst_171 {dimension_numbers = #tpu.dot_dimension_numbers<[1], [1], [0], [0], [0, 0, 1, 0], [], []>} : vector<5x8xbf16>, vector<5x8xbf16>, vector<5x5xf32> -> vector<5x5xf32>
    %cst_172 = arith.constant dense<0xFF800000> : vector<5xf32>
    %623 = vector.multi_reduction <maximumf>, %622, %cst_172 [1] : vector<5x5xf32> to vector<5xf32>
    %624 = vector.shape_cast %623 : vector<5xf32> to vector<5x1xf32>
    %625 = vector.broadcast %624 : vector<5x1xf32> to vector<5x5xf32>
    %626 = arith.subf %622, %625 : vector<5x5xf32>
    %627 = math.exp %626 : vector<5x5xf32>
    %cst_173 = arith.constant dense<0.000000e+00> : vector<5xf32>
    %628 = vector.multi_reduction <add>, %627, %cst_173 [1] : vector<5x5xf32> to vector<5xf32>
    %629 = vector.shape_cast %628 : vector<5xf32> to vector<5x1xf32>
    %630 = tpu.reciprocal %629 {approx = true} : vector<5x1xf32> -> vector<5x1xf32>
    %631 = vector.broadcast %630 : vector<5x1xf32> to vector<5x5xf32>
    %632 = arith.mulf %627, %631 : vector<5x5xf32>
    %633 = vector.extract_strided_slice %556 {offsets = [0, 24], sizes = [5, 8], strides = [1, 1]} : vector<5x32xbf16> to vector<5x8xbf16>
    %634 = arith.truncf %632 : vector<5x5xf32> to vector<5x5xbf16>
    %cst_174 = arith.constant dense<0.000000e+00> : vector<5x8xf32>
    %635 = tpu.matmul %634, %633, %cst_174 {dimension_numbers = #tpu.dot_dimension_numbers<[1], [0], [0], [1], [0, 0, 1, 1], [], []>} : vector<5x5xbf16>, vector<5x8xbf16>, vector<5x8xf32> -> vector<5x8xf32>
    %636 = vector.extract_strided_slice %558 {offsets = [24, 0], sizes = [8, 32], strides = [1, 1]} : vector<32x32xbf16> to vector<8x32xbf16>
    %637 = arith.truncf %635 : vector<5x8xf32> to vector<5x8xbf16>
    %cst_175 = arith.constant dense<0.000000e+00> : vector<5x32xf32>
    %638 = tpu.matmul %637, %636, %cst_175 {dimension_numbers = #tpu.dot_dimension_numbers<[1], [0], [0], [1], [0, 0, 1, 1], [], []>} : vector<5x8xbf16>, vector<8x32xbf16>, vector<5x32xf32> -> vector<5x32xf32>
    %639 = arith.addf %619, %638 : vector<5x32xf32>
    %c1_176 = arith.constant 1 : index
    %c0_177 = arith.constant 0 : index
    %c0_178 = arith.constant 0 : index
    %640 = vector.load %arg17[%c1_176, %c0_177, %c0_178] : memref<2x1x32xf32, #tpu.memory_space<vmem>>, vector<1x1x32xf32>
    %641 = vector.shape_cast %640 : vector<1x1x32xf32> to vector<1x32xf32>
    %642 = vector.broadcast %641 : vector<1x32xf32> to vector<5x32xf32>
    %643 = arith.addf %639, %642 : vector<5x32xf32>
    %644 = arith.addf %540, %643 : vector<5x32xf32>
    %c1_179 = arith.constant 1 : index
    %c0_180 = arith.constant 0 : index
    %c0_181 = arith.constant 0 : index
    %645 = vector.load %arg18[%c1_179, %c0_180, %c0_181] : memref<2x1x32xf32, #tpu.memory_space<vmem>>, vector<1x1x32xf32>
    %646 = vector.shape_cast %645 : vector<1x1x32xf32> to vector<1x32xf32>
    %c1_182 = arith.constant 1 : index
    %c0_183 = arith.constant 0 : index
    %c0_184 = arith.constant 0 : index
    %647 = vector.load %arg19[%c1_182, %c0_183, %c0_184] : memref<2x1x32xf32, #tpu.memory_space<vmem>>, vector<1x1x32xf32>
    %648 = vector.shape_cast %647 : vector<1x1x32xf32> to vector<1x32xf32>
    %cst_185 = arith.constant dense<0.000000e+00> : vector<5xf32>
    %649 = vector.multi_reduction <add>, %644, %cst_185 [1] : vector<5x32xf32> to vector<5xf32>
    %650 = vector.shape_cast %649 : vector<5xf32> to vector<5x1xf32>
    %651 = arith.mulf %644, %644 : vector<5x32xf32>
    %cst_186 = arith.constant dense<0.000000e+00> : vector<5xf32>
    %652 = vector.multi_reduction <add>, %651, %cst_186 [1] : vector<5x32xf32> to vector<5xf32>
    %653 = vector.shape_cast %652 : vector<5xf32> to vector<5x1xf32>
    %cst_187 = arith.constant 3.125000e-02 : f32
    %654 = vector.broadcast %cst_187 : f32 to vector<5x1xf32>
    %655 = arith.mulf %650, %654 : vector<5x1xf32>
    %cst_188 = arith.constant 3.125000e-02 : f32
    %656 = vector.broadcast %cst_188 : f32 to vector<5x1xf32>
    %657 = arith.mulf %653, %656 : vector<5x1xf32>
    %658 = arith.mulf %655, %655 : vector<5x1xf32>
    %659 = arith.subf %657, %658 : vector<5x1xf32>
    %660 = vector.broadcast %655 : vector<5x1xf32> to vector<5x32xf32>
    %661 = arith.subf %644, %660 : vector<5x32xf32>
    %cst_189 = arith.constant 9.99999974E-6 : f32
    %662 = vector.broadcast %cst_189 : f32 to vector<5x1xf32>
    %663 = arith.addf %659, %662 : vector<5x1xf32>
    %664 = math.rsqrt %663 : vector<5x1xf32>
    %665 = vector.broadcast %664 : vector<5x1xf32> to vector<5x32xf32>
    %666 = arith.mulf %661, %665 : vector<5x32xf32>
    %667 = vector.broadcast %646 : vector<1x32xf32> to vector<5x32xf32>
    %668 = arith.mulf %666, %667 : vector<5x32xf32>
    %669 = vector.broadcast %648 : vector<1x32xf32> to vector<5x32xf32>
    %670 = arith.addf %668, %669 : vector<5x32xf32>
    %c1_190 = arith.constant 1 : index
    %c0_191 = arith.constant 0 : index
    %c0_192 = arith.constant 0 : index
    %671 = vector.load %arg20[%c1_190, %c0_191, %c0_192] : memref<2x32x2048xbf16, #tpu.memory_space<vmem>>, vector<1x32x2048xbf16>
    %672 = vector.shape_cast %671 : vector<1x32x2048xbf16> to vector<32x2048xbf16>
    %673 = arith.truncf %670 : vector<5x32xf32> to vector<5x32xbf16>
    %cst_193 = arith.constant dense<0.000000e+00> : vector<5x2048xf32>
    %674 = tpu.matmul %673, %672, %cst_193 {dimension_numbers = #tpu.dot_dimension_numbers<[1], [0], [0], [1], [0, 0, 1, 1], [], []>} : vector<5x32xbf16>, vector<32x2048xbf16>, vector<5x2048xf32> -> vector<5x2048xf32>
    %c1_194 = arith.constant 1 : index
    %c0_195 = arith.constant 0 : index
    %c0_196 = arith.constant 0 : index
    %675 = vector.load %arg21[%c1_194, %c0_195, %c0_196] : memref<2x1x2048xf32, #tpu.memory_space<vmem>>, vector<1x1x2048xf32>
    %676 = vector.shape_cast %675 : vector<1x1x2048xf32> to vector<1x2048xf32>
    %677 = vector.broadcast %676 : vector<1x2048xf32> to vector<5x2048xf32>
    %678 = arith.addf %674, %677 : vector<5x2048xf32>
    %cst_197 = arith.constant 0.000000e+00 : f32
    %679 = vector.broadcast %cst_197 : f32 to vector<5x2048xf32>
    %680 = arith.maximumf %678, %679 : vector<5x2048xf32>
    %c1_198 = arith.constant 1 : index
    %c0_199 = arith.constant 0 : index
    %c0_200 = arith.constant 0 : index
    %681 = vector.load %arg22[%c1_198, %c0_199, %c0_200] : memref<2x2048x32xbf16, #tpu.memory_space<vmem>>, vector<1x2048x32xbf16>
    %682 = vector.shape_cast %681 : vector<1x2048x32xbf16> to vector<2048x32xbf16>
    %683 = arith.truncf %680 : vector<5x2048xf32> to vector<5x2048xbf16>
    %cst_201 = arith.constant dense<0.000000e+00> : vector<5x32xf32>
    %684 = tpu.matmul %683, %682, %cst_201 {dimension_numbers = #tpu.dot_dimension_numbers<[1], [0], [0], [1], [0, 0, 1, 1], [], []>} : vector<5x2048xbf16>, vector<2048x32xbf16>, vector<5x32xf32> -> vector<5x32xf32>
    %c1_202 = arith.constant 1 : index
    %c0_203 = arith.constant 0 : index
    %c0_204 = arith.constant 0 : index
    %685 = vector.load %arg23[%c1_202, %c0_203, %c0_204] : memref<2x1x32xf32, #tpu.memory_space<vmem>>, vector<1x1x32xf32>
    %686 = vector.shape_cast %685 : vector<1x1x32xf32> to vector<1x32xf32>
    %687 = vector.broadcast %686 : vector<1x32xf32> to vector<5x32xf32>
    %688 = arith.addf %684, %687 : vector<5x32xf32>
    %689 = arith.addf %670, %688 : vector<5x32xf32>
    %c1_205 = arith.constant 1 : index
    %c0_206 = arith.constant 0 : index
    %c0_207 = arith.constant 0 : index
    %690 = vector.load %arg24[%c1_205, %c0_206, %c0_207] : memref<2x1x32xf32, #tpu.memory_space<vmem>>, vector<1x1x32xf32>
    %691 = vector.shape_cast %690 : vector<1x1x32xf32> to vector<1x32xf32>
    %c1_208 = arith.constant 1 : index
    %c0_209 = arith.constant 0 : index
    %c0_210 = arith.constant 0 : index
    %692 = vector.load %arg25[%c1_208, %c0_209, %c0_210] : memref<2x1x32xf32, #tpu.memory_space<vmem>>, vector<1x1x32xf32>
    %693 = vector.shape_cast %692 : vector<1x1x32xf32> to vector<1x32xf32>
    %cst_211 = arith.constant dense<0.000000e+00> : vector<5xf32>
    %694 = vector.multi_reduction <add>, %689, %cst_211 [1] : vector<5x32xf32> to vector<5xf32>
    %695 = vector.shape_cast %694 : vector<5xf32> to vector<5x1xf32>
    %696 = arith.mulf %689, %689 : vector<5x32xf32>
    %cst_212 = arith.constant dense<0.000000e+00> : vector<5xf32>
    %697 = vector.multi_reduction <add>, %696, %cst_212 [1] : vector<5x32xf32> to vector<5xf32>
    %698 = vector.shape_cast %697 : vector<5xf32> to vector<5x1xf32>
    %cst_213 = arith.constant 3.125000e-02 : f32
    %699 = vector.broadcast %cst_213 : f32 to vector<5x1xf32>
    %700 = arith.mulf %695, %699 : vector<5x1xf32>
    %cst_214 = arith.constant 3.125000e-02 : f32
    %701 = vector.broadcast %cst_214 : f32 to vector<5x1xf32>
    %702 = arith.mulf %698, %701 : vector<5x1xf32>
    %703 = arith.mulf %700, %700 : vector<5x1xf32>
    %704 = arith.subf %702, %703 : vector<5x1xf32>
    %705 = vector.broadcast %700 : vector<5x1xf32> to vector<5x32xf32>
    %706 = arith.subf %689, %705 : vector<5x32xf32>
    %cst_215 = arith.constant 9.99999974E-6 : f32
    %707 = vector.broadcast %cst_215 : f32 to vector<5x1xf32>
    %708 = arith.addf %704, %707 : vector<5x1xf32>
    %709 = math.rsqrt %708 : vector<5x1xf32>
    %710 = vector.broadcast %709 : vector<5x1xf32> to vector<5x32xf32>
    %711 = arith.mulf %706, %710 : vector<5x32xf32>
    %712 = vector.broadcast %691 : vector<1x32xf32> to vector<5x32xf32>
    %713 = arith.mulf %711, %712 : vector<5x32xf32>
    %714 = vector.broadcast %693 : vector<1x32xf32> to vector<5x32xf32>
    %715 = arith.addf %713, %714 : vector<5x32xf32>
    %cst_216 = arith.constant dense<0.000000e+00> : vector<32xf32>
    %716 = vector.multi_reduction <add>, %715, %cst_216 [0] : vector<5x32xf32> to vector<32xf32>
    %717 = vector.shape_cast %716 : vector<32xf32> to vector<1x32xf32>
    %cst_217 = arith.constant 5.000000e+00 : f32
    %718 = vector.broadcast %cst_217 : f32 to vector<1x32xf32>
    %719 = arith.divf %717, %718 : vector<1x32xf32>
    %c0_218 = arith.constant 0 : index
    %c0_219 = arith.constant 0 : index
    %720 = vector.load %arg26[%c0_218, %c0_219] : memref<32x6xbf16, #tpu.memory_space<vmem>>, vector<32x6xbf16>
    %721 = arith.truncf %719 : vector<1x32xf32> to vector<1x32xbf16>
    %cst_220 = arith.constant dense<0.000000e+00> : vector<1x6xf32>
    %722 = tpu.matmul %721, %720, %cst_220 {dimension_numbers = #tpu.dot_dimension_numbers<[1], [0], [0], [1], [0, 0, 1, 1], [], []>} : vector<1x32xbf16>, vector<32x6xbf16>, vector<1x6xf32> -> vector<1x6xf32>
    %c0_221 = arith.constant 0 : index
    %c0_222 = arith.constant 0 : index
    %723 = vector.load %arg27[%c0_221, %c0_222] : memref<1x6xf32, #tpu.memory_space<vmem>>, vector<1x6xf32>
    %724 = arith.addf %722, %723 : vector<1x6xf32>
    %c0_223 = arith.constant 0 : index
    %c0_224 = arith.constant 0 : index
    %725 = vector.load %arg28[%c0_223, %c0_224] : memref<1x6xf32, #tpu.memory_space<vmem>>, vector<1x6xf32>
    tpu.vector_store %arg28[%c0_223, %c0_224], %724 {strides = array<i32>} : memref<1x6xf32, #tpu.memory_space<vmem>>, vector<1x6xf32>,
    return
  }
  func.func @transform_0(%arg0: i32) -> (i32, i32) {
    %c0_i32 = arith.constant 0 : i32
    %c0_i32_0 = arith.constant 0 : i32
    %c0_i32_1 = arith.constant 0 : i32
    return %c0_i32, %c0_i32_0 : i32, i32
  }
  func.func @transform_1(%arg0: i32) -> (i32, i32) {
    %c0_i32 = arith.constant 0 : i32
    %c0_i32_0 = arith.constant 0 : i32
    %c0_i32_1 = arith.constant 0 : i32
    return %c0_i32, %c0_i32_0 : i32, i32
  }
  func.func @transform_2(%arg0: i32) -> (i32, i32) {
    %c0_i32 = arith.constant 0 : i32
    %c0_i32_0 = arith.constant 0 : i32
    %c0_i32_1 = arith.constant 0 : i32
    return %c0_i32, %c0_i32_0 : i32, i32
  }
  func.func @transform_3(%arg0: i32) -> (i32, i32) {
    %c0_i32 = arith.constant 0 : i32
    %c0_i32_0 = arith.constant 0 : i32
    %c0_i32_1 = arith.constant 0 : i32
    return %c0_i32, %c0_i32_0 : i32, i32
  }
  func.func @transform_4(%arg0: i32) -> (i32, i32) {
    %c0_i32 = arith.constant 0 : i32
    %c0_i32_0 = arith.constant 0 : i32
    %c0_i32_1 = arith.constant 0 : i32
    return %c0_i32, %c0_i32_0 : i32, i32
  }
  func.func @transform_5(%arg0: i32) -> (i32, i32) {
    %c0_i32 = arith.constant 0 : i32
    %c0_i32_0 = arith.constant 0 : i32
    %c0_i32_1 = arith.constant 0 : i32
    return %c0_i32, %c0_i32_0 : i32, i32
  }
  func.func @transform_6(%arg0: i32) -> (i32, i32) {
    %c0_i32 = arith.constant 0 : i32
    %c0_i32_0 = arith.constant 0 : i32
    %c0_i32_1 = arith.constant 0 : i32
    return %c0_i32, %c0_i32_0 : i32, i32
  }
  func.func @transform_7(%arg0: i32) -> (i32, i32) {
    %c0_i32 = arith.constant 0 : i32
    %c0_i32_0 = arith.constant 0 : i32
    %c0_i32_1 = arith.constant 0 : i32
    return %c0_i32, %c0_i32_0 : i32, i32
  }
  func.func @transform_8(%arg0: i32) -> (i32, i32, i32) {
    %c0_i32 = arith.constant 0 : i32
    %c0_i32_0 = arith.constant 0 : i32
    %c0_i32_1 = arith.constant 0 : i32
    %c0_i32_2 = arith.constant 0 : i32
    return %c0_i32, %c0_i32_0, %c0_i32_1 : i32, i32, i32
  }
  func.func @transform_9(%arg0: i32) -> (i32, i32, i32) {
    %c0_i32 = arith.constant 0 : i32
    %c0_i32_0 = arith.constant 0 : i32
    %c0_i32_1 = arith.constant 0 : i32
    %c0_i32_2 = arith.constant 0 : i32
    return %c0_i32, %c0_i32_0, %c0_i32_1 : i32, i32, i32
  }
  func.func @transform_10(%arg0: i32) -> (i32, i32, i32) {
    %c0_i32 = arith.constant 0 : i32
    %c0_i32_0 = arith.constant 0 : i32
    %c0_i32_1 = arith.constant 0 : i32
    %c0_i32_2 = arith.constant 0 : i32
    return %c0_i32, %c0_i32_0, %c0_i32_1 : i32, i32, i32
  }
  func.func @transform_11(%arg0: i32) -> (i32, i32) {
    %c0_i32 = arith.constant 0 : i32
    %c0_i32_0 = arith.constant 0 : i32
    %c0_i32_1 = arith.constant 0 : i32
    return %c0_i32, %c0_i32_0 : i32, i32
  }
  func.func @transform_12(%arg0: i32) -> (i32, i32) {
    %c0_i32 = arith.constant 0 : i32
    %c0_i32_0 = arith.constant 0 : i32
    %c0_i32_1 = arith.constant 0 : i32
    return %c0_i32, %c0_i32_0 : i32, i32
  }
  func.func @transform_13(%arg0: i32) -> (i32, i32, i32) {
    %c0_i32 = arith.constant 0 : i32
    %c0_i32_0 = arith.constant 0 : i32
    %c0_i32_1 = arith.constant 0 : i32
    %c0_i32_2 = arith.constant 0 : i32
    return %c0_i32, %c0_i32_0, %c0_i32_1 : i32, i32, i32
  }
  func.func @transform_14(%arg0: i32) -> (i32, i32, i32) {
    %c0_i32 = arith.constant 0 : i32
    %c0_i32_0 = arith.constant 0 : i32
    %c0_i32_1 = arith.constant 0 : i32
    %c0_i32_2 = arith.constant 0 : i32
    return %c0_i32, %c0_i32_0, %c0_i32_1 : i32, i32, i32
  }
  func.func @transform_15(%arg0: i32) -> (i32, i32, i32) {
    %c0_i32 = arith.constant 0 : i32
    %c0_i32_0 = arith.constant 0 : i32
    %c0_i32_1 = arith.constant 0 : i32
    %c0_i32_2 = arith.constant 0 : i32
    return %c0_i32, %c0_i32_0, %c0_i32_1 : i32, i32, i32
  }
  func.func @transform_16(%arg0: i32) -> (i32, i32, i32) {
    %c0_i32 = arith.constant 0 : i32
    %c0_i32_0 = arith.constant 0 : i32
    %c0_i32_1 = arith.constant 0 : i32
    %c0_i32_2 = arith.constant 0 : i32
    return %c0_i32, %c0_i32_0, %c0_i32_1 : i32, i32, i32
  }
  func.func @transform_17(%arg0: i32) -> (i32, i32, i32) {
    %c0_i32 = arith.constant 0 : i32
    %c0_i32_0 = arith.constant 0 : i32
    %c0_i32_1 = arith.constant 0 : i32
    %c0_i32_2 = arith.constant 0 : i32
    return %c0_i32, %c0_i32_0, %c0_i32_1 : i32, i32, i32
  }
  func.func @transform_18(%arg0: i32) -> (i32, i32, i32) {
    %c0_i32 = arith.constant 0 : i32
    %c0_i32_0 = arith.constant 0 : i32
    %c0_i32_1 = arith.constant 0 : i32
    %c0_i32_2 = arith.constant 0 : i32
    return %c0_i32, %c0_i32_0, %c0_i32_1 : i32, i32, i32
  }
  func.func @transform_19(%arg0: i32) -> (i32, i32, i32) {
    %c0_i32 = arith.constant 0 : i32
    %c0_i32_0 = arith.constant 0 : i32
    %c0_i32_1 = arith.constant 0 : i32
    %c0_i32_2 = arith.constant 0 : i32
    return %c0_i32, %c0_i32_0, %c0_i32_1 : i32, i32, i32
  }
  func.func @transform_20(%arg0: i32) -> (i32, i32, i32) {
    %c0_i32 = arith.constant 0 : i32
    %c0_i32_0 = arith.constant 0 : i32
    %c0_i32_1 = arith.constant 0 : i32
    %c0_i32_2 = arith.constant 0 : i32
    return %c0_i32, %c0_i32_0, %c0_i32_1 : i32, i32, i32
  }
  func.func @transform_21(%arg0: i32) -> (i32, i32, i32) {
    %c0_i32 = arith.constant 0 : i32
    %c0_i32_0 = arith.constant 0 : i32
    %c0_i32_1 = arith.constant 0 : i32
    %c0_i32_2 = arith.constant 0 : i32
    return %c0_i32, %c0_i32_0, %c0_i32_1 : i32, i32, i32
  }
  func.func @transform_22(%arg0: i32) -> (i32, i32, i32) {
    %c0_i32 = arith.constant 0 : i32
    %c0_i32_0 = arith.constant 0 : i32
    %c0_i32_1 = arith.constant 0 : i32
    %c0_i32_2 = arith.constant 0 : i32
    return %c0_i32, %c0_i32_0, %c0_i32_1 : i32, i32, i32
  }
  func.func @transform_23(%arg0: i32) -> (i32, i32, i32) {
    %c0_i32 = arith.constant 0 : i32
    %c0_i32_0 = arith.constant 0 : i32
    %c0_i32_1 = arith.constant 0 : i32
    %c0_i32_2 = arith.constant 0 : i32
    return %c0_i32, %c0_i32_0, %c0_i32_1 : i32, i32, i32
  }
  func.func @transform_24(%arg0: i32) -> (i32, i32, i32) {
    %c0_i32 = arith.constant 0 : i32
    %c0_i32_0 = arith.constant 0 : i32
    %c0_i32_1 = arith.constant 0 : i32
    %c0_i32_2 = arith.constant 0 : i32
    return %c0_i32, %c0_i32_0, %c0_i32_1 : i32, i32, i32
  }
  func.func @transform_25(%arg0: i32) -> (i32, i32) {
    %c0_i32 = arith.constant 0 : i32
    %c0_i32_0 = arith.constant 0 : i32
    %c0_i32_1 = arith.constant 0 : i32
    return %c0_i32, %c0_i32_0 : i32, i32
  }
  func.func @transform_26(%arg0: i32) -> (i32, i32) {
    %c0_i32 = arith.constant 0 : i32
    %c0_i32_0 = arith.constant 0 : i32
    %c0_i32_1 = arith.constant 0 : i32
    return %c0_i32, %c0_i32_0 : i32, i32
  }
  func.func @transform_27(%arg0: i32) -> (i32, i32) {
    %c0_i32 = arith.constant 0 : i32
    %c0_i32_0 = arith.constant 0 : i32
    %c0_i32_1 = arith.constant 0 : i32
    return %c0_i32, %c0_i32_0 : i32, i32
  }
}

</mosaic_0001>

<bundles_post_ra>
// kernel: forward.1
= control target key start
LH: loop header
LB: loop body
LE: loop exit
PB: predicated region body
PF: predicated region fallthrough
CT: control target
= control target key end

     0   :  { %s11647_s0 = inlined_call_operand.vmem [shape: f32[1,6], index: 0, kind: input, shape index: {}]   ;;  %s11648_s1 = inlined_call_operand.<no memory space> [shape: f32[1,1], index: 1, kind: input, shape index: {}]   ;;  %s11649_s2 = inlined_call_operand.vmem [shape: f32[8,3], index: 2, kind: input, shape index: {}]   ;;  %s11650_s3 = inlined_call_operand.vmem [shape: bf16[6,32], index: 3, kind: input, shape index: {}]   ;;  %s11651_s4 = inlined_call_operand.vmem [shape: f32[1,32], index: 4, kind: input, shape index: {}]   ;;  %s11652_s5 = inlined_call_operand.vmem [shape: f32[1,32], index: 5, kind: input, shape index: {}]   ;;  %s11653_s6 = inlined_call_operand.vmem [shape: f32[1,32], index: 6, kind: input, shape index: {}]   ;;  %s11654_s7 = inlined_call_operand.vmem [shape: bf16[3,256], index: 7, kind: input, shape index: {}]   ;;  %s11655_s8 = inlined_call_operand.vmem [shape: bf16[1,64,256], index: 8, kind: input, shape index: {}]   ;;  %s11656_s9 = inlined_call_operand.vmem [shape: bf16[2,64,256], index: 9, kind: input, shape index: {}]   ;;  %s11657_s10 = inlined_call_operand.vmem [shape: f32[2,1,256], index: 10, kind: input, shape index: {}]   ;;  %s11658_s11 = inlined_call_operand.vmem [shape: bf16[64,96], index: 11, kind: input, shape index: {}]   ;;  %s11659_s12 = inlined_call_operand.vmem [shape: f32[1,96], index: 12, kind: input, shape index: {}]   ;;  %s11660_s13 = inlined_call_operand.vmem [shape: bf16[2,32,96], index: 13, kind: input, shape index: {}]   ;;  %s11661_s14 = inlined_call_operand.vmem [shape: f32[2,1,96], index: 14, kind: input, shape index: {}]   ;;  %s11662_s15 = inlined_call_operand.vmem [shape: bf16[2,32,32], index: 15, kind: input, shape index: {}]   ;;  %s11663_s16 = inlined_call_operand.vmem [shape: f32[2,1,32], index: 16, kind: input, shape index: {}]   ;;  %s11664_s17 = inlined_call_operand.vmem [shape: f32[2,1,32], index: 17, kind: input, shape index: {}]   ;;  %s11665_s18 = inlined_call_operand.vmem [shape: f32[2,1,32], index: 18, kind: input, shape index: {}]   ;;  %s11666_s19 = inlined_call_operand.vmem [shape: bf16[2,32,2048], index: 19, kind: input, shape index: {}]   ;;  %s11667_s20 = inlined_call_operand.vmem [shape: f32[2,1,2048], index: 20, kind: input, shape index: {}]   ;;  %s11668_s21 = inlined_call_operand.vmem [shape: bf16[2,2048,32], index: 21, kind: input, shape index: {}]   ;;  %s11669_s22 = inlined_call_operand.vmem [shape: f32[2,1,32], index: 22, kind: input, shape index: {}]   ;;  %s11670_s23 = inlined_call_operand.vmem [shape: f32[2,1,32], index: 23, kind: input, shape index: {}]   ;;  %s11671_s24 = inlined_call_operand.vmem [shape: f32[2,1,32], index: 24, kind: input, shape index: {}]   ;;  %s11672_s25 = inlined_call_operand.vmem [shape: bf16[32,6], index: 25, kind: input, shape index: {}]   ;;  %s11673_s26 = inlined_call_operand.vmem [shape: f32[1,6], index: 26, kind: input, shape index: {}]   ;;  %s11674_s27 = inlined_call_operand.hbm [shape: f32[1,6], index: 27, kind: output, shape index: {}]  }
   0x1   :  { %11684 = sst [smem:[#allocation6_spill]] %s11647_s0 }
   0x2   :  { %11685 = sst [smem:[#allocation7_spill]] %s11648_s1 }
   0x3   :  { %11686 = sst [smem:[#allocation8_spill]] %s11649_s2 }
   0x4   :  { %11687 = sst [smem:[#allocation9_spill]] %s11650_s3 }
   0x5   :  { %11688 = sst [smem:[#allocation10_spill]] %s11651_s4 }
   0x6   :  { %11689 = sst [smem:[#allocation11_spill]] %s11652_s5 }
   0x7   :  { %11690 = sst [smem:[#allocation12_spill]] %s11653_s6 }
   0x8   :  { %11691 = sst [smem:[#allocation13_spill]] %s11654_s7 }
   0x9   :  { %11692 = sst [smem:[#allocation14_spill]] %s11655_s8 }
   0xa   :  { %11693 = sst [smem:[#allocation15_spill]] %s11656_s9 }
   0xb   :  { %11694 = sst [smem:[#allocation16_spill]] %s11657_s10 }
   0xc   :  { %11695 = sst [smem:[#allocation17_spill]] %s11658_s11 }
   0xd   :  { %s11696_s8 = sld [smem:[#allocation7_spill]] }
  0x13   :  { %v32_v0 = vstv %s11696_s8 }
  0x14   :  { %33 = vst [vmem:[#allocation2] sm:$0x1] %v32_v0 }
  0x15   :  { %s11697_s5 = sld [smem:[#allocation9_spill]]  ;;  %vm98_vm0 = vcmask 1042432   ;;  %vm94_vm1 = vcmask 48128   ;;  %v9537_v2 = vmov 0.0   ;;  %vm9538_vm2 = vmmov 0  }
  0x16   :  { %8770 = vmatprep.subr.bf16.mxu0 %v9537_v2  ;;  %8772 = vmatprep.mubr.msk.bf16.mxu0 %vm9538_vm2, %v9537_v2  ;;  %s11698_s10 = sld [smem:[#allocation6_spill]]  ;;  %vm192_vm3 = vcmask 1040384   ;;  %vm193_vm4 = vcmask 1041408   ;;  %v9539_v9 = vmov 65535   ;;  %v9540_v18 = vmov 0  }
  0x17   :  { %s11699_s6 = sld [smem:[#allocation15_spill]]  ;;  %v194_v10 = vsel %vm192_vm3, 4294967295, %v9539_v9  ;;  %234 = vmatprep.mubr.bf16.mxu1 %v9540_v18  ;;  %8972 = vset.pattern.permute.xlu0 %v9540_v18  ;;  %vm188_vm5 = vcmask 23552   ;;  %v149_v24 = vlaneseq }
  0x18   :  { %s11700_s4 = sld [smem:[#allocation13_spill]]  ;;  %v195_v12 = vsel %vm193_vm4, %v194_v10, 0 }
  0x19   :  { %s11701_s28 = sld [smem:[#allocation8_spill]] }
  0x1b   :  { %v91_v1 = vld [vmem:[%s11697_s5] sm:$0x7] }
  0x1c   :  { %v100_v3 = vsel %vm98_vm0, %v91_v1, 0  ;;  %v90_v4 = vld [vmem:[%s11698_s10] sm:$0x1] }
  0x1d   :  { %8771 = vmatpush3.bf16.msra.mxu0 %v100_v3  ;;  %v92_v5 = vpack.c.bf16 %v90_v4, %v90_v4  ;;  %v8973_v6 = vld [vmem:[%s11699_s6 + $0x34] ss:$8 sps:$4 sm:$0xff]   ;;  %v8975_v7 = vld [vmem:[%s11699_s6 + $0x30] ss:$8 sps:$4 sm:$0xff]   ;;  %v8976_v13 = vld [vmem:[%s11699_s6 + $0x24] ss:$8 sps:$4 sm:$0xff]  }
  0x1e   :  { %v7579_v8 = vld.sshfl [vmem:[%s11700_s4] sm:$0x33 pattern:$0x76325410]  ;;  %295 = vmatprep.subr.bf16.mxu0 %v8973_v6  ;;  %v8979_v19 = vld [vmem:[%s11699_s6 + $0x14] ss:$8 sps:$4 sm:$0xff]  }
  0x1f   :  { %v187_v11 = vcombine.high %v7579_v8, %v7579_v8  ;;  %v197_v14 = vand.u32 %v7579_v8, %v195_v12  ;;  %v164_v15 = vld [vmem:[%s11701_s28] sm:$0xff]  ;;  %v8981_v21 = vld [vmem:[%s11699_s6 + $0x10] ss:$8 sps:$4 sm:$0xff]  }
  0x20   :  { %8773 = vmatmul.mubr.msk.bf16.vlgmr.msra.gmra.mxu0 %vm94_vm1, %v92_v5  ;;  %v8978_v17 = vld [vmem:[%s11699_s6 + $0x20] ss:$8 sps:$4 sm:$0xff]   ;;  %v166_v20 = vpack.c.bf16 %v164_v15, %v164_v15  ;;  %v8982_v22 = vld [vmem:[%s11699_s6 + $0x4] ss:$8 sps:$4 sm:$0xff]  }
  0x21   :  { %296 = vmatpush1.bf16.msra.mxu0 %v8975_v7  ;;  %v200_v16 = vand.u32 %v195_v12, %v187_v11  ;;  %319 = vmatprep.mubr.bf16.mxu0 %v9540_v18  ;;  %v8984_v23 = vld [vmem:[%s11699_s6] ss:$8 sps:$4 sm:$0xff]  }
  0x22   :  { %297 = vmatprep.subr.bf16.mxu0 %v8976_v13 }
  0x23   :  { %216 = vmatprep.subr.bf16.mxu1 %v200_v16 }
  0x24   :  { %217 = vmatpush1.bf16.msra.mxu1 %v197_v14 }
  0x25   :  { %298 = vmatpush1.bf16.msra.mxu0 %v8978_v17  ;;  %372 = vmatprep.subr.bf16.mxu1 %v8973_v6 }
  0x26   :  { %299 = vmatprep.subr.bf16.mxu0 %v8979_v19 }
  0x27   :  { %7580 = vmatmul.mubr.msk.bf16.vlgmr.msra.gmra.mxu1 %vm188_vm5, %v166_v20 }
  0x28   :  { %373 = vmatpush1.bf16.msra.mxu1 %v8975_v7  ;;  %396 = vmatprep.mubr.bf16.mxu1 %v9540_v18 }
  0x29   :  { %300 = vmatpush1.bf16.msra.mxu0 %v8981_v21  ;;  %374 = vmatprep.subr.bf16.mxu1 %v8976_v13 }
  0x2a   :  { %301 = vmatprep.subr.bf16.mxu0 %v8982_v22 }
  0x2c   :  { %375 = vmatpush1.bf16.msra.mxu1 %v8978_v17 }
  0x2d   :  { %302 = vmatpush1.bf16.msra.mxu0 %v8984_v23  ;;  %376 = vmatprep.subr.bf16.mxu1 %v8979_v19 }
  0x2e   :  { %461 = vmatprep.subr.bf16.mxu0 %v8973_v6 }
  0x30   :  { %320 = vmatmul.mubr.bf16.vlgmr.msra.gmra.mxu0 %v9540_v18  ;;  %377 = vmatpush1.bf16.msra.mxu1 %v8981_v21 }
  0x31   :  { %378 = vmatprep.subr.bf16.mxu1 %v8982_v22  ;;  %462 = vmatpush1.bf16.msra.mxu0 %v8975_v7 }
  0x32   :  { %463 = vmatprep.subr.bf16.mxu0 %v8976_v13  ;;  %485 = vmatprep.mubr.bf16.mxu0 %v9540_v18 }
  0x34   :  { %379 = vmatpush1.bf16.msra.mxu1 %v8984_v23 }
  0x35   :  { %464 = vmatpush1.bf16.msra.mxu0 %v8978_v17  ;;  %549 = vmatprep.subr.bf16.mxu1 %v8973_v6 }
  0x36   :  { %465 = vmatprep.subr.bf16.mxu0 %v8979_v19 }
  0x39   :  { %466 = vmatpush1.bf16.msra.mxu0 %v8981_v21 }
  0x3a   :  { %467 = vmatprep.subr.bf16.mxu0 %v8982_v22 }
  0x3d   :  { %468 = vmatpush1.bf16.msra.mxu0 %v8984_v23 }
  0x3e   :  { %639 = vmatprep.subr.bf16.mxu0 %v8973_v6 }
  0x3f   :  { %34 = vsyncpa [#allocation4], 0  ;;  %v9746_v25 = vshrl.u32 %v149_v24, 7  ;;  %s11702_s5 = sld [smem:[#allocation16_spill]]  ;;  %s9541_s28 = smov 64   ;;  %vm283_vm6 = vcmask 523264  }
  0x40   :  { %v9778_v1 = vld [vmem:[%s11699_s6 + $0x30] ss:$8 sps:$4 sm:$0xff]   ;;  %v9785_v3 = vld [vmem:[%s11699_s6 + $0x24] ss:$8 sps:$4 sm:$0xff]   ;;  %v9791_v4 = vld [vmem:[%s11699_s6 + $0x20] ss:$8 sps:$4 sm:$0xff]  }
  0x41   :  { %v9751_v27 = vsub.s32 0, %v9746_v25  ;;  %v9760_v35 = vsub.s32 1, %v9746_v25  ;;  %v9797_v5 = vld [vmem:[%s11699_s6 + $0x14] ss:$8 sps:$4 sm:$0xff]   ;;  %v9803_v6 = vld [vmem:[%s11699_s6 + $0x10] ss:$8 sps:$4 sm:$0xff]  }
  0x42   :  { %v9809_v7 = vld [vmem:[%s11699_s6 + $0x4] ss:$8 sps:$4 sm:$0xff]   ;;  %v9815_v8 = vld [vmem:[%s11699_s6] ss:$8 sps:$4 sm:$0xff]   ;;  %v9821_v10 = vld [vmem:[%s11699_s6 + $0x34] ss:$8 sps:$4 sm:$0xff]  }
  0x43   :  { %vm991_vm7 = vcmask 1043456   ;;  %vm993_vm8 = vcmask 1044480   ;;  %vm995_vm9 = vcmask 1045504   ;;  %s11703_s30 = sld [smem:[#allocation14_spill]]  ;;  %vm997_vm10 = vcmask 1046528   ;;  %s9542_s3 = smov 96  }
  0x44   :  { %s11704_s11 = sld [smem:[#allocation17_spill]]  ;;  %vm1963_vm11 = vcmask 261120   ;;  %s9544_s29 = smov 120   ;;  %vm2017_vm12 = vcmask 64512   ;;  %vm2064_vm13 = vcmask 36864   ;;  %vm2079_vm14 = vcmask 39936  }
  0x45   :  { %v167_v28 = vld [vmem:[%s11702_s5] sm:$0x3]  ;;  %s11705_s2 = sld [smem:[#allocation10_spill]]  ;;  %s9546_s1 = smov 112   ;;  %vm2660_vm15 = vcmask 258048  }
  0x46   :  { %v172_v31 = vrot.slane %v167_v28, %v9751_v27  ;;  %v176_v38 = vrot.slane %v167_v28, %v9760_v35  ;;  %s11706_s4 = sld [smem:[#allocation11_spill]]  ;;  %s11680_s8 = smov 72  }
  0x47   :  { %s11707_s9 = sld [smem:[#allocation12_spill]]  ;;  %s11711_s0 = smov 72  }
  0xe0   :  { %v9748_v26 = vpop.f32.mrf.mxu0 }
  0xe2   :  { %v8774_v29 = vpop.f32.mrf.mxu0 }
  0xe4   :  { %v139_v30 = vpop.f32.mrf.mxu0 }
  0xe6   :  { %v8775_v32 = vpop.f32.mrf.mxu0 }
  0xe7   :  { %v236_v33 = vpop.f32.mrf.mxu1 }
  0xe8   :  { %v9757_v34 = vadd.f32 %v236_v33, %v172_v31 }
  0xe9   :  { %v238_v36 = vpop.f32.mrf.mxu1 }
  0xea   :  { %v9763_v41 = vadd.f32 %v238_v36, %v176_v38 }
  0xeb   :  { %v240_v37 = vpop.f32.mrf.mxu1 }
  0xed   :  { %v241_v39 = vpop.f32.mrf.mxu1 }
  0xf0   :  { %v321_v40 = vpop.f32.mrf.mxu0 }
  0xf1   :  { %v328_v47 = vadd.f32 %v321_v40, %v9757_v34 }
  0xf2   :  { %v323_v42 = vpop.f32.mrf.mxu0 }
  0xf3   :  { %v329_v43 = vadd.f32 %v323_v42, %v9763_v41  ;;  %v7589_v48 = vmul.f32 -1.442695, %v328_v47 }
  0xf4   :  { %v325_v44 = vpop.f32.mrf.mxu0 }
  0xf5   :  { %9275 = vtanh.f32 %v329_v43  ;;  %v7590_v58 = vmul.f32 -1.442695, %v329_v43 }
  0xf6   :  { %v326_v45 = vpop.f32.mrf.mxu0  ;;  %9277 = vpow2.f32 %v7589_v48 }
 0x102   :  { %v9276_v46 = vpop.eup %9275 }
 0x103   :  { %345 = vrot.lane.b32.xlu0 %v9276_v46, %s9541_s28  ;;  %v9278_v49 = vpop.eup %9277 }
 0x104   :  { %v336_v50 = vadd.f32 1.0, %v9278_v49 }
 0x106   :  { %9279 = vrcp.f32 %v336_v50 }
 0x113   :  { %v9280_v51 = vpop.eup %9279 }
 0x114   :  { %v343_v54 = vmul.f32 0.0, %v9280_v51 }
 0x175   :  { %v346_v52 = vpop.permute.xlu0 %345 }
 0x176   :  { %v348_v53 = vmul.f32 %v9280_v51, %v346_v52 }
 0x178   :  { %350 = vrot.lane.b32.xlu0 %v348_v53, %s9541_s28 }
 0x1ea   :  { %v351_v55 = vpop.permute.xlu0 %350 }
 0x1eb   :  { %v353_v56 = vadd.f32 %v351_v55, %v343_v54 }
 0x1ed   :  { %9281 = vtanh.f32 %v353_v56  ;;  %v427_v30 = vrot.slane %v353_v56, 7 }
 0x1ee   :  { %9283 = vpow2.f32 %v7590_v58 }
 0x1fa   :  { %v9282_v57 = vpop.eup %9281 }
 0x1fb   :  { %356 = vrot.lane.b32.xlu1 %v9282_v57, %s9541_s28  ;;  %v9284_v59 = vpop.eup %9283 }
 0x1fc   :  { %v337_v60 = vadd.f32 1.0, %v9284_v59 }
 0x1fe   :  { %9285 = vrcp.f32 %v337_v60 }
 0x20b   :  { %v9286_v61 = vpop.eup %9285 }
 0x26d   :  { %v357_v62 = vpop.permute.xlu1 %356 }
 0x26e   :  { %v9770_v63 = vmul.f32 %v9286_v61, %v357_v62 }
 0x270   :  { %v360_v0 = vpack.c.bf16 %v9770_v63, %v9770_v63 }
 0x272   :  { %7591 = vmatmul.mubr.msk.bf16.vlgmr.msra.gmra.mxu1 %vm283_vm6, %v360_v0 }
 0x273   :  { %550 = vmatpush1.bf16.msra.mxu1 %v9778_v1  ;;  %573 = vmatprep.mubr.bf16.mxu1 %v9540_v18 }
 0x274   :  { %551 = vmatprep.subr.bf16.mxu1 %v9785_v3 }
 0x277   :  { %552 = vmatpush1.bf16.msra.mxu1 %v9791_v4 }
 0x278   :  { %553 = vmatprep.subr.bf16.mxu1 %v9797_v5 }
 0x27b   :  { %554 = vmatpush1.bf16.msra.mxu1 %v9803_v6 }
 0x27c   :  { %555 = vmatprep.subr.bf16.mxu1 %v9809_v7 }
 0x27f   :  { %556 = vmatpush1.bf16.msra.mxu1 %v9815_v8 }
 0x280   :  { %727 = vmatprep.subr.bf16.mxu1 %v9821_v10 }
 0x332   :  { %v398_v11 = vpop.f32.mrf.mxu1 }
 0x333   :  { %v407_v19 = vrot.slane %v398_v11, 7 }
 0x334   :  { %v400_v12 = vpop.f32.mrf.mxu1 }
 0x335   :  { %v408_v13 = vrot.slane %v400_v12, 7  ;;  %v411_v20 = vadd.f32 %v407_v19, %v9757_v34 }
 0x336   :  { %v402_v14 = vpop.f32.mrf.mxu1 }
 0x337   :  { %v412_v15 = vadd.f32 %v408_v13, %v9763_v41  ;;  %v7592_v21 = vmul.f32 -1.442695, %v411_v20 }
 0x338   :  { %v403_v16 = vpop.f32.mrf.mxu1 }
 0x339   :  { %9287 = vtanh.f32 %v412_v15  ;;  %v7593_v37 = vmul.f32 -1.442695, %v412_v15 }
 0x33a   :  { %9289 = vpow2.f32 %v7592_v21 }
 0x346   :  { %v9288_v17 = vpop.eup %9287 }
 0x347   :  { %431 = vrot.lane.b32.xlu1 %v9288_v17, %s9541_s28  ;;  %v9290_v22 = vpop.eup %9289 }
 0x348   :  { %v419_v23 = vadd.f32 1.0, %v9290_v22 }
 0x34a   :  { %9291 = vrcp.f32 %v419_v23 }
 0x357   :  { %v9292_v24 = vpop.eup %9291 }
 0x358   :  { %v429_v31 = vmul.f32 %v9292_v24, %v427_v30 }
 0x3b9   :  { %v432_v28 = vpop.permute.xlu1 %431 }
 0x3ba   :  { %v434_v29 = vmul.f32 %v9292_v24, %v432_v28 }
 0x3bc   :  { %436 = vrot.lane.b32.xlu0 %v434_v29, %s9541_s28 }
 0x42e   :  { %v437_v32 = vpop.permute.xlu0 %436 }
 0x42f   :  { %v439_v33 = vadd.f32 %v437_v32, %v429_v31 }
 0x431   :  { %9293 = vtanh.f32 %v439_v33  ;;  %v516_v61 = vrot.slane %v439_v33, 7 }
 0x432   :  { %9295 = vpow2.f32 %v7593_v37 }
 0x43e   :  { %v9294_v36 = vpop.eup %9293 }
 0x43f   :  { %442 = vrot.lane.b32.xlu1 %v9294_v36, %s9541_s28  ;;  %v9296_v38 = vpop.eup %9295 }
 0x440   :  { %v420_v39 = vadd.f32 1.0, %v9296_v38 }
 0x442   :  { %9297 = vrcp.f32 %v420_v39 }
 0x44f   :  { %v9298_v40 = vpop.eup %9297 }
 0x4b1   :  { %v443_v42 = vpop.permute.xlu1 %442 }
 0x4b2   :  { %v445_v43 = vmul.f32 %v9298_v40, %v443_v42 }
 0x4b4   :  { %v446_v44 = vpack.c.bf16 %v445_v43, %v445_v43  ;;  %v988_v20 = vsel %vm192_vm3, %v9770_v63, %v445_v43 }
 0x4b6   :  { %v448_v45 = vshrl.u32 %v446_v44, 16 }
 0x4b8   :  { %7594 = vmatmul.mubr.msk.bf16.vlgmr.msra.gmra.mxu0 %vm283_vm6, %v448_v45 }
 0x4b9   :  { %640 = vmatpush1.bf16.msra.mxu0 %v9778_v1  ;;  %663 = vmatprep.mubr.bf16.mxu0 %v9540_v18 }
 0x4ba   :  { %641 = vmatprep.subr.bf16.mxu0 %v9785_v3 }
 0x4bd   :  { %642 = vmatpush1.bf16.msra.mxu0 %v9791_v4 }
 0x4be   :  { %643 = vmatprep.subr.bf16.mxu0 %v9797_v5 }
 0x4c1   :  { %644 = vmatpush1.bf16.msra.mxu0 %v9803_v6 }
 0x4c2   :  { %645 = vmatprep.subr.bf16.mxu0 %v9809_v7 }
 0x4c5   :  { %646 = vmatpush1.bf16.msra.mxu0 %v9815_v8 }
 0x4c6   :  { %817 = vmatprep.subr.bf16.mxu0 %v9821_v10 }
 0x578   :  { %v487_v46 = vpop.f32.mrf.mxu0 }
 0x579   :  { %v496_v53 = vrot.slane %v487_v46, 6 }
 0x57a   :  { %v489_v47 = vpop.f32.mrf.mxu0 }
 0x57b   :  { %v497_v48 = vrot.slane %v489_v47, 6  ;;  %v500_v54 = vadd.f32 %v496_v53, %v9757_v34 }
 0x57c   :  { %v491_v49 = vpop.f32.mrf.mxu0 }
 0x57d   :  { %v501_v50 = vadd.f32 %v497_v48, %v9763_v41  ;;  %v7595_v55 = vmul.f32 -1.442695, %v500_v54 }
 0x57e   :  { %v492_v51 = vpop.f32.mrf.mxu0 }
 0x57f   :  { %9299 = vtanh.f32 %v501_v50  ;;  %v7596_v13 = vmul.f32 -1.442695, %v501_v50 }
 0x580   :  { %9301 = vpow2.f32 %v7595_v55 }
 0x58c   :  { %v9300_v52 = vpop.eup %9299 }
 0x58d   :  { %520 = vrot.lane.b32.xlu0 %v9300_v52, %s9541_s28  ;;  %v9302_v56 = vpop.eup %9301 }
 0x58e   :  { %v508_v57 = vadd.f32 1.0, %v9302_v56 }
 0x590   :  { %9303 = vrcp.f32 %v508_v57 }
 0x59d   :  { %v9304_v58 = vpop.eup %9303 }
 0x59e   :  { %v518_v62 = vmul.f32 %v9304_v58, %v516_v61 }
 0x5ff   :  { %v521_v59 = vpop.permute.xlu0 %520 }
 0x600   :  { %v523_v60 = vmul.f32 %v9304_v58, %v521_v59 }
 0x602   :  { %525 = vrot.lane.b32.xlu1 %v523_v60, %s9541_s28 }
 0x674   :  { %v526_v0 = vpop.permute.xlu1 %525 }
 0x675   :  { %v528_v11 = vadd.f32 %v526_v0, %v518_v62 }
 0x677   :  { %9305 = vtanh.f32 %v528_v11  ;;  %v604_v43 = vrot.slane %v528_v11, 7 }
 0x678   :  { %9307 = vpow2.f32 %v7596_v13 }
 0x684   :  { %v9306_v12 = vpop.eup %9305 }
 0x685   :  { %531 = vrot.lane.b32.xlu0 %v9306_v12, %s9541_s28  ;;  %v9308_v14 = vpop.eup %9307 }
 0x686   :  { %v509_v15 = vadd.f32 1.0, %v9308_v14 }
 0x688   :  { %9309 = vrcp.f32 %v509_v15 }
 0x695   :  { %v9310_v16 = vpop.eup %9309 }
 0x6f7   :  { %v532_v17 = vpop.permute.xlu0 %531 }
 0x6f8   :  { %v534_v19 = vmul.f32 %v9310_v16, %v532_v17 }
 0x6fa   :  { %v535_v21 = vpack.c.bf16 %v534_v19, %v534_v19  ;;  %v989_v22 = vsel %vm193_vm4, %v988_v20, %v534_v19 }
 0x6fc   :  { %v537_v23 = vrot.slane %v535_v21, 1 }
 0x6fe   :  { %7597 = vmatmul.mubr.msk.bf16.vlgmr.msra.gmra.mxu1 %vm283_vm6, %v537_v23 }
 0x6ff   :  { %728 = vmatpush1.bf16.msra.mxu1 %v9778_v1  ;;  %751 = vmatprep.mubr.bf16.mxu1 %v9540_v18 }
 0x700   :  { %729 = vmatprep.subr.bf16.mxu1 %v9785_v3 }
 0x703   :  { %730 = vmatpush1.bf16.msra.mxu1 %v9791_v4 }
 0x704   :  { %731 = vmatprep.subr.bf16.mxu1 %v9797_v5 }
 0x707   :  { %732 = vmatpush1.bf16.msra.mxu1 %v9803_v6 }
 0x708   :  { %733 = vmatprep.subr.bf16.mxu1 %v9809_v7 }
 0x70b   :  { %734 = vmatpush1.bf16.msra.mxu1 %v9815_v8 }
 0x70c   :  { %905 = vmatprep.subr.bf16.mxu1 %v9821_v10 }
 0x7be   :  { %v575_v63 = vpop.f32.mrf.mxu1 }
 0x7bf   :  { %v584_v33 = vrot.slane %v575_v63, 5 }
 0x7c0   :  { %v577_v24 = vpop.f32.mrf.mxu1 }
 0x7c1   :  { %v585_v28 = vrot.slane %v577_v24, 5  ;;  %v588_v36 = vadd.f32 %v584_v33, %v9757_v34 }
 0x7c2   :  { %v579_v29 = vpop.f32.mrf.mxu1 }
 0x7c3   :  { %v589_v30 = vadd.f32 %v585_v28, %v9763_v41  ;;  %v7598_v37 = vmul.f32 -1.442695, %v588_v36 }
 0x7c4   :  { %v580_v31 = vpop.f32.mrf.mxu1 }
 0x7c5   :  { %9311 = vtanh.f32 %v589_v30  ;;  %v7599_v48 = vmul.f32 -1.442695, %v589_v30 }
 0x7c6   :  { %9313 = vpow2.f32 %v7598_v37 }
 0x7d2   :  { %v9312_v32 = vpop.eup %9311 }
 0x7d3   :  { %608 = vrot.lane.b32.xlu1 %v9312_v32, %s9541_s28  ;;  %v9314_v38 = vpop.eup %9313 }
 0x7d4   :  { %v596_v39 = vadd.f32 1.0, %v9314_v38 }
 0x7d6   :  { %9315 = vrcp.f32 %v596_v39 }
 0x7e3   :  { %v9316_v10 = vpop.eup %9315 }
 0x7e4   :  { %v606_v44 = vmul.f32 %v9316_v10, %v604_v43 }
 0x845   :  { %v609_v40 = vpop.permute.xlu1 %608 }
 0x846   :  { %v611_v42 = vmul.f32 %v9316_v10, %v609_v40 }
 0x848   :  { %613 = vrot.lane.b32.xlu0 %v611_v42, %s9541_s28 }
 0x8ba   :  { %v614_v45 = vpop.permute.xlu0 %613 }
 0x8bb   :  { %v616_v46 = vadd.f32 %v614_v45, %v606_v44 }
 0x8bd   :  { %9317 = vtanh.f32 %v616_v46  ;;  %v694_v21 = vrot.slane %v616_v46, 7 }
 0x8be   :  { %9319 = vpow2.f32 %v7599_v48 }
 0x8ca   :  { %v9318_v47 = vpop.eup %9317 }
 0x8cb   :  { %619 = vrot.lane.b32.xlu1 %v9318_v47, %s9541_s28  ;;  %v9320_v49 = vpop.eup %9319 }
 0x8cc   :  { %v597_v50 = vadd.f32 1.0, %v9320_v49 }
 0x8ce   :  { %9321 = vrcp.f32 %v597_v50 }
 0x8db   :  { %v9322_v51 = vpop.eup %9321 }
 0x93d   :  { %v620_v52 = vpop.permute.xlu1 %619 }
 0x93e   :  { %v622_v53 = vmul.f32 %v9322_v51, %v620_v52 }
 0x940   :  { %v623_v54 = vpack.c.bf16 %v622_v53, %v622_v53  ;;  %v990_v55 = vsel %vm98_vm0, %v989_v22, %v622_v53 }
 0x942   :  { %v625_v56 = vshrl.u32 %v623_v54, 16 }
 0x944   :  { %v627_v57 = vrot.slane %v625_v56, 1 }
 0x946   :  { %7600 = vmatmul.mubr.msk.bf16.vlgmr.msra.gmra.mxu0 %vm283_vm6, %v627_v57 }
 0x947   :  { %818 = vmatpush1.bf16.msra.mxu0 %v9778_v1  ;;  %841 = vmatprep.mubr.bf16.mxu0 %v9540_v18 }
 0x948   :  { %819 = vmatprep.subr.bf16.mxu0 %v9785_v3 }
 0x94b   :  { %820 = vmatpush1.bf16.msra.mxu0 %v9791_v4 }
 0x94c   :  { %821 = vmatprep.subr.bf16.mxu0 %v9797_v5 }
 0x94f   :  { %822 = vmatpush1.bf16.msra.mxu0 %v9803_v6 }
 0x950   :  { %823 = vmatprep.subr.bf16.mxu0 %v9809_v7 }
 0x953   :  { %824 = vmatpush1.bf16.msra.mxu0 %v9815_v8 }
 0xa06   :  { %v665_v58 = vpop.f32.mrf.mxu0 }
 0xa07   :  { %v674_v12 = vrot.slane %v665_v58, 4 }
 0xa08   :  { %v667_v59 = vpop.f32.mrf.mxu0 }
 0xa09   :  { %v675_v60 = vrot.slane %v667_v59, 4  ;;  %v678_v13 = vadd.f32 %v674_v12, %v9757_v34 }
 0xa0a   :  { %v669_v61 = vpop.f32.mrf.mxu0 }
 0xa0b   :  { %v679_v62 = vadd.f32 %v675_v60, %v9763_v41  ;;  %v7601_v14 = vmul.f32 -1.442695, %v678_v13 }
 0xa0c   :  { %v670_v0 = vpop.f32.mrf.mxu0 }
 0xa0d   :  { %9323 = vtanh.f32 %v679_v62  ;;  %v7602_v28 = vmul.f32 -1.442695, %v679_v62 }
 0xa0e   :  { %9325 = vpow2.f32 %v7601_v14 }
 0xa1a   :  { %v9324_v11 = vpop.eup %9323 }
 0xa1b   :  { %698 = vrot.lane.b32.xlu0 %v9324_v11, %s9541_s28  ;;  %v9326_v15 = vpop.eup %9325 }
 0xa1c   :  { %v686_v16 = vadd.f32 1.0, %v9326_v15 }
 0xa1e   :  { %9327 = vrcp.f32 %v686_v16 }
 0xa2b   :  { %v9328_v17 = vpop.eup %9327 }
 0xa2c   :  { %v696_v22 = vmul.f32 %v9328_v17, %v694_v21 }
 0xa8d   :  { %v699_v19 = vpop.permute.xlu0 %698 }
 0xa8e   :  { %v701_v20 = vmul.f32 %v9328_v17, %v699_v19 }
 0xa90   :  { %703 = vrot.lane.b32.xlu1 %v701_v20, %s9541_s28 }
 0xb02   :  { %v704_v23 = vpop.permute.xlu1 %703 }
 0xb03   :  { %v706_v63 = vadd.f32 %v704_v23, %v696_v22 }
 0xb05   :  { %9329 = vtanh.f32 %v706_v63  ;;  %v782_v47 = vrot.slane %v706_v63, 7 }
 0xb06   :  { %9331 = vpow2.f32 %v7602_v28 }
 0xb12   :  { %v9330_v24 = vpop.eup %9329 }
 0xb13   :  { %709 = vrot.lane.b32.xlu0 %v9330_v24, %s9541_s28  ;;  %v9332_v29 = vpop.eup %9331 }
 0xb14   :  { %v687_v30 = vadd.f32 1.0, %v9332_v29 }
 0xb16   :  { %9333 = vrcp.f32 %v687_v30 }
 0xb23   :  { %v9334_v31 = vpop.eup %9333 }
 0xb85   :  { %v710_v32 = vpop.permute.xlu0 %709 }
 0xb86   :  { %v712_v33 = vmul.f32 %v9334_v31, %v710_v32 }
 0xb88   :  { %v713_v36 = vpack.c.bf16 %v712_v33, %v712_v33  ;;  %v992_v37 = vsel %vm991_vm7, %v990_v55, %v712_v33 }
 0xb8a   :  { %v715_v38 = vrot.slane %v713_v36, 2 }
 0xb8c   :  { %7603 = vmatmul.mubr.msk.bf16.vlgmr.msra.gmra.mxu1 %vm283_vm6, %v715_v38 }
 0xb8d   :  { %906 = vmatpush1.bf16.msra.mxu1 %v9778_v1  ;;  %929 = vmatprep.mubr.bf16.mxu1 %v9540_v18 }
 0xb8e   :  { %907 = vmatprep.subr.bf16.mxu1 %v9785_v3 }
 0xb91   :  { %908 = vmatpush1.bf16.msra.mxu1 %v9791_v4 }
 0xb92   :  { %909 = vmatprep.subr.bf16.mxu1 %v9797_v5 }
 0xb95   :  { %910 = vmatpush1.bf16.msra.mxu1 %v9803_v6 }
 0xb96   :  { %911 = vmatprep.subr.bf16.mxu1 %v9809_v7 }
 0xb99   :  { %912 = vmatpush1.bf16.msra.mxu1 %v9815_v8 }
 0xc4c   :  { %v753_v39 = vpop.f32.mrf.mxu1 }
 0xc4d   :  { %v762_v3 = vrot.slane %v753_v39, 3 }
 0xc4e   :  { %v755_v10 = vpop.f32.mrf.mxu1 }
 0xc4f   :  { %v763_v40 = vrot.slane %v755_v10, 3  ;;  %v766_v4 = vadd.f32 %v762_v3, %v9757_v34 }
 0xc50   :  { %v757_v42 = vpop.f32.mrf.mxu1 }
 0xc51   :  { %v767_v1 = vadd.f32 %v763_v40, %v9763_v41  ;;  %v7604_v5 = vmul.f32 -1.442695, %v766_v4 }
 0xc52   :  { %v758_v43 = vpop.f32.mrf.mxu1 }
 0xc53   :  { %9335 = vtanh.f32 %v767_v1  ;;  %v7605_v52 = vmul.f32 -1.442695, %v767_v1 }
 0xc54   :  { %9337 = vpow2.f32 %v7604_v5 }
 0xc60   :  { %v9336_v44 = vpop.eup %9335 }
 0xc61   :  { %786 = vrot.lane.b32.xlu1 %v9336_v44, %s9541_s28  ;;  %v9338_v6 = vpop.eup %9337 }
 0xc62   :  { %v774_v7 = vadd.f32 1.0, %v9338_v6 }
 0xc64   :  { %9339 = vrcp.f32 %v774_v7 }
 0xc71   :  { %v9340_v8 = vpop.eup %9339 }
 0xc72   :  { %v784_v48 = vmul.f32 %v9340_v8, %v782_v47 }
 0xcd3   :  { %v787_v45 = vpop.permute.xlu1 %786 }
 0xcd4   :  { %v789_v46 = vmul.f32 %v9340_v8, %v787_v45 }
 0xcd6   :  { %791 = vrot.lane.b32.xlu0 %v789_v46, %s9541_s28 }
 0xd48   :  { %v792_v49 = vpop.permute.xlu0 %791 }
 0xd49   :  { %v794_v50 = vadd.f32 %v792_v49, %v784_v48 }
 0xd4b   :  { %9341 = vtanh.f32 %v794_v50  ;;  %v872_v24 = vrot.slane %v794_v50, 7 }
 0xd4c   :  { %9343 = vpow2.f32 %v7605_v52  ;;  %v8990_v52 = vld [vmem:[%s11703_s30 + $0x34] ss:$8 sps:$4 sm:$0xff]  }
 0xd4d   :  { %1072 = vmatprep.subr.bf16.mxu0 %v8990_v52 }
 0xd58   :  { %v9342_v51 = vpop.eup %9341 }
 0xd59   :  { %797 = vrot.lane.b32.xlu1 %v9342_v51, %s9541_s28  ;;  %v9344_v53 = vpop.eup %9343  ;;  %v9921_v51 = vld [vmem:[%s11699_s6 + $0x70] ss:$8 sps:$4 sm:$0xff]  }
 0xd5a   :  { %v775_v54 = vadd.f32 1.0, %v9344_v53  ;;  %v9932_v53 = vld [vmem:[%s11699_s6 + $0x64] ss:$8 sps:$4 sm:$0xff]  }
 0xd5c   :  { %9345 = vrcp.f32 %v775_v54  ;;  %v8996_v54 = vld [vmem:[%s11703_s30 + $0x24] ss:$8 sps:$4 sm:$0xff]  }
 0xd69   :  { %v9346_v55 = vpop.eup %9345 }
 0xdcb   :  { %v798_v56 = vpop.permute.xlu1 %797 }
 0xdcc   :  { %v800_v57 = vmul.f32 %v9346_v55, %v798_v56  ;;  %v9942_v55 = vld [vmem:[%s11699_s6 + $0x60] ss:$8 sps:$4 sm:$0xff]  }
 0xdcd   :  { %v8994_v56 = vld [vmem:[%s11703_s30 + $0x20] ss:$8 sps:$4 sm:$0xff]  }
 0xdce   :  { %v801_v58 = vpack.c.bf16 %v800_v57, %v800_v57  ;;  %v994_v59 = vsel %vm993_vm8, %v992_v37, %v800_v57  ;;  %v9951_v57 = vld [vmem:[%s11699_s6 + $0x54] ss:$8 sps:$4 sm:$0xff]  }
 0xdd0   :  { %v803_v60 = vshrl.u32 %v801_v58, 16  ;;  %v9002_v58 = vld [vmem:[%s11703_s30 + $0x14] ss:$8 sps:$4 sm:$0xff]  }
 0xdd2   :  { %v805_v61 = vrot.slane %v803_v60, 2  ;;  %v9000_v60 = vld [vmem:[%s11703_s30 + $0x10] ss:$8 sps:$4 sm:$0xff]  }
 0xdd4   :  { %7606 = vmatmul.mubr.msk.bf16.vlgmr.msra.gmra.mxu0 %vm283_vm6, %v805_v61  ;;  %v9969_v61 = vld [vmem:[%s11699_s6 + $0x44] ss:$8 sps:$4 sm:$0xff]  }
 0xdd5   :  { %1096 = vmatprep.mubr.bf16.mxu0 %v9540_v18 }
 0xe94   :  { %v843_v62 = vpop.f32.mrf.mxu0 }
 0xe95   :  { %v852_v16 = vrot.slane %v843_v62, 2  ;;  %v9975_v62 = vld [vmem:[%s11699_s6 + $0x40] ss:$8 sps:$4 sm:$0xff]  }
 0xe96   :  { %v845_v0 = vpop.f32.mrf.mxu0 }
 0xe97   :  { %v853_v11 = vrot.slane %v845_v0, 2  ;;  %v856_v17 = vadd.f32 %v852_v16, %v9757_v34 }
 0xe98   :  { %v847_v12 = vpop.f32.mrf.mxu0 }
 0xe99   :  { %v857_v13 = vadd.f32 %v853_v11, %v9763_v41  ;;  %v7607_v19 = vmul.f32 -1.442695, %v856_v17 }
 0xe9a   :  { %v848_v14 = vpop.f32.mrf.mxu0 }
 0xe9b   :  { %9347 = vtanh.f32 %v857_v13  ;;  %v7608_v32 = vmul.f32 -1.442695, %v857_v13  ;;  %v9008_v14 = vld [vmem:[%s11703_s30 + $0x4] ss:$8 sps:$4 sm:$0xff]  }
 0xe9c   :  { %9349 = vpow2.f32 %v7607_v19 }
 0xea8   :  { %v9348_v15 = vpop.eup %9347 }
 0xea9   :  { %876 = vrot.lane.b32.xlu0 %v9348_v15, %s9541_s28  ;;  %v9350_v20 = vpop.eup %9349  ;;  %v9006_v15 = vld [vmem:[%s11703_s30] ss:$8 sps:$4 sm:$0xff]  }
 0xeaa   :  { %v864_v21 = vadd.f32 1.0, %v9350_v20 }
 0xeac   :  { %9351 = vrcp.f32 %v864_v21 }
 0xeb9   :  { %v9352_v22 = vpop.eup %9351 }
 0xeba   :  { %v874_v28 = vmul.f32 %v9352_v22, %v872_v24 }
 0xf1b   :  { %v877_v23 = vpop.permute.xlu0 %876 }
 0xf1c   :  { %v879_v63 = vmul.f32 %v9352_v22, %v877_v23 }
 0xf1e   :  { %881 = vrot.lane.b32.xlu1 %v879_v63, %s9541_s28 }
 0xf90   :  { %v882_v29 = vpop.permute.xlu1 %881 }
 0xf91   :  { %v9898_v30 = vadd.f32 %v882_v29, %v874_v28 }
 0xf93   :  { %9353 = vtanh.f32 %v9898_v30  ;;  %v960_v0 = vrot.slane %v9898_v30, 7 }
 0xf94   :  { %9355 = vpow2.f32 %v7608_v32  ;;  %v7620_v32 = vld [vmem:[%s11702_s5 + $0x2] sm:$0x3]  ;;  %s9545_s5 = smov 56  }
 0xfa0   :  { %v9354_v31 = vpop.eup %9353 }
 0xfa1   :  { %887 = vrot.lane.b32.xlu0 %v9354_v31, %s9541_s28  ;;  %v9356_v33 = vpop.eup %9355 }
 0xfa2   :  { %v865_v36 = vadd.f32 1.0, %v9356_v33  ;;  %v1018_v33 = vrot.slane %v7620_v32, %v9760_v35 }
 0xfa4   :  { %9357 = vrcp.f32 %v865_v36 }
 0xfb1   :  { %v9358_v37 = vpop.eup %9357 }
0x1013   :  { %v888_v38 = vpop.permute.xlu0 %887 }
0x1014   :  { %v890_v39 = vmul.f32 %v9358_v37, %v888_v38 }
0x1016   :  { %v891_v10 = vpack.c.bf16 %v890_v39, %v890_v39  ;;  %v9902_v40 = vsel %vm995_vm9, %v994_v59, %v890_v39  ;;  %v9960_v59 = vld [vmem:[%s11699_s6 + $0x50] ss:$8 sps:$4 sm:$0xff]  }
0x1018   :  { %v893_v42 = vrot.slane %v891_v10, 3 }
0x101a   :  { %7609 = vmatmul.mubr.msk.bf16.vlgmr.msra.gmra.mxu1 %vm283_vm6, %v893_v42 }
0x101b   :  { %1177 = vmatprep.mubr.bf16.mxu1 %v9540_v18 }
0x10da   :  { %v931_v1 = vpop.f32.mrf.mxu1 }
0x10db   :  { %v940_v7 = vrot.slane %v931_v1, 1  ;;  %v1014_v1 = vrot.slane %v7620_v32, %v9751_v27 }
0x10dc   :  { %v933_v43 = vpop.f32.mrf.mxu1 }
0x10dd   :  { %v941_v44 = vrot.slane %v933_v43, 1  ;;  %v944_v8 = vadd.f32 %v940_v7, %v9757_v34  ;;  %v8988_v34 = vld [vmem:[%s11703_s30 + $0x30] ss:$8 sps:$4 sm:$0xff]   ;;  %s9543_s30 = smov 88  }
0x10de   :  { %v935_v3 = vpop.f32.mrf.mxu1  ;;  %1073 = vmatpush1.bf16.msra.mxu0 %v8988_v34 }
0x10df   :  { %v9907_v4 = vadd.f32 %v941_v44, %v9763_v41  ;;  %v7610_v45 = vmul.f32 -1.442695, %v944_v8  ;;  %v9916_v41 = vld [vmem:[%s11699_s6 + $0x74] ss:$8 sps:$4 sm:$0xff]   ;;  %1074 = vmatprep.subr.bf16.mxu0 %v8996_v54  ;;  %s11681_s6 = smov 104  }
0x10e0   :  { %v936_v5 = vpop.f32.mrf.mxu1  ;;  %1153 = vmatprep.subr.bf16.mxu1 %v9916_v41 }
0x10e1   :  { %9359 = vtanh.f32 %v9907_v4  ;;  %1154 = vmatpush1.bf16.msra.mxu1 %v9921_v51  ;;  %v7611_v17 = vmul.f32 -1.442695, %v9907_v4 }
0x10e2   :  { %9361 = vpow2.f32 %v7610_v45  ;;  %1155 = vmatprep.subr.bf16.mxu1 %v9932_v53  ;;  %1075 = vmatpush1.bf16.msra.mxu0 %v8994_v56 }
0x10e3   :  { %1076 = vmatprep.subr.bf16.mxu0 %v9002_v58 }
0x10e5   :  { %1156 = vmatpush1.bf16.msra.mxu1 %v9942_v55 }
0x10e6   :  { %1157 = vmatprep.subr.bf16.mxu1 %v9951_v57  ;;  %1077 = vmatpush1.bf16.msra.mxu0 %v9000_v60 }
0x10e7   :  { %1078 = vmatprep.subr.bf16.mxu0 %v9008_v14 }
0x10e9   :  { %1158 = vmatpush1.bf16.msra.mxu1 %v9960_v59 }
0x10ea   :  { %1159 = vmatprep.subr.bf16.mxu1 %v9969_v61  ;;  %1079 = vmatpush1.bf16.msra.mxu0 %v9006_v15 }
0x10eb   :  { %1230 = vmatprep.subr.bf16.mxu0 %v9916_v41 }
0x10ed   :  { %1160 = vmatpush1.bf16.msra.mxu1 %v9975_v62 }
0x10ee   :  { %v9360_v6 = vpop.eup %9359  ;;  %1319 = vmatprep.subr.bf16.mxu1 %v9916_v41 }
0x10ef   :  { %964 = vrot.lane.b32.xlu1 %v9360_v6, %s9541_s28  ;;  %v9362_v46 = vpop.eup %9361 }
0x10f0   :  { %v952_v47 = vadd.f32 1.0, %v9362_v46  ;;  %1178 = vmatmul.mubr.bf16.vlgmr.msra.gmra.mxu1 %v9540_v18 }
0x10f1   :  { %1320 = vmatpush1.bf16.msra.mxu1 %v9921_v51  ;;  %1343 = vmatprep.mubr.bf16.mxu1 %v9540_v18 }
0x10f2   :  { %9363 = vrcp.f32 %v952_v47  ;;  %1321 = vmatprep.subr.bf16.mxu1 %v9932_v53 }
0x10f5   :  { %1322 = vmatpush1.bf16.msra.mxu1 %v9942_v55 }
0x10f6   :  { %1323 = vmatprep.subr.bf16.mxu1 %v9951_v57 }
0x10f9   :  { %1324 = vmatpush1.bf16.msra.mxu1 %v9960_v59 }
0x10fa   :  { %1325 = vmatprep.subr.bf16.mxu1 %v9969_v61 }
0x10fd   :  { %1326 = vmatpush1.bf16.msra.mxu1 %v9975_v62 }
0x10fe   :  { %1497 = vmatprep.subr.bf16.mxu1 %v9916_v41 }
0x10ff   :  { %v9364_v48 = vpop.eup %9363 }
0x1100   :  { %v962_v11 = vmul.f32 %v9364_v48, %v960_v0 }
0x1161   :  { %v965_v49 = vpop.permute.xlu1 %964 }
0x1162   :  { %v967_v50 = vmul.f32 %v9364_v48, %v965_v49 }
0x1164   :  { %969 = vrot.lane.b32.xlu0 %v967_v50, %s9541_s28 }
0x11b0   :  { %v1179_v19 = vpop.f32.mrf.mxu1 }
0x11b2   :  { %v1181_v20 = vpop.f32.mrf.mxu1 }
0x11b4   :  { %v1183_v21 = vpop.f32.mrf.mxu1 }
0x11b6   :  { %v1184_v22 = vpop.f32.mrf.mxu1 }
0x11d6   :  { %v970_v12 = vpop.permute.xlu0 %969 }
0x11d7   :  { %v972_v13 = vadd.f32 %v970_v12, %v962_v11 }
0x11d9   :  { %9365 = vtanh.f32 %v972_v13 }
0x11da   :  { %9367 = vpow2.f32 %v7611_v17 }
0x11e6   :  { %v9366_v16 = vpop.eup %9365 }
0x11e7   :  { %975 = vrot.lane.b32.xlu1 %v9366_v16, %s9541_s28  ;;  %v9368_v23 = vpop.eup %9367 }
0x11e8   :  { %v953_v63 = vadd.f32 1.0, %v9368_v23 }
0x11ea   :  { %9369 = vrcp.f32 %v953_v63 }
0x11f7   :  { %v9370_v24 = vpop.eup %9369 }
0x1259   :  { %v976_v28 = vpop.permute.xlu1 %975 }
0x125a   :  { %v978_v29 = vmul.f32 %v9370_v24, %v976_v28 }
0x125c   :  { %v998_v30 = vsel %vm997_vm10, %v9902_v40, %v978_v29 }
0x125d   :  { %v1007_v31 = vpack.c.bf16 %v998_v30, %v998_v30 }
0x125f   :  { %7629 = vmatmul.mubr.msk.bf16.vlgmr.msra.gmra.mxu0 %vm283_vm6, %v1007_v31 }
0x1260   :  { %1231 = vmatpush1.bf16.msra.mxu0 %v9921_v51  ;;  %1254 = vmatprep.mubr.bf16.mxu0 %v9540_v18 }
0x1261   :  { %1232 = vmatprep.subr.bf16.mxu0 %v9932_v53 }
0x1264   :  { %1233 = vmatpush1.bf16.msra.mxu0 %v9942_v55 }
0x1265   :  { %1234 = vmatprep.subr.bf16.mxu0 %v9951_v57 }
0x1268   :  { %1235 = vmatpush1.bf16.msra.mxu0 %v9960_v59 }
0x1269   :  { %1236 = vmatprep.subr.bf16.mxu0 %v9969_v61 }
0x126c   :  { %1237 = vmatpush1.bf16.msra.mxu0 %v9975_v62 }
0x126d   :  { %1407 = vmatprep.subr.bf16.mxu0 %v9916_v41 }
0x131f   :  { %v1098_v36 = vpop.f32.mrf.mxu0 }
0x1320   :  { %v10020_v43 = vadd.f32 %v1098_v36, %v1014_v1 }
0x1321   :  { %v1100_v37 = vpop.f32.mrf.mxu0 }
0x1322   :  { %v10015_v38 = vadd.f32 %v1100_v37, %v1018_v33  ;;  %v1186_v44 = vadd.f32 %v1179_v19, %v10020_v43 }
0x1323   :  { %v1102_v39 = vpop.f32.mrf.mxu0 }
0x1324   :  { %v1187_v10 = vadd.f32 %v1181_v20, %v10015_v38  ;;  %v7638_v3 = vmul.f32 -1.442695, %v1186_v44 }
0x1325   :  { %v1103_v40 = vpop.f32.mrf.mxu0 }
0x1326   :  { %9371 = vtanh.f32 %v1187_v10  ;;  %v7639_v49 = vmul.f32 -1.442695, %v1187_v10 }
0x1327   :  { %9373 = vpow2.f32 %v7638_v3 }
0x1333   :  { %v9372_v42 = vpop.eup %9371 }
0x1334   :  { %1203 = vrot.lane.b32.xlu0 %v9372_v42, %s9541_s28  ;;  %v9374_v4 = vpop.eup %9373 }
0x1335   :  { %v1194_v5 = vadd.f32 1.0, %v9374_v4 }
0x1337   :  { %9375 = vrcp.f32 %v1194_v5 }
0x1344   :  { %v9376_v6 = vpop.eup %9375 }
0x1345   :  { %v1201_v45 = vmul.f32 0.0, %v9376_v6 }
0x13a6   :  { %v1204_v7 = vpop.permute.xlu0 %1203 }
0x13a7   :  { %v1206_v8 = vmul.f32 %v9376_v6, %v1204_v7 }
0x13a9   :  { %1208 = vrot.lane.b32.xlu1 %v1206_v8, %s9541_s28 }
0x141b   :  { %v1209_v46 = vpop.permute.xlu1 %1208 }
0x141c   :  { %v1211_v47 = vadd.f32 %v1209_v46, %v1201_v45 }
0x141e   :  { %9377 = vtanh.f32 %v1211_v47  ;;  %v1285_v24 = vrot.slane %v1211_v47, 7 }
0x141f   :  { %9379 = vpow2.f32 %v7639_v49 }
0x142b   :  { %v9378_v48 = vpop.eup %9377 }
0x142c   :  { %1214 = vrot.lane.b32.xlu0 %v9378_v48, %s9541_s28  ;;  %v9380_v50 = vpop.eup %9379 }
0x142d   :  { %v1195_v34 = vadd.f32 1.0, %v9380_v50 }
0x142f   :  { %9381 = vrcp.f32 %v1195_v34 }
0x143c   :  { %v9382_v52 = vpop.eup %9381 }
0x149e   :  { %v1215_v54 = vpop.permute.xlu0 %1214 }
0x149f   :  { %v1217_v56 = vmul.f32 %v9382_v52, %v1215_v54 }
0x14a1   :  { %v1218_v58 = vpack.c.bf16 %v1217_v56, %v1217_v56 }
0x14a3   :  { %7640 = vmatmul.mubr.msk.bf16.vlgmr.msra.gmra.mxu0 %vm283_vm6, %v1218_v58 }
0x14a4   :  { %1408 = vmatpush1.bf16.msra.mxu0 %v9921_v51  ;;  %1431 = vmatprep.mubr.bf16.mxu0 %v9540_v18 }
0x14a5   :  { %1409 = vmatprep.subr.bf16.mxu0 %v9932_v53 }
0x14a8   :  { %1410 = vmatpush1.bf16.msra.mxu0 %v9942_v55 }
0x14a9   :  { %1411 = vmatprep.subr.bf16.mxu0 %v9951_v57 }
0x14ac   :  { %1412 = vmatpush1.bf16.msra.mxu0 %v9960_v59 }
0x14ad   :  { %1413 = vmatprep.subr.bf16.mxu0 %v9969_v61 }
0x14b0   :  { %1414 = vmatpush1.bf16.msra.mxu0 %v9975_v62 }
0x14b1   :  { %1585 = vmatprep.subr.bf16.mxu0 %v9916_v41 }
0x1563   :  { %v1256_v60 = vpop.f32.mrf.mxu0 }
0x1564   :  { %v1265_v16 = vrot.slane %v1256_v60, 7 }
0x1565   :  { %v1258_v0 = vpop.f32.mrf.mxu0 }
0x1566   :  { %v1266_v11 = vrot.slane %v1258_v0, 7  ;;  %v1269_v17 = vadd.f32 %v1265_v16, %v10020_v43 }
0x1567   :  { %v1260_v12 = vpop.f32.mrf.mxu0 }
0x1568   :  { %v1270_v13 = vadd.f32 %v1266_v11, %v10015_v38  ;;  %v7641_v19 = vmul.f32 -1.442695, %v1269_v17 }
0x1569   :  { %v1261_v14 = vpop.f32.mrf.mxu0 }
0x156a   :  { %9383 = vtanh.f32 %v1270_v13  ;;  %v7642_v32 = vmul.f32 -1.442695, %v1270_v13 }
0x156b   :  { %9385 = vpow2.f32 %v7641_v19 }
0x1577   :  { %v9384_v15 = vpop.eup %9383 }
0x1578   :  { %1289 = vrot.lane.b32.xlu1 %v9384_v15, %s9541_s28  ;;  %v9386_v20 = vpop.eup %9385 }
0x1579   :  { %v1277_v21 = vadd.f32 1.0, %v9386_v20 }
0x157b   :  { %9387 = vrcp.f32 %v1277_v21 }
0x1588   :  { %v9388_v22 = vpop.eup %9387 }
0x1589   :  { %v1287_v28 = vmul.f32 %v9388_v22, %v1285_v24 }
0x15ea   :  { %v1290_v23 = vpop.permute.xlu1 %1289 }
0x15eb   :  { %v1292_v63 = vmul.f32 %v9388_v22, %v1290_v23 }
0x15ed   :  { %1294 = vrot.lane.b32.xlu0 %v1292_v63, %s9541_s28 }
0x165f   :  { %v1295_v29 = vpop.permute.xlu0 %1294 }
0x1660   :  { %v1297_v30 = vadd.f32 %v1295_v29, %v1287_v28 }
0x1662   :  { %9389 = vtanh.f32 %v1297_v30  ;;  %v1374_v52 = vrot.slane %v1297_v30, 7 }
0x1663   :  { %9391 = vpow2.f32 %v7642_v32 }
0x166f   :  { %v9390_v31 = vpop.eup %9389 }
0x1670   :  { %1300 = vrot.lane.b32.xlu1 %v9390_v31, %s9541_s28  ;;  %v9392_v33 = vpop.eup %9391 }
0x1671   :  { %v1278_v36 = vadd.f32 1.0, %v9392_v33 }
0x1673   :  { %9393 = vrcp.f32 %v1278_v36 }
0x1680   :  { %v9394_v37 = vpop.eup %9393 }
0x16e2   :  { %v1301_v39 = vpop.permute.xlu1 %1300 }
0x16e3   :  { %v1303_v10 = vmul.f32 %v9394_v37, %v1301_v39 }
0x16e5   :  { %v1304_v40 = vpack.c.bf16 %v1303_v10, %v1303_v10 }
0x16e7   :  { %v1306_v42 = vshrl.u32 %v1304_v40, 16 }
0x16e9   :  { %7643 = vmatmul.mubr.msk.bf16.vlgmr.msra.gmra.mxu1 %vm283_vm6, %v1306_v42 }
0x16ea   :  { %1498 = vmatpush1.bf16.msra.mxu1 %v9921_v51  ;;  %1521 = vmatprep.mubr.bf16.mxu1 %v9540_v18 }
0x16eb   :  { %1499 = vmatprep.subr.bf16.mxu1 %v9932_v53 }
0x16ee   :  { %1500 = vmatpush1.bf16.msra.mxu1 %v9942_v55 }
0x16ef   :  { %1501 = vmatprep.subr.bf16.mxu1 %v9951_v57 }
0x16f2   :  { %1502 = vmatpush1.bf16.msra.mxu1 %v9960_v59 }
0x16f3   :  { %1503 = vmatprep.subr.bf16.mxu1 %v9969_v61 }
0x16f6   :  { %1504 = vmatpush1.bf16.msra.mxu1 %v9975_v62 }
0x16f7   :  { %1675 = vmatprep.subr.bf16.mxu1 %v9916_v41 }
0x17a9   :  { %v1345_v1 = vpop.f32.mrf.mxu1 }
0x17aa   :  { %v1354_v8 = vrot.slane %v1345_v1, 6 }
0x17ab   :  { %v1347_v44 = vpop.f32.mrf.mxu1 }
0x17ac   :  { %v1355_v3 = vrot.slane %v1347_v44, 6  ;;  %v1358_v45 = vadd.f32 %v1354_v8, %v10020_v43 }
0x17ad   :  { %v1349_v4 = vpop.f32.mrf.mxu1 }
0x17ae   :  { %v1359_v5 = vadd.f32 %v1355_v3, %v10015_v38  ;;  %v7644_v46 = vmul.f32 -1.442695, %v1358_v45 }
0x17af   :  { %v1350_v6 = vpop.f32.mrf.mxu1 }
0x17b0   :  { %9395 = vtanh.f32 %v1359_v5  ;;  %v7645_v0 = vmul.f32 -1.442695, %v1359_v5 }
0x17b1   :  { %9397 = vpow2.f32 %v7644_v46 }
0x17bd   :  { %v9396_v7 = vpop.eup %9395 }
0x17be   :  { %1378 = vrot.lane.b32.xlu0 %v9396_v7, %s9541_s28  ;;  %v9398_v47 = vpop.eup %9397 }
0x17bf   :  { %v1366_v48 = vadd.f32 1.0, %v9398_v47 }
0x17c1   :  { %9399 = vrcp.f32 %v1366_v48 }
0x17ce   :  { %v9400_v49 = vpop.eup %9399 }
0x17cf   :  { %v1376_v54 = vmul.f32 %v9400_v49, %v1374_v52 }
0x1830   :  { %v1379_v50 = vpop.permute.xlu0 %1378 }
0x1831   :  { %v1381_v34 = vmul.f32 %v9400_v49, %v1379_v50 }
0x1833   :  { %1383 = vrot.lane.b32.xlu1 %v1381_v34, %s9541_s28 }
0x18a5   :  { %v1384_v56 = vpop.permute.xlu1 %1383 }
0x18a6   :  { %v1386_v58 = vadd.f32 %v1384_v56, %v1376_v54 }
0x18a8   :  { %9401 = vtanh.f32 %v1386_v58  ;;  %v1462_v37 = vrot.slane %v1386_v58, 7 }
0x18a9   :  { %9403 = vpow2.f32 %v7645_v0 }
0x18b5   :  { %v9402_v60 = vpop.eup %9401 }
0x18b6   :  { %1389 = vrot.lane.b32.xlu0 %v9402_v60, %s9541_s28  ;;  %v9404_v11 = vpop.eup %9403 }
0x18b7   :  { %v1367_v12 = vadd.f32 1.0, %v9404_v11 }
0x18b9   :  { %9405 = vrcp.f32 %v1367_v12 }
0x18c6   :  { %v9406_v13 = vpop.eup %9405 }
0x1928   :  { %v1390_v14 = vpop.permute.xlu0 %1389 }
0x1929   :  { %v1392_v15 = vmul.f32 %v9406_v13, %v1390_v14 }
0x192b   :  { %v1393_v16 = vpack.c.bf16 %v1392_v15, %v1392_v15 }
0x192d   :  { %v1395_v17 = vrot.slane %v1393_v16, 1 }
0x192f   :  { %7646 = vmatmul.mubr.msk.bf16.vlgmr.msra.gmra.mxu0 %vm283_vm6, %v1395_v17 }
0x1930   :  { %1586 = vmatpush1.bf16.msra.mxu0 %v9921_v51  ;;  %1609 = vmatprep.mubr.bf16.mxu0 %v9540_v18 }
0x1931   :  { %1587 = vmatprep.subr.bf16.mxu0 %v9932_v53 }
0x1934   :  { %1588 = vmatpush1.bf16.msra.mxu0 %v9942_v55 }
0x1935   :  { %1589 = vmatprep.subr.bf16.mxu0 %v9951_v57 }
0x1938   :  { %1590 = vmatpush1.bf16.msra.mxu0 %v9960_v59 }
0x1939   :  { %1591 = vmatprep.subr.bf16.mxu0 %v9969_v61 }
0x193c   :  { %1592 = vmatpush1.bf16.msra.mxu0 %v9975_v62 }
0x193d   :  { %1763 = vmatprep.subr.bf16.mxu0 %v9916_v41 }
0x19ef   :  { %v1433_v19 = vpop.f32.mrf.mxu0 }
0x19f0   :  { %v1442_v28 = vrot.slane %v1433_v19, 5 }
0x19f1   :  { %v1435_v20 = vpop.f32.mrf.mxu0 }
0x19f2   :  { %v1443_v21 = vrot.slane %v1435_v20, 5  ;;  %v1446_v29 = vadd.f32 %v1442_v28, %v10020_v43 }
0x19f3   :  { %v1437_v22 = vpop.f32.mrf.mxu0 }
0x19f4   :  { %v1447_v23 = vadd.f32 %v1443_v21, %v10015_v38  ;;  %v7647_v30 = vmul.f32 -1.442695, %v1446_v29 }
0x19f5   :  { %v1438_v63 = vpop.f32.mrf.mxu0 }
0x19f6   :  { %9407 = vtanh.f32 %v1447_v23  ;;  %v7648_v1 = vmul.f32 -1.442695, %v1447_v23 }
0x19f7   :  { %9409 = vpow2.f32 %v7647_v30 }
0x1a03   :  { %v9408_v24 = vpop.eup %9407 }
0x1a04   :  { %1466 = vrot.lane.b32.xlu1 %v9408_v24, %s9541_s28  ;;  %v9410_v31 = vpop.eup %9409 }
0x1a05   :  { %v1454_v32 = vadd.f32 1.0, %v9410_v31 }
0x1a07   :  { %9411 = vrcp.f32 %v1454_v32 }
0x1a14   :  { %v9412_v41 = vpop.eup %9411 }
0x1a15   :  { %v1464_v39 = vmul.f32 %v9412_v41, %v1462_v37 }
0x1a76   :  { %v1467_v33 = vpop.permute.xlu1 %1466 }
0x1a77   :  { %v1469_v36 = vmul.f32 %v9412_v41, %v1467_v33 }
0x1a79   :  { %1471 = vrot.lane.b32.xlu0 %v1469_v36, %s9541_s28 }
0x1aeb   :  { %v1472_v10 = vpop.permute.xlu0 %1471 }
0x1aec   :  { %v1474_v40 = vadd.f32 %v1472_v10, %v1464_v39 }
0x1aee   :  { %9413 = vtanh.f32 %v1474_v40  ;;  %v1552_v14 = vrot.slane %v1474_v40, 7 }
0x1aef   :  { %9415 = vpow2.f32 %v7648_v1 }
0x1afb   :  { %v9414_v42 = vpop.eup %9413 }
0x1afc   :  { %1477 = vrot.lane.b32.xlu1 %v9414_v42, %s9541_s28  ;;  %v9416_v44 = vpop.eup %9415 }
0x1afd   :  { %v1455_v3 = vadd.f32 1.0, %v9416_v44 }
0x1aff   :  { %9417 = vrcp.f32 %v1455_v3 }
0x1b0c   :  { %v9418_v4 = vpop.eup %9417 }
0x1b6e   :  { %v1478_v5 = vpop.permute.xlu1 %1477 }
0x1b6f   :  { %v1480_v6 = vmul.f32 %v9418_v4, %v1478_v5 }
0x1b71   :  { %v1481_v7 = vpack.c.bf16 %v1480_v6, %v1480_v6 }
0x1b73   :  { %v1483_v8 = vshrl.u32 %v1481_v7, 16 }
0x1b75   :  { %v1485_v45 = vrot.slane %v1483_v8, 1 }
0x1b77   :  { %7649 = vmatmul.mubr.msk.bf16.vlgmr.msra.gmra.mxu1 %vm283_vm6, %v1485_v45 }
0x1b78   :  { %1676 = vmatpush1.bf16.msra.mxu1 %v9921_v51  ;;  %1699 = vmatprep.mubr.bf16.mxu1 %v9540_v18 }
0x1b79   :  { %1677 = vmatprep.subr.bf16.mxu1 %v9932_v53 }
0x1b7c   :  { %1678 = vmatpush1.bf16.msra.mxu1 %v9942_v55 }
0x1b7d   :  { %1679 = vmatprep.subr.bf16.mxu1 %v9951_v57 }
0x1b80   :  { %1680 = vmatpush1.bf16.msra.mxu1 %v9960_v59 }
0x1b81   :  { %1681 = vmatprep.subr.bf16.mxu1 %v9969_v61 }
0x1b84   :  { %1682 = vmatpush1.bf16.msra.mxu1 %v9975_v62 }
0x1b85   :  { %8776 = vmatprep.subr.bf16.mxu1 %v9537_v2 }
0x1c37   :  { %v1523_v46 = vpop.f32.mrf.mxu1 }
0x1c38   :  { %v1532_v54 = vrot.slane %v1523_v46, 4 }
0x1c39   :  { %v1525_v47 = vpop.f32.mrf.mxu1 }
0x1c3a   :  { %v1533_v48 = vrot.slane %v1525_v47, 4  ;;  %v1536_v56 = vadd.f32 %v1532_v54, %v10020_v43 }
0x1c3b   :  { %v1527_v49 = vpop.f32.mrf.mxu1 }
0x1c3c   :  { %v1537_v50 = vadd.f32 %v1533_v48, %v10015_v38  ;;  %v7650_v58 = vmul.f32 -1.442695, %v1536_v56 }
0x1c3d   :  { %v1528_v34 = vpop.f32.mrf.mxu1 }
0x1c3e   :  { %9419 = vtanh.f32 %v1537_v50  ;;  %v7651_v20 = vmul.f32 -1.442695, %v1537_v50 }
0x1c3f   :  { %9421 = vpow2.f32 %v7650_v58 }
0x1c4b   :  { %v9420_v52 = vpop.eup %9419 }
0x1c4c   :  { %1556 = vrot.lane.b32.xlu0 %v9420_v52, %s9541_s28  ;;  %v9422_v60 = vpop.eup %9421 }
0x1c4d   :  { %v1544_v0 = vadd.f32 1.0, %v9422_v60 }
0x1c4f   :  { %9423 = vrcp.f32 %v1544_v0 }
0x1c5c   :  { %v9424_v11 = vpop.eup %9423 }
0x1c5d   :  { %v1554_v15 = vmul.f32 %v9424_v11, %v1552_v14 }
0x1cbe   :  { %v1557_v12 = vpop.permute.xlu0 %1556 }
0x1cbf   :  { %v1559_v13 = vmul.f32 %v9424_v11, %v1557_v12 }
0x1cc1   :  { %1561 = vrot.lane.b32.xlu1 %v1559_v13, %s9541_s28 }
0x1d33   :  { %v1562_v16 = vpop.permute.xlu1 %1561 }
0x1d34   :  { %v1564_v17 = vadd.f32 %v1562_v16, %v1554_v15 }
0x1d36   :  { %9425 = vtanh.f32 %v1564_v17  ;;  %v1640_v10 = vrot.slane %v1564_v17, 7 }
0x1d37   :  { %9427 = vpow2.f32 %v7651_v20 }
0x1d43   :  { %v9426_v19 = vpop.eup %9425 }
0x1d44   :  { %1567 = vrot.lane.b32.xlu0 %v9426_v19, %s9541_s28  ;;  %v9428_v21 = vpop.eup %9427 }
0x1d45   :  { %v1545_v22 = vadd.f32 1.0, %v9428_v21 }
0x1d47   :  { %9429 = vrcp.f32 %v1545_v22 }
0x1d54   :  { %v9430_v23 = vpop.eup %9429 }
0x1db6   :  { %v1568_v63 = vpop.permute.xlu0 %1567 }
0x1db7   :  { %v1570_v24 = vmul.f32 %v9430_v23, %v1568_v63 }
0x1db9   :  { %v1571_v28 = vpack.c.bf16 %v1570_v24, %v1570_v24 }
0x1dbb   :  { %v1573_v29 = vrot.slane %v1571_v28, 2 }
0x1dbd   :  { %7652 = vmatmul.mubr.msk.bf16.vlgmr.msra.gmra.mxu0 %vm283_vm6, %v1573_v29 }
0x1dbe   :  { %1764 = vmatpush1.bf16.msra.mxu0 %v9921_v51  ;;  %1787 = vmatprep.mubr.bf16.mxu0 %v9540_v18 }
0x1dbf   :  { %1765 = vmatprep.subr.bf16.mxu0 %v9932_v53 }
0x1dc2   :  { %1766 = vmatpush1.bf16.msra.mxu0 %v9942_v55 }
0x1dc3   :  { %1767 = vmatprep.subr.bf16.mxu0 %v9951_v57 }
0x1dc6   :  { %1768 = vmatpush1.bf16.msra.mxu0 %v9960_v59 }
0x1dc7   :  { %1769 = vmatprep.subr.bf16.mxu0 %v9969_v61 }
0x1dca   :  { %1770 = vmatpush1.bf16.msra.mxu0 %v9975_v62 }
0x1dcb   :  { %8788 = vmatprep.subr.bf16.mxu0 %v9537_v2 }
0x1e7d   :  { %v1611_v30 = vpop.f32.mrf.mxu0 }
0x1e7e   :  { %v1620_v55 = vrot.slane %v1611_v30, 3 }
0x1e7f   :  { %v1613_v31 = vpop.f32.mrf.mxu0 }
0x1e80   :  { %v1621_v32 = vrot.slane %v1613_v31, 3  ;;  %v1624_v57 = vadd.f32 %v1620_v55, %v10020_v43 }
0x1e81   :  { %v1615_v51 = vpop.f32.mrf.mxu0 }
0x1e82   :  { %v1625_v41 = vadd.f32 %v1621_v32, %v10015_v38  ;;  %v7653_v59 = vmul.f32 -1.442695, %v1624_v57 }
0x1e83   :  { %v1616_v33 = vpop.f32.mrf.mxu0 }
0x1e84   :  { %9431 = vtanh.f32 %v1625_v41  ;;  %v7654_v3 = vmul.f32 -1.442695, %v1625_v41 }
0x1e85   :  { %9433 = vpow2.f32 %v7653_v59 }
0x1e91   :  { %v9432_v53 = vpop.eup %9431 }
0x1e92   :  { %1644 = vrot.lane.b32.xlu1 %v9432_v53, %s9541_s28  ;;  %v9434_v61 = vpop.eup %9433 }
0x1e93   :  { %v1632_v62 = vadd.f32 1.0, %v9434_v61 }
0x1e95   :  { %9435 = vrcp.f32 %v1632_v62 }
0x1ea2   :  { %v9436_v36 = vpop.eup %9435 }
0x1ea3   :  { %v1642_v40 = vmul.f32 %v9436_v36, %v1640_v10 }
0x1f04   :  { %v1645_v37 = vpop.permute.xlu1 %1644 }
0x1f05   :  { %v1647_v39 = vmul.f32 %v9436_v36, %v1645_v37 }
0x1f07   :  { %1649 = vrot.lane.b32.xlu0 %v1647_v39, %s9541_s28 }
0x1f79   :  { %v1650_v42 = vpop.permute.xlu0 %1649 }
0x1f7a   :  { %v1652_v1 = vadd.f32 %v1650_v42, %v1642_v40  ;;  %v9010_v42 = vld [vmem:[%s11704_s11 + $0x10] sm:$0xff]  }
0x1f7c   :  { %9437 = vtanh.f32 %v1652_v1  ;;  %v1730_v16 = vrot.slane %v1652_v1, 7 }
0x1f7d   :  { %9439 = vpow2.f32 %v7654_v3 }
0x1f89   :  { %v9438_v44 = vpop.eup %9437 }
0x1f8a   :  { %1655 = vrot.lane.b32.xlu1 %v9438_v44, %s9541_s28  ;;  %v9440_v4 = vpop.eup %9439 }
0x1f8b   :  { %v1633_v5 = vadd.f32 1.0, %v9440_v4  ;;  %v9011_v4 = vld [vmem:[%s11704_s11 + $0x8] sm:$0xff]  }
0x1f8d   :  { %9441 = vrcp.f32 %v1633_v5  ;;  %v9012_v5 = vld [vmem:[%s11704_s11] sm:$0xff]  }
0x1f9a   :  { %v9442_v6 = vpop.eup %9441 }
0x1ffc   :  { %v1656_v7 = vpop.permute.xlu1 %1655 }
0x1ffd   :  { %v1658_v8 = vmul.f32 %v9442_v6, %v1656_v7  ;;  %v142_v6 = vld [vmem:[#allocation2] sm:$0x1] }
0x1fff   :  { %v1659_v45 = vpack.c.bf16 %v1658_v8, %v1658_v8 }
0x2001   :  { %v1661_v46 = vshrl.u32 %v1659_v45, 16 }
0x2003   :  { %v1663_v47 = vrot.slane %v1661_v46, 2 }
0x2005   :  { %7655 = vmatmul.mubr.msk.bf16.vlgmr.msra.gmra.mxu1 %vm283_vm6, %v1663_v47 }
0x2006   :  { %8784 = vmatprep.mubr.msk.bf16.mxu1 %vm9538_vm2, %v9537_v2 }
0x20c5   :  { %v1701_v48 = vpop.f32.mrf.mxu1 }
0x20c6   :  { %v1710_v58 = vrot.slane %v1701_v48, 2 }
0x20c7   :  { %v1703_v49 = vpop.f32.mrf.mxu1 }
0x20c8   :  { %v1711_v50 = vrot.slane %v1703_v49, 2  ;;  %v1714_v60 = vadd.f32 %v1710_v58, %v10020_v43  ;;  %v1846_v58 = vld [vmem:[%s11659_s12] sm:$0x1] }
0x20c9   :  { %v1705_v34 = vpop.f32.mrf.mxu1 }
0x20ca   :  { %v1715_v52 = vadd.f32 %v1711_v50, %v10015_v38  ;;  %v7656_v0 = vmul.f32 -1.442695, %v1714_v60  ;;  %v93_v60 = vld [vmem:[%s11705_s2] sm:$0x1]  ;;  %s11679_s2 = smov 40  }
0x20cb   :  { %v1706_v54 = vpop.f32.mrf.mxu1 }
0x20cc   :  { %9443 = vtanh.f32 %v1715_v52  ;;  %v7657_v22 = vmul.f32 -1.442695, %v1715_v52  ;;  %v9013_v54 = vld [vmem:[%s11660_s13 + $0x8] sm:$0xff]  }
0x20cd   :  { %9445 = vpow2.f32 %v7656_v0 }
0x20d9   :  { %v9444_v56 = vpop.eup %9443 }
0x20da   :  { %1734 = vrot.lane.b32.xlu0 %v9444_v56, %s9541_s28  ;;  %v9446_v11 = vpop.eup %9445  ;;  %v9014_v56 = vld [vmem:[%s11660_s13] sm:$0xff]  }
0x20db   :  { %v1722_v12 = vadd.f32 1.0, %v9446_v11 }
0x20dd   :  { %9447 = vrcp.f32 %v1722_v12 }
0x20ea   :  { %v9448_v13 = vpop.eup %9447 }
0x20eb   :  { %v1732_v17 = vmul.f32 %v9448_v13, %v1730_v16 }
0x214c   :  { %v1735_v14 = vpop.permute.xlu0 %1734 }
0x214d   :  { %v1737_v15 = vmul.f32 %v9448_v13, %v1735_v14  ;;  %v137_v13 = vadd.f32 %v9748_v26, %v93_v60  ;;  %v2083_v60 = vsel %vm193_vm4, 4294967295, %v9539_v9 }
0x214f   :  { %1739 = vrot.lane.b32.xlu1 %v1737_v15, %s9541_s28 }
0x21c1   :  { %v1740_v19 = vpop.permute.xlu1 %1739 }
0x21c2   :  { %v1742_v20 = vadd.f32 %v1740_v19, %v1732_v17 }
0x21c4   :  { %9449 = vtanh.f32 %v1742_v20 }
0x21c5   :  { %9451 = vpow2.f32 %v7657_v22 }
0x21d1   :  { %v9450_v21 = vpop.eup %9449 }
0x21d2   :  { %1745 = vrot.lane.b32.xlu0 %v9450_v21, %s9541_s28  ;;  %v9452_v23 = vpop.eup %9451 }
0x21d3   :  { %v1723_v63 = vadd.f32 1.0, %v9452_v23  ;;  %v143_v23 = vld [vmem:[%s11706_s4] sm:$0x1] }
0x21d5   :  { %9453 = vrcp.f32 %v1723_v63  ;;  %v154_v63 = vld [vmem:[%s11707_s9] sm:$0x1]  ;;  %s11682_s9 = smov 48  }
0x21e2   :  { %v9454_v24 = vpop.eup %9453 }
0x2244   :  { %v1746_v28 = vpop.permute.xlu0 %1745 }
0x2245   :  { %v1748_v29 = vmul.f32 %v9454_v24, %v1746_v28 }
0x2247   :  { %v1749_v30 = vpack.c.bf16 %v1748_v29, %v1748_v29 }
0x2249   :  { %v1751_v31 = vrot.slane %v1749_v30, 3 }
0x224b   :  { %7658 = vmatmul.mubr.msk.bf16.vlgmr.msra.gmra.mxu0 %vm283_vm6, %v1751_v31 }
0x224c   :  { %8792 = vmatprep.mubr.msk.bf16.mxu0 %vm9538_vm2, %v9537_v2  ;;  %8789 = vmatpush3.bf16.msra.mxu0 %v9013_v54 }
0x224d   :  { %8790 = vmatprep.subr.bf16.mxu0 %v9537_v2 }
0x2250   :  { %8791 = vmatpush3.bf16.msra.mxu0 %v9014_v56 }
0x2251   :  { %8802 = vmatprep.subr.bf16.mxu0 %v9537_v2 }
0x230b   :  { %v1789_v32 = vpop.f32.mrf.mxu0 }
0x230c   :  { %v1798_v59 = vrot.slane %v1789_v32, 1 }
0x230d   :  { %v1791_v51 = vpop.f32.mrf.mxu0 }
0x230e   :  { %v1799_v41 = vrot.slane %v1791_v51, 1  ;;  %v1802_v61 = vadd.f32 %v1798_v59, %v10020_v43  ;;  %v1818_v43 = vrot.slane %v1742_v20, 7 }
0x230f   :  { %v1793_v33 = vpop.f32.mrf.mxu0 }
0x2310   :  { %v1803_v53 = vadd.f32 %v1799_v41, %v10015_v38  ;;  %v7659_v62 = vmul.f32 -1.442695, %v1802_v61  ;;  %v9009_v38 = vld [vmem:[%s11704_s11 + $0x18] sm:$0xff]   ;;  %v7666_v33 = vld [vmem:[%s11661_s14] ss:$0 sm:$0xff]  ;;  %s11683_s11 = smov 80  }
0x2311   :  { %v1794_v55 = vpop.f32.mrf.mxu0  ;;  %8777 = vmatpush3.bf16.msra.mxu1 %v9009_v38 }
0x2312   :  { %9455 = vtanh.f32 %v1803_v53  ;;  %8778 = vmatprep.subr.bf16.mxu1 %v9537_v2  ;;  %v7660_v8 = vmul.f32 -1.442695, %v1803_v53 }
0x2313   :  { %9457 = vpow2.f32 %v7659_v62 }
0x2315   :  { %8779 = vmatpush3.bf16.msra.mxu1 %v9010_v42 }
0x2316   :  { %8780 = vmatprep.subr.bf16.mxu1 %v9537_v2 }
0x2319   :  { %8781 = vmatpush3.bf16.msra.mxu1 %v9011_v4 }
0x231a   :  { %8782 = vmatprep.subr.bf16.mxu1 %v9537_v2 }
0x231d   :  { %8783 = vmatpush3.bf16.msra.mxu1 %v9012_v5 }
0x231e   :  { %8796 = vmatprep.subr.bf16.mxu1 %v9537_v2 }
0x231f   :  { %v9456_v57 = vpop.eup %9455 }
0x2320   :  { %1822 = vrot.lane.b32.xlu1 %v9456_v57, %s9541_s28  ;;  %v9458_v36 = vpop.eup %9457 }
0x2321   :  { %v1810_v37 = vadd.f32 1.0, %v9458_v36 }
0x2323   :  { %9459 = vrcp.f32 %v1810_v37 }
0x2330   :  { %v9460_v39 = vpop.eup %9459 }
0x2331   :  { %v1820_v1 = vmul.f32 %v9460_v39, %v1818_v43 }
0x2392   :  { %v1823_v10 = vpop.permute.xlu1 %1822 }
0x2393   :  { %v1825_v40 = vmul.f32 %v9460_v39, %v1823_v10 }
0x2395   :  { %1827 = vrot.lane.b32.xlu0 %v1825_v40, %s9541_s28 }
0x2399   :  { %146 = vperm.xlu0 %8972, %v142_v6  }
0x2407   :  { %v1828_v44 = vpop.permute.xlu0 %1827 }
0x2408   :  { %v1830_v3 = vadd.f32 %v1828_v44, %v1820_v1 }
0x240a   :  { %9461 = vtanh.f32 %v1830_v3 }
0x240b   :  { %9463 = vpow2.f32 %v7660_v8 }
0x2414   :  { %v147_v21 = vpop.permute.xlu0 %146 }
0x2415   :  { %v152_v22 = vrot.slane %v147_v21, %v9751_v27 }
0x2417   :  { %v9462_v7 = vpop.eup %9461  ;;  %v153_v26 = vmul.f32 %v152_v22, %v143_v23  ;;  %v2010_v23 = vld [vmem:[%s11662_s15] sm:$0xf] }
0x2418   :  { %1833 = vrot.lane.b32.xlu1 %v9462_v7, %s9541_s28  ;;  %v9464_v45 = vpop.eup %9463 }
0x2419   :  { %v1811_v46 = vadd.f32 1.0, %v9464_v45  ;;  %v155_v24 = vadd.f32 %v154_v63, %v153_v26  ;;  %v2291_v26 = vsel %vm991_vm7, %v2010_v23, 0  ;;  %v2011_v63 = vld [vmem:[%s11662_s15 + $0x4] sm:$0xf] }
0x241b   :  { %9465 = vrcp.f32 %v1811_v46  ;;  %v1929_v28 = vrot.slane %v155_v24, %v9751_v27  ;;  %v2245_v24 = vsel %vm991_vm7, %v2011_v63, 0 }
0x2428   :  { %v9466_v47 = vpop.eup %9465 }
0x248a   :  { %v1834_v48 = vpop.permute.xlu1 %1833 }
0x248b   :  { %v1836_v49 = vmul.f32 %v9466_v47, %v1834_v48 }
0x248d   :  { %v1845_v50 = vpack.c.bf16 %v1836_v49, %v1836_v49 }
0x248f   :  { %v1848_v34 = vshrl.u32 %v1845_v50, 16 }
0x2491   :  { %v1850_v52 = vrot.slane %v1848_v34, 3 }
0x2493   :  { %8785 = vmatmul.mubr.msk.bf16.vlgmr.msra.gmra.mxu1 %vm283_vm6, %v1850_v52 }
0x2494   :  { %8798 = vmatprep.mubr.msk.bf16.mxu1 %vm9538_vm2, %v9537_v2 }
0x2553   :  { %v1912_v0 = vpop.f32.mrf.mxu1 }
0x2554   :  { %v1913_v11 = vadd.f32 %v1912_v0, %v1846_v58 }
0x2555   :  { %v8786_v12 = vpop.f32.mrf.mxu1 }
0x2556   :  { %v1919_v14 = vrot.slane %v1913_v11, 7  ;;  %v1921_v15 = vrot.slane %v1913_v11, 6  ;;  %v1931_v20 = vrot.slane %v1913_v11, 4  ;;  %v10210_v11 = vsel %vm98_vm0, %v2083_v60, 0 }
0x2557   :  { %v1915_v16 = vpop.f32.mrf.mxu1 }
0x2558   :  { %1922 = vrot.lane.b32.xlu1 %v1921_v15, %s9542_s3  ;;  %v1935_v17 = vsel %vm192_vm3, %v137_v13, %v1919_v14 }
0x2559   :  { %v8787_v19 = vpop.f32.mrf.mxu1 }
0x255c   :  { %1932 = vrot.lane.b32.xlu1 %v1931_v20, %s9541_s28 }
0x25ca   :  { %v1923_v29 = vpop.permute.xlu1 %1922 }
0x25cb   :  { %v1936_v30 = vsel %vm193_vm4, %v1935_v17, %v1923_v29 }
0x25cc   :  { %v1937_v32 = vsel %vm98_vm0, %v1936_v30, %v1929_v28  ;;  %vm7562_vm0 = vcmask 40960  }
0x25ce   :  { %v1933_v31 = vpop.permute.xlu1 %1932 }
0x25cf   :  { %v10164_v51 = vsel %vm991_vm7, %v1937_v32, %v1933_v31 }
0x25d0   :  { %v1943_v41 = vpack.c.bf16 %v10164_v51, %v10164_v51 }
0x25d2   :  { %8793 = vmatmul.mubr.msk.bf16.vlgmr.msra.gmra.mxu0 %vm1963_vm11, %v1943_v41 }
0x25d3   :  { %8804 = vmatprep.mubr.msk.bf16.mxu0 %vm9538_vm2, %v9537_v2 }
0x2692   :  { %v2001_v53 = vpop.f32.mrf.mxu0 }
0x2693   :  { %v2002_v55 = vadd.f32 %v7666_v33, %v2001_v53 }
0x2694   :  { %v8794_v57 = vpop.f32.mrf.mxu0 }
0x2695   :  { %v2007_v59 = vmul.f32 0.35355338, %v2002_v55  ;;  %v10174_v61 = vpack.c.bf16 %v2002_v55, %v2002_v55 }
0x2696   :  { %v2004_v62 = vpop.f32.mrf.mxu0 }
0x2697   :  { %2132 = vrot.lane.b32.xlu1 %v10174_v61, %s9543_s30  ;;  %2015 = vrot.lane.b32.xlu0 %v10174_v61, %s9542_s3  ;;  %v10180_v37 = vpack.c.bf16 %v2007_v59, %v2007_v59 }
0x2698   :  { %v8795_v36 = vpop.f32.mrf.mxu0 }
0x269b   :  { %2130 = vrot.lane.b32.xlu0 %v10180_v37, %s9544_s29 }
0x2709   :  { %v2016_v39 = vpop.permute.xlu0 %2015  ;;  %v2133_v40 = vpop.permute.xlu1 %2132 }
0x270a   :  { %v2022_v10 = vsel %vm2017_vm12, %v2016_v39, 0  ;;  %v2138_v38 = vsel %vm2017_vm12, %v2133_v40, 0 }
0x270b   :  { %8797 = vmatpush3.bf16.xpose.msra.mxu1 %v2022_v10 }
0x270c   :  { %8808 = vmatprep.subr.bf16.mxu1 %v9537_v2 }
0x270d   :  { %v2131_v42 = vpop.permute.xlu0 %2130 }
0x2712   :  { %8799 = vmatmul.mubr.msk.bf16.vlgmr.msra.gmra.mxu1 %vm2017_vm12, %v10180_v37 }
0x2713   :  { %8809 = vmatpush3.bf16.xpose.msra.mxu1 %v2138_v38  ;;  %8810 = vmatprep.mubr.msk.bf16.mxu1 %vm9538_vm2, %v9537_v2 }
0x2714   :  { %8820 = vmatprep.subr.bf16.mxu1 %v9537_v2 }
0x271a   :  { %8811 = vmatmul.mubr.msk.bf16.vlgmr.msra.gmra.mxu1 %vm2017_vm12, %v2131_v42 }
0x271b   :  { %8822 = vmatprep.mubr.msk.bf16.mxu1 %vm9538_vm2, %v9537_v2  ;;  %8821 = vmatpush3.bf16.msra.mxu1 %v2245_v24 }
0x271c   :  { %8832 = vmatprep.subr.bf16.mxu1 %v9537_v2 }
0x27d2   :  { %v2058_v43 = vpop.f32.mrf.mxu1 }
0x27d3   :  { %v2065_v1 = vsel %vm2064_vm13, %v2058_v43, -inf }
0x27d4   :  { %2066 = vmax.xlane.f32.xlu1 %v2065_v1  ;;  %v8800_v44 = vpop.f32.mrf.mxu1 }
0x27d6   :  { %v2061_v3 = vpop.f32.mrf.mxu1 }
0x27d8   :  { %v8801_v4 = vpop.f32.mrf.mxu1 }
0x27da   :  { %v2174_v5 = vpop.f32.mrf.mxu1 }
0x27db   :  { %v2180_v6 = vsel %vm2064_vm13, %v2174_v5, -inf }
0x27dc   :  { %2181 = vmax.xlane.f32.xlu0 %v2180_v6  ;;  %v8812_v7 = vpop.f32.mrf.mxu1 }
0x27de   :  { %v2177_v8 = vpop.f32.mrf.mxu1 }
0x27e0   :  { %v8813_v45 = vpop.f32.mrf.mxu1 }
0x285d   :  { %v2067_v46 = vpop.xlane.xlu1 %2066 }
0x285e   :  { %v2068_v47 = vsub.f32 %v2058_v43, %v2067_v46 }
0x2860   :  { %v2069_v48 = vmul.f32 1.442695, %v2068_v47 }
0x2862   :  { %9467 = vpow2.f32 %v2069_v48 }
0x2865   :  { %v2182_v49 = vpop.xlane.xlu0 %2181 }
0x2866   :  { %v2183_v50 = vsub.f32 %v2174_v5, %v2182_v49 }
0x2868   :  { %v2184_v34 = vmul.f32 1.442695, %v2183_v50 }
0x286a   :  { %9469 = vpow2.f32 %v2184_v34 }
0x286f   :  { %v9468_v52 = vpop.eup %9467 }
0x2870   :  { %v2071_v54 = vsel %vm2064_vm13, %v9468_v52, 0.0 }
0x2871   :  { %2072 = vadd.xlane.f32.xlu0 %v2071_v54 }
0x2877   :  { %v9470_v56 = vpop.eup %9469 }
0x2878   :  { %v2186_v58 = vsel %vm2064_vm13, %v9470_v56, 0.0 }
0x2879   :  { %2187 = vadd.xlane.f32.xlu1 %v2186_v58 }
0x2887   :  { %2077 = vrot.lane.b32.xlu0 %v10174_v61, %s9541_s28 }
0x288a   :  { %2192 = vrot.lane.b32.xlu1 %v10174_v61, %s9545_s5 }
0x288b   :  { %2333 = vrot.lane.b32.xlu0 %v10180_v37, %s9546_s1 }
0x288e   :  { %2335 = vrot.lane.b32.xlu1 %v10174_v61, %s11683_s11 }
0x28fa   :  { %v2073_v0 = vpop.xlane.xlu0 %2072 }
0x28fb   :  { %9471 = vrcp.f32 %v2073_v0 }
0x28fe   :  { %v2078_v12 = vpop.permute.xlu0 %2077 }
0x28ff   :  { %v2086_v13 = vand.u32 %v10210_v11, %v2078_v12  ;;  %v2012_v12 = vld [vmem:[%s11662_s15 + $0x8] sm:$0xf] }
0x2901   :  { %8803 = vmatpush3.bf16.msra.mxu0 %v2086_v13  ;;  %v2448_v13 = vsel %vm991_vm7, %v2012_v12, 0  ;;  %v2699_v12 = vld [vmem:[%s11666_s19 + $0x48] sm:$0xff] }
0x2902   :  { %v2188_v14 = vpop.xlane.xlu1 %2187  ;;  %8814 = vmatprep.subr.bf16.mxu0 %v9537_v2  ;;  %v2334_v36 = vpop.permute.xlu0 %2333 }
0x2903   :  { %9473 = vrcp.f32 %v2188_v14 }
0x2906   :  { %v2193_v16 = vpop.permute.xlu1 %2192 }
0x2907   :  { %v2198_v9 = vand.u32 %v2193_v16, %v10210_v11 }
0x2908   :  { %v9472_v15 = vpop.eup %9471 }
0x2909   :  { %v2075_v17 = vmul.f32 %v9472_v15, %v9468_v52 }
0x290a   :  { %v2336_v41 = vpop.permute.xlu1 %2335 }
0x290b   :  { %v2076_v19 = vpack.c.bf16 %v2075_v17, %v2075_v17  ;;  %v2341_v57 = vsel %vm2017_vm12, %v2336_v41, 0  ;;  %v2013_v41 = vld [vmem:[%s11662_s15 + $0xc] sm:$0xf] }
0x290d   :  { %8805 = vmatmul.mubr.msk.bf16.vlgmr.msra.gmra.mxu0 %vm2079_vm14, %v2076_v19 }
0x290e   :  { %8815 = vmatpush3.bf16.msra.mxu0 %v2198_v9  ;;  %8816 = vmatprep.mubr.msk.bf16.mxu0 %vm9538_vm2, %v9537_v2 }
0x290f   :  { %8826 = vmatprep.subr.bf16.mxu0 %v9537_v2 }
0x2910   :  { %v9474_v20 = vpop.eup %9473 }
0x2911   :  { %v2190_v21 = vmul.f32 %v9474_v20, %v9470_v56 }
0x2913   :  { %v2191_v22 = vpack.c.bf16 %v2190_v21, %v2190_v21 }
0x2915   :  { %8817 = vmatmul.mubr.msk.bf16.vlgmr.msra.gmra.mxu0 %vm2079_vm14, %v2191_v22 }
0x2916   :  { %8828 = vmatprep.mubr.msk.bf16.mxu0 %vm9538_vm2, %v9537_v2  ;;  %8827 = vmatpush3.bf16.msra.mxu0 %v2291_v26 }
0x2917   :  { %8838 = vmatprep.subr.bf16.mxu0 %v9537_v2 }
0x29cd   :  { %v2122_v28 = vpop.f32.mrf.mxu0 }
0x29ce   :  { %v2128_v29 = vpack.c.bf16 %v2122_v28, %v2122_v28 }
0x29cf   :  { %v8806_v30 = vpop.f32.mrf.mxu0 }
0x29d0   :  { %8829 = vmatmul.mubr.msk.bf16.vlgmr.msra.gmra.mxu0 %vm2017_vm12, %v2128_v29 }
0x29d1   :  { %v2125_v31 = vpop.f32.mrf.mxu0  ;;  %8840 = vmatprep.mubr.msk.bf16.mxu0 %vm9538_vm2, %v9537_v2 }
0x29d3   :  { %v8807_v32 = vpop.f32.mrf.mxu0 }
0x29d5   :  { %v2234_v33 = vpop.f32.mrf.mxu0 }
0x29d6   :  { %v2240_v53 = vpack.c.bf16 %v2234_v33, %v2234_v33 }
0x29d7   :  { %v8818_v55 = vpop.f32.mrf.mxu0 }
0x29d8   :  { %8823 = vmatmul.mubr.msk.bf16.vlgmr.msra.gmra.mxu1 %vm2017_vm12, %v2240_v53 }
0x29d9   :  { %8833 = vmatpush3.bf16.xpose.msra.mxu1 %v2341_v57  ;;  %v2237_v59 = vpop.f32.mrf.mxu0  ;;  %8834 = vmatprep.mubr.msk.bf16.mxu1 %vm9538_vm2, %v9537_v2 }
0x29da   :  { %8844 = vmatprep.subr.bf16.mxu1 %v9537_v2 }
0x29db   :  { %v8819_v62 = vpop.f32.mrf.mxu0 }
0x29e0   :  { %8835 = vmatmul.mubr.msk.bf16.vlgmr.msra.gmra.mxu1 %vm2017_vm12, %v2334_v36 }
0x29e1   :  { %8846 = vmatprep.mubr.msk.bf16.mxu1 %vm9538_vm2, %v9537_v2  ;;  %8845 = vmatpush3.bf16.msra.mxu1 %v2448_v13 }
0x29e2   :  { %8856 = vmatprep.subr.bf16.mxu1 %v9537_v2 }
0x2a90   :  { %v2327_v39 = vpop.f32.mrf.mxu0 }
0x2a92   :  { %v8830_v10 = vpop.f32.mrf.mxu0 }
0x2a94   :  { %v2330_v40 = vpop.f32.mrf.mxu0 }
0x2a96   :  { %v8831_v38 = vpop.f32.mrf.mxu0 }
0x2a98   :  { %v2281_v42 = vpop.f32.mrf.mxu1 }
0x2a99   :  { %v10243_v43 = vadd.f32 %v2327_v39, %v2281_v42 }
0x2a9a   :  { %v8824_v1 = vpop.f32.mrf.mxu1 }
0x2a9c   :  { %v2284_v44 = vpop.f32.mrf.mxu1 }
0x2a9d   :  { %v7682_v44 = vld [vmem:[%s11663_s16] ss:$0 sm:$0xff] }
0x2a9e   :  { %v8825_v3 = vpop.f32.mrf.mxu1 }
0x2aa0   :  { %v2377_v4 = vpop.f32.mrf.mxu1 }
0x2aa1   :  { %v2383_v5 = vsel %vm2064_vm13, %v2377_v4, -inf }
0x2aa2   :  { %2384 = vmax.xlane.f32.xlu1 %v2383_v5  ;;  %v8836_v6 = vpop.f32.mrf.mxu1 }
0x2aa4   :  { %v2380_v7 = vpop.f32.mrf.mxu1 }
0x2aa6   :  { %v8837_v8 = vpop.f32.mrf.mxu1 }
0x2ab3   :  { %2493 = vrot.lane.b32.xlu1 %v10174_v61, %s11680_s8  ;;  %s11712_s8 = smov 40  }
0x2ab7   :  { %2491 = vrot.lane.b32.xlu1 %v10180_v37, %s11681_s6 }
0x2b2b   :  { %v2385_v45 = vpop.xlane.xlu1 %2384 }
0x2b2c   :  { %v2386_v46 = vsub.f32 %v2377_v4, %v2385_v45 }
0x2b2e   :  { %v2387_v47 = vmul.f32 1.442695, %v2386_v46 }
0x2b2f   :  { %v2494_v56 = vpop.permute.xlu1 %2493 }
0x2b30   :  { %9475 = vpow2.f32 %v2387_v47  ;;  %v2499_v60 = vsel %vm2017_vm12, %v2494_v56, 0  ;;  %v2690_v56 = vld [vmem:[%s11666_s19] sm:$0xff] }
0x2b33   :  { %v2492_v0 = vpop.permute.xlu1 %2491 }
0x2b3d   :  { %v9476_v48 = vpop.eup %9475 }
0x2b3e   :  { %v2389_v49 = vsel %vm2064_vm13, %v9476_v48, 0.0 }
0x2b3f   :  { %2390 = vadd.xlane.f32.xlu0 %v2389_v49  ;;  %v2714_v49 = vld [vmem:[%s11666_s19 + $0xc0] sm:$0xff] }
0x2b55   :  { %2395 = vrot.lane.b32.xlu0 %v10174_v61, %s11682_s9 }
0x2bc8   :  { %v2391_v50 = vpop.xlane.xlu0 %2390 }
0x2bc9   :  { %9477 = vrcp.f32 %v2391_v50 }
0x2bcc   :  { %v2396_v34 = vpop.permute.xlu0 %2395 }
0x2bcd   :  { %v2401_v52 = vand.u32 %v2396_v34, %v10210_v11  ;;  %v2715_v34 = vld [vmem:[%s11666_s19 + $0xc8] sm:$0xff] }
0x2bcf   :  { %8839 = vmatpush3.bf16.msra.mxu0 %v2401_v52 }
0x2bd0   :  { %8850 = vmatprep.subr.bf16.mxu0 %v9537_v2 }
0x2bd6   :  { %v9478_v37 = vpop.eup %9477 }
0x2bd7   :  { %v2393_v54 = vmul.f32 %v9478_v37, %v9476_v48  ;;  %v2706_v48 = vld [vmem:[%s11666_s19 + $0x80] sm:$0xff] }
0x2bd8   :  { %v7702_v50 = vcombine.high %v2706_v48, %v2714_v49  ;;  %v7701_v52 = vcombine.low %v2706_v48, %v2714_v49 }
0x2bd9   :  { %v2394_v58 = vpack.c.bf16 %v2393_v54, %v2393_v54 }
0x2bdb   :  { %8841 = vmatmul.mubr.msk.bf16.vlgmr.msra.gmra.mxu0 %vm2079_vm14, %v2394_v58  ;;  %v2698_v58 = vld [vmem:[%s11666_s19 + $0x40] sm:$0xff] }
0x2bdc   :  { %8851 = vmatpush3.bf16.xpose.msra.mxu0 %v2499_v60  ;;  %8852 = vmatprep.mubr.msk.bf16.mxu0 %vm9538_vm2, %v9537_v2  ;;  %v2691_v60 = vld [vmem:[%s11666_s19 + $0x8] sm:$0xff]  ;;  %v7685_v13 = vcombine.low %v2690_v56, %v2698_v58 }
0x2bdd   :  { %8862 = vmatprep.subr.bf16.mxu0 %v9537_v2 }
0x2be3   :  { %8853 = vmatmul.mubr.msk.bf16.vlgmr.msra.gmra.mxu0 %vm2017_vm12, %v2492_v0  ;;  %v7686_v0 = vcombine.high %v2690_v56, %v2698_v58 }
0x2be4   :  { %8864 = vmatprep.mubr.msk.bf16.mxu0 %vm9538_vm2, %v9537_v2 }
0x2c9b   :  { %v2437_v14 = vpop.f32.mrf.mxu0 }
0x2c9c   :  { %v2443_v15 = vpack.c.bf16 %v2437_v14, %v2437_v14  ;;  %v7687_v14 = vcombine.low %v2691_v60, %v2699_v12 }
0x2c9d   :  { %v8842_v16 = vpop.f32.mrf.mxu0 }
0x2c9e   :  { %8847 = vmatmul.mubr.msk.bf16.vlgmr.msra.gmra.mxu1 %vm2017_vm12, %v2443_v15  ;;  %v7688_v15 = vcombine.high %v2691_v60, %v2699_v12  ;;  %v2708_v16 = vld [vmem:[%s11666_s19 + $0x90] sm:$0xff] }
0x2c9f   :  { %v2440_v17 = vpop.f32.mrf.mxu0  ;;  %8858 = vmatprep.mubr.msk.bf16.mxu1 %vm9538_vm2, %v9537_v2  ;;  %v2704_v12 = vld [vmem:[%s11666_s19 + $0x70] sm:$0xff] }
0x2ca0   :  { %v2716_v17 = vld [vmem:[%s11666_s19 + $0xd0] sm:$0xff] }
0x2ca1   :  { %v8843_v19 = vpop.f32.mrf.mxu0 }
0x2ca2   :  { %v2709_v19 = vld [vmem:[%s11666_s19 + $0x98] sm:$0xff] }
0x2ca3   :  { %v2535_v9 = vpop.f32.mrf.mxu0 }
0x2ca4   :  { %v2541_v20 = vsel %vm2064_vm13, %v2535_v9, -inf }
0x2ca5   :  { %2542 = vmax.xlane.f32.xlu0 %v2541_v20  ;;  %v8854_v21 = vpop.f32.mrf.mxu0  ;;  %v2717_v20 = vld [vmem:[%s11666_s19 + $0xd8] sm:$0xff] }
0x2ca6   :  { %v7705_v21 = vcombine.low %v2708_v16, %v2716_v17 }
0x2ca7   :  { %v2538_v22 = vpop.f32.mrf.mxu0 }
0x2ca8   :  { %v7707_v22 = vcombine.low %v2709_v19, %v2717_v20 }
0x2ca9   :  { %v8855_v23 = vpop.f32.mrf.mxu0 }
0x2caa   :  { %v7708_v23 = vcombine.high %v2709_v19, %v2717_v20 }
0x2cbb   :  { %2553 = vrot.lane.b32.xlu0 %v10174_v61, %s11679_s2  ;;  %v2606_v61 = vsel %vm991_vm7, %v2013_v41, 0 }
0x2cbc   :  { %8863 = vmatpush3.bf16.msra.mxu0 %v2606_v61 }
0x2d2e   :  { %v2543_v26 = vpop.xlane.xlu0 %2542 }
0x2d2f   :  { %v2544_v63 = vsub.f32 %v2535_v9, %v2543_v26  ;;  %v7706_v9 = vcombine.high %v2708_v16, %v2716_v17 }
0x2d31   :  { %v2545_v24 = vmul.f32 1.442695, %v2544_v63 }
0x2d32   :  { %v2554_v28 = vpop.permute.xlu0 %2553 }
0x2d33   :  { %9479 = vpow2.f32 %v2545_v24  ;;  %v2559_v29 = vand.u32 %v2554_v28, %v10210_v11 }
0x2d35   :  { %8857 = vmatpush3.bf16.msra.mxu1 %v2559_v29 }
0x2d36   :  { %2982 = vmatprep.subr.bf16.mxu1 %v7702_v50  ;;  %v2712_v50 = vld [vmem:[%s11666_s19 + $0xb0] sm:$0xff] }
0x2d40   :  { %v9480_v30 = vpop.eup %9479 }
0x2d41   :  { %v2547_v31 = vsel %vm2064_vm13, %v9480_v30, 0.0 }
0x2d42   :  { %2548 = vadd.xlane.f32.xlu1 %v2547_v31 }
0x2d5e   :  { %v2484_v32 = vpop.f32.mrf.mxu1 }
0x2d5f   :  { %v2490_v33 = vadd.f32 %v2484_v32, %v10243_v43 }
0x2d60   :  { %v8848_v53 = vpop.f32.mrf.mxu1 }
0x2d61   :  { %v7684_v53 = vld [vmem:[%s11665_s18] ss:$0 sm:$0xff] }
0x2d62   :  { %v2487_v55 = vpop.f32.mrf.mxu1 }
0x2d64   :  { %v8849_v57 = vpop.f32.mrf.mxu1 }
0x2d65   :  { %v2692_v57 = vld [vmem:[%s11666_s19 + $0x10] sm:$0xff] }
0x2dcb   :  { %v2549_v59 = vpop.xlane.xlu1 %2548 }
0x2dcc   :  { %9481 = vrcp.f32 %v2549_v59  ;;  %v2700_v59 = vld [vmem:[%s11666_s19 + $0x50] sm:$0xff] }
0x2dd9   :  { %v9482_v62 = vpop.eup %9481 }
0x2dda   :  { %v2551_v36 = vmul.f32 %v9482_v62, %v9480_v30  ;;  %v2693_v62 = vld [vmem:[%s11666_s19 + $0x18] sm:$0xff] }
0x2ddc   :  { %v2552_v39 = vpack.c.bf16 %v2551_v36, %v2551_v36  ;;  %v2701_v36 = vld [vmem:[%s11666_s19 + $0x58] sm:$0xff] }
0x2dde   :  { %8859 = vmatmul.mubr.msk.bf16.vlgmr.msra.gmra.mxu1 %vm2079_vm14, %v2552_v39 }
0x2ddf   :  { %3002 = vmatprep.mubr.bf16.mxu1 %v9540_v18  ;;  %2983 = vmatpush1.bf16.msra.mxu1 %v7701_v52  ;;  %v2713_v52 = vld [vmem:[%s11666_s19 + $0xb8] sm:$0xff] }
0x2de0   :  { %2984 = vmatprep.subr.bf16.mxu1 %v7686_v0  ;;  %v2696_v0 = vld [vmem:[%s11666_s19 + $0x30] sm:$0xff] }
0x2de1   :  { %v7698_v17 = vcombine.high %v2696_v0, %v2704_v12 }
0x2de3   :  { %2985 = vmatpush1.bf16.msra.mxu1 %v7685_v13  ;;  %v2697_v13 = vld [vmem:[%s11666_s19 + $0x38] sm:$0xff] }
0x2de4   :  { %3064 = vmatprep.subr.bf16.mxu1 %v7706_v9  ;;  %v7697_v9 = vcombine.low %v2696_v0, %v2704_v12 }
0x2e9e   :  { %v2595_v10 = vpop.f32.mrf.mxu1 }
0x2e9f   :  { %v2601_v40 = vpack.c.bf16 %v2595_v10, %v2595_v10 }
0x2ea0   :  { %v8860_v38 = vpop.f32.mrf.mxu1 }
0x2ea1   :  { %8865 = vmatmul.mubr.msk.bf16.vlgmr.msra.gmra.mxu0 %vm2017_vm12, %v2601_v40  ;;  %v7690_v40 = vcombine.high %v2692_v57, %v2700_v59  ;;  %v7692_v38 = vcombine.high %v2693_v62, %v2701_v36 }
0x2ea2   :  { %v2598_v42 = vpop.f32.mrf.mxu1  ;;  %3043 = vmatprep.mubr.bf16.mxu0 %v9540_v18 }
0x2ea3   :  { %v2710_v42 = vld [vmem:[%s11666_s19 + $0xa0] sm:$0xff] }
0x2ea4   :  { %v8861_v43 = vpop.f32.mrf.mxu1 }
0x2ea5   :  { %v2718_v43 = vld [vmem:[%s11666_s19 + $0xe0] sm:$0xff] }
0x2f61   :  { %v2642_v1 = vpop.f32.mrf.mxu0 }
0x2f62   :  { %v2648_v3 = vadd.f32 %v2642_v1, %v2490_v33  ;;  %v7683_v33 = vld [vmem:[%s11664_s17] ss:$0 sm:$0xff]  ;;  %v2711_v1 = vld [vmem:[%s11666_s19 + $0xa8] sm:$0xff] }
0x2f63   :  { %v8866_v4 = vpop.f32.mrf.mxu0 }
0x2f64   :  { %v2656_v5 = vadd.f32 %v7682_v44, %v2648_v3  ;;  %v2719_v44 = vld [vmem:[%s11666_s19 + $0xe8] sm:$0xff]  ;;  %v7689_v3 = vcombine.low %v2692_v57, %v2700_v59  ;;  %v7691_v4 = vcombine.low %v2693_v62, %v2701_v36  ;;  %v9031_v57 = vld [vmem:[%s11668_s21 + $0x58] sm:$0xff]  }
0x2f65   :  { %v2645_v6 = vpop.f32.mrf.mxu0  ;;  %v7711_v48 = vcombine.low %v2711_v1, %v2719_v44  ;;  %v9032_v59 = vld [vmem:[%s11668_s21 + $0xd8] sm:$0xff]  }
0x2f66   :  { %v2657_v7 = vadd.f32 %v2656_v5, %v10164_v51  ;;  %v2707_v51 = vld [vmem:[%s11666_s19 + $0x88] sm:$0xff]  ;;  %v7710_v5 = vcombine.high %v2710_v42, %v2718_v43  ;;  %v7712_v6 = vcombine.high %v2711_v1, %v2719_v44  ;;  %v9033_v62 = vld [vmem:[%s11668_s21 + $0x18] sm:$0xff]  }
0x2f67   :  { %v8867_v8 = vpop.f32.mrf.mxu0  ;;  %v7703_v37 = vcombine.low %v2707_v51, %v2715_v34  ;;  %v7704_v54 = vcombine.high %v2707_v51, %v2715_v34  ;;  %v2720_v34 = vld [vmem:[%s11666_s19 + $0xf0] sm:$0xff]  ;;  %v9034_v36 = vld [vmem:[%s11668_s21 + $0x98] sm:$0xff]   ;;  %v9040_v1 = vld [vmem:[%s11668_s21 + $0xc8] sm:$0xff]  }
0x2f68   :  { %v2661_v45 = vsel %vm2660_vm15, %v2657_v7, 0.0  ;;  %v2664_v46 = vmul.f32 %v2657_v7, %v2657_v7  ;;  %v2702_v8 = vld [vmem:[%s11666_s19 + $0x60] sm:$0xff]  ;;  %v7714_v58 = vcombine.high %v2712_v50, %v2720_v34  ;;  %v9041_v44 = vld [vmem:[%s11668_s21 + $0x8] sm:$0xff]  }
0x2f69   :  { %2662 = vadd.xlane.f32.xlu1 %v2661_v45  ;;  %3023 = vmatprep.subr.bf16.mxu0 %v7704_v54  ;;  %v2695_v45 = vld [vmem:[%s11666_s19 + $0x28] sm:$0xff] }
0x2f6a   :  { %v2665_v47 = vsel %vm2660_vm15, %v2664_v46, 0.0  ;;  %3024 = vmatpush1.bf16.msra.mxu0 %v7703_v37  ;;  %v2703_v46 = vld [vmem:[%s11666_s19 + $0x68] sm:$0xff]  ;;  %v2721_v37 = vld [vmem:[%s11666_s19 + $0xf8] sm:$0xff] }
0x2f6b   :  { %3025 = vmatprep.subr.bf16.mxu0 %v7688_v15  ;;  %v7696_v51 = vcombine.high %v2695_v45, %v2703_v46  ;;  %v7695_v56 = vcombine.low %v2695_v45, %v2703_v46  ;;  %v7716_v60 = vcombine.high %v2713_v52, %v2721_v37  ;;  %v7713_v15 = vcombine.low %v2712_v50, %v2720_v34  ;;  %v9048_v45 = vld [vmem:[%s11668_s21 + $0x1f8] sm:$0xff]  }
0x2f6c   :  { %v7715_v16 = vcombine.low %v2713_v52, %v2721_v37  ;;  %v10524_v46 = vsub.s32 2, %v9746_v25 }
0x2f6d   :  { %2666 = vadd.xlane.f32.xlu1 %v2665_v47  ;;  %v7709_v47 = vcombine.low %v2710_v42, %v2718_v43  ;;  %v9038_v42 = vld [vmem:[%s11668_s21 + $0x90] sm:$0xff]   ;;  %v9039_v43 = vld [vmem:[%s11668_s21 + $0x48] sm:$0xff]  }
0x2f6e   :  { %3026 = vmatpush1.bf16.msra.mxu0 %v7687_v14  ;;  %v2705_v14 = vld [vmem:[%s11666_s19 + $0x78] sm:$0xff] }
0x2f6f   :  { %3105 = vmatprep.subr.bf16.mxu0 %v7708_v23  ;;  %v7700_v19 = vcombine.high %v2697_v13, %v2705_v14  ;;  %v7699_v20 = vcombine.low %v2697_v13, %v2705_v14  ;;  %v9017_v23 = vld [vmem:[%s11668_s21 + $0x38] sm:$0xff]   ;;  %v10543_v13 = vsub.s32 5, %v9746_v25  ;;  %v10546_v14 = vsub.s32 7, %v9746_v25 }
0x2ff2   :  { %v2663_v26 = vpop.xlane.xlu1 %2662 }
0x2ff3   :  { %v2668_v63 = vmul.f32 0.03125, %v2663_v26  ;;  %v9018_v26 = vld [vmem:[%s11668_s21 + $0xb8] sm:$0xff]  }
0x2ff5   :  { %v2670_v28 = vmul.f32 %v2668_v63, %v2668_v63  ;;  %v2672_v32 = vsub.f32 %v2657_v7, %v2668_v63  ;;  %v2694_v7 = vld [vmem:[%s11666_s19 + $0x20] sm:$0xff]  ;;  %v9019_v63 = vld [vmem:[%s11668_s21 + $0x70] sm:$0xff]  }
0x2ff6   :  { %v2667_v24 = vpop.xlane.xlu1 %2666  ;;  %v7694_v49 = vcombine.high %v2694_v7, %v2702_v8  ;;  %v7693_v54 = vcombine.low %v2694_v7, %v2702_v8  ;;  %v9046_v7 = vld [vmem:[%s11668_s21 + $0x80] sm:$0xff]   ;;  %v9047_v8 = vld [vmem:[%s11668_s21 + $0x178] sm:$0xff]  }
0x2ff7   :  { %v2669_v29 = vmul.f32 0.03125, %v2667_v24  ;;  %v9020_v24 = vld [vmem:[%s11668_s21 + $0xf0] sm:$0xff]  }
0x2ff9   :  { %v2671_v30 = vsub.f32 %v2669_v29, %v2670_v28  ;;  %v9021_v28 = vld [vmem:[%s11668_s21 + $0x30] sm:$0xff]  }
0x2ffa   :  { %v9022_v29 = vld [vmem:[%s11668_s21 + $0xb0] sm:$0xff]  }
0x2ffb   :  { %v2673_v31 = vadd.f32 1e-05, %v2671_v30  ;;  %v9023_v30 = vld [vmem:[%s11668_s21 + $0x68] sm:$0xff]  }
0x2ffd   :  { %9483 = vrsqrt.f32 %v2673_v31  ;;  %v9024_v31 = vld [vmem:[%s11668_s21 + $0xe8] sm:$0xff]  }
0x300a   :  { %v9484_v41 = vpop.eup %9483 }
0x300b   :  { %v2675_v61 = vmul.f32 %v9484_v41, %v2672_v32  ;;  %v9025_v32 = vld [vmem:[%s11668_s21 + $0x28] sm:$0xff]  }
0x300c   :  { %v9026_v41 = vld [vmem:[%s11668_s21 + $0xa8] sm:$0xff]  }
0x300d   :  { %v2682_v55 = vmul.f32 %v7683_v33, %v2675_v61  ;;  %v9027_v33 = vld [vmem:[%s11668_s21 + $0x60] sm:$0xff]  }
0x300e   :  { %v9028_v61 = vld [vmem:[%s11668_s21 + $0xe0] sm:$0xff]  }
0x300f   :  { %v10345_v39 = vadd.f32 %v7684_v53, %v2682_v55  ;;  %v9029_v53 = vld [vmem:[%s11668_s21 + $0x20] sm:$0xff]  }
0x3010   :  { %v9030_v55 = vld [vmem:[%s11668_s21 + $0xa0] sm:$0xff]  }
0x3011   :  { %v10349_v10 = vpack.c.bf16 %v10345_v39, %v10345_v39 }
0x3013   :  { %7717 = vmatmul.mubr.msk.bf16.vlgmr.msra.gmra.mxu1 %vm1963_vm11, %v10349_v10  ;;  %7718 = vmatmul.mubr.msk.bf16.vlgmr.msra.gmra.mxu0 %vm1963_vm11, %v10349_v10 }
0x3014   :  { %3065 = vmatpush1.bf16.msra.mxu1 %v7705_v21  ;;  %3106 = vmatpush1.bf16.msra.mxu0 %v7707_v22  ;;  %v9015_v21 = vld [vmem:[%s11668_s21 + $0x78] sm:$0xff]  }
0x3015   :  { %3066 = vmatprep.subr.bf16.mxu1 %v7690_v40  ;;  %3107 = vmatprep.subr.bf16.mxu0 %v7692_v38  ;;  %v9016_v22 = vld [vmem:[%s11668_s21 + $0xf8] sm:$0xff]   ;;  %v9036_v40 = vld [vmem:[%s11668_s21 + $0xd0] sm:$0xff]  }
0x3016   :  { %3084 = vmatprep.mubr.bf16.mxu1 %v9540_v18  ;;  %3125 = vmatprep.mubr.bf16.mxu0 %v9540_v18  ;;  %v9037_v38 = vld [vmem:[%s11668_s21 + $0x10] sm:$0xff]  }
0x3018   :  { %3067 = vmatpush1.bf16.msra.mxu1 %v7689_v3  ;;  %3108 = vmatpush1.bf16.msra.mxu0 %v7691_v4  ;;  %v9042_v3 = vld [vmem:[%s11668_s21 + $0x88] sm:$0xff]   ;;  %v9043_v4 = vld [vmem:[%s11668_s21 + $0x40] sm:$0xff]  }
0x3019   :  { %3146 = vmatprep.subr.bf16.mxu1 %v7710_v5  ;;  %3187 = vmatprep.subr.bf16.mxu0 %v7712_v6  ;;  %v9044_v5 = vld [vmem:[%s11668_s21 + $0xc0] sm:$0xff]  }
0x301a   :  { %v9045_v6 = vld [vmem:[%s11668_s21] sm:$0xff]  }
0x301b   :  { %7719 = vmatmul.mubr.msk.bf16.vlgmr.msra.gmra.mxu1 %vm1963_vm11, %v10349_v10  ;;  %7720 = vmatmul.mubr.msk.bf16.vlgmr.msra.gmra.mxu0 %vm1963_vm11, %v10349_v10 }
0x301c   :  { %3147 = vmatpush1.bf16.msra.mxu1 %v7709_v47  ;;  %3188 = vmatpush1.bf16.msra.mxu0 %v7711_v48  ;;  %v10529_v47 = vld [vmem:[%s11667_s20] sm:$0xff]  ;;  %v10532_v48 = vsub.s32 3, %v9746_v25 }
0x301d   :  { %3148 = vmatprep.subr.bf16.mxu1 %v7694_v49  ;;  %3189 = vmatprep.subr.bf16.mxu0 %v7696_v51  ;;  %v2730_v49 = vrot.slane %v10529_v47, %v9751_v27  ;;  %v2738_v51 = vrot.slane %v10529_v47, %v10524_v46  ;;  %v2734_v50 = vrot.slane %v10529_v47, %v9760_v35 }
0x301e   :  { %3166 = vmatprep.mubr.bf16.mxu1 %v9540_v18  ;;  %3207 = vmatprep.mubr.bf16.mxu0 %v9540_v18  ;;  %v2742_v34 = vrot.slane %v10529_v47, %v10532_v48 }
0x3020   :  { %3149 = vmatpush1.bf16.msra.mxu1 %v7693_v54  ;;  %3190 = vmatpush1.bf16.msra.mxu0 %v7695_v56 }
0x3021   :  { %3228 = vmatprep.subr.bf16.mxu1 %v7714_v58  ;;  %3269 = vmatprep.subr.bf16.mxu0 %v7716_v60 }
0x3023   :  { %7721 = vmatmul.mubr.msk.bf16.vlgmr.msra.gmra.mxu1 %vm1963_vm11, %v10349_v10  ;;  %7722 = vmatmul.mubr.msk.bf16.vlgmr.msra.gmra.mxu0 %vm1963_vm11, %v10349_v10 }
0x3024   :  { %3229 = vmatpush1.bf16.msra.mxu1 %v7713_v15  ;;  %3270 = vmatpush1.bf16.msra.mxu0 %v7715_v16 }
0x3025   :  { %3230 = vmatprep.subr.bf16.mxu1 %v7698_v17  ;;  %3271 = vmatprep.subr.bf16.mxu0 %v7700_v19 }
0x3026   :  { %3248 = vmatprep.mubr.bf16.mxu1 %v9540_v18  ;;  %3289 = vmatprep.mubr.bf16.mxu0 %v9540_v18 }
0x3028   :  { %3231 = vmatpush1.bf16.msra.mxu1 %v7697_v9  ;;  %3272 = vmatpush1.bf16.msra.mxu0 %v7699_v20 }
0x3029   :  { %8388 = vmatprep.subr.bf16.mxu1 %v9015_v21  ;;  %8410 = vmatprep.subr.bf16.mxu0 %v9016_v22 }
0x302b   :  { %7723 = vmatmul.mubr.msk.bf16.vlgmr.msra.gmra.mxu1 %vm1963_vm11, %v10349_v10  ;;  %7724 = vmatmul.mubr.msk.bf16.vlgmr.msra.gmra.mxu0 %vm1963_vm11, %v10349_v10  ;;  %v9035_v10 = vld [vmem:[%s11668_s21 + $0x50] sm:$0xff]  }
0x302c   :  { %8389 = vmatpush3.bf16.msra.mxu1 %v9017_v23  ;;  %8411 = vmatpush3.bf16.msra.mxu0 %v9018_v26 }
0x302d   :  { %8390 = vmatprep.subr.bf16.mxu1 %v9019_v63  ;;  %8412 = vmatprep.subr.bf16.mxu0 %v9020_v24  ;;  %v2750_v63 = vrot.slane %v10529_v47, %v10543_v13  ;;  %v2758_v24 = vrot.slane %v10529_v47, %v10546_v14 }
0x3030   :  { %8391 = vmatpush3.bf16.msra.mxu1 %v9021_v28  ;;  %8413 = vmatpush3.bf16.msra.mxu0 %v9022_v29  ;;  %v9049_v28 = vld [vmem:[%s11668_s21 + $0x138] sm:$0xff]  }
0x3031   :  { %8392 = vmatprep.subr.bf16.mxu1 %v9023_v30  ;;  %8414 = vmatprep.subr.bf16.mxu0 %v9024_v31  ;;  %v9050_v29 = vld [vmem:[%s11668_s21 + $0x1b8] sm:$0xff]  }
0x3034   :  { %8393 = vmatpush3.bf16.msra.mxu1 %v9025_v32  ;;  %8415 = vmatpush3.bf16.msra.mxu0 %v9026_v41 }
0x3035   :  { %8394 = vmatprep.subr.bf16.mxu1 %v9027_v33  ;;  %8416 = vmatprep.subr.bf16.mxu0 %v9028_v61  ;;  %v9051_v33 = vld [vmem:[%s11668_s21 + $0x170] sm:$0xff]  }
0x3036   :  { %v9052_v61 = vld [vmem:[%s11668_s21 + $0x1f0] sm:$0xff]  }
0x3038   :  { %8395 = vmatpush3.bf16.msra.mxu1 %v9029_v53  ;;  %8417 = vmatpush3.bf16.msra.mxu0 %v9030_v55 }
0x3039   :  { %8396 = vmatprep.subr.bf16.mxu1 %v9031_v57  ;;  %8418 = vmatprep.subr.bf16.mxu0 %v9032_v59 }
0x303c   :  { %8397 = vmatpush3.bf16.msra.mxu1 %v9033_v62  ;;  %8419 = vmatpush3.bf16.msra.mxu0 %v9034_v36  ;;  %v9053_v62 = vld [vmem:[%s11668_s21 + $0x130] sm:$0xff]  }
0x303d   :  { %8398 = vmatprep.subr.bf16.mxu1 %v9035_v10  ;;  %8420 = vmatprep.subr.bf16.mxu0 %v9036_v40  ;;  %v9054_v36 = vld [vmem:[%s11668_s21 + $0x1b0] sm:$0xff]  }
0x3040   :  { %8399 = vmatpush3.bf16.msra.mxu1 %v9037_v38  ;;  %8421 = vmatpush3.bf16.msra.mxu0 %v9038_v42  ;;  %v9055_v38 = vld [vmem:[%s11668_s21 + $0x168] sm:$0xff]  }
0x3041   :  { %8400 = vmatprep.subr.bf16.mxu1 %v9039_v43  ;;  %8422 = vmatprep.subr.bf16.mxu0 %v9040_v1  ;;  %v9056_v42 = vld [vmem:[%s11668_s21 + $0x1e8] sm:$0xff]  }
0x3044   :  { %8401 = vmatpush3.bf16.msra.mxu1 %v9041_v44  ;;  %8423 = vmatpush3.bf16.msra.mxu0 %v9042_v3 }
0x3045   :  { %8402 = vmatprep.subr.bf16.mxu1 %v9043_v4  ;;  %8424 = vmatprep.subr.bf16.mxu0 %v9044_v5 }
0x3048   :  { %8403 = vmatpush3.bf16.msra.mxu1 %v9045_v6  ;;  %8425 = vmatpush3.bf16.msra.mxu0 %v9046_v7  ;;  %v9057_v6 = vld [vmem:[%s11668_s21 + $0x128] sm:$0xff]  }
0x3049   :  { %8432 = vmatprep.subr.bf16.mxu1 %v9047_v8  ;;  %8454 = vmatprep.subr.bf16.mxu0 %v9048_v45  ;;  %v9058_v7 = vld [vmem:[%s11668_s21 + $0x1a8] sm:$0xff]  }
0x30d3   :  { %v3004_v52 = vpop.f32.mrf.mxu1  ;;  %v3045_v37 = vpop.f32.mrf.mxu0 }
0x30d4   :  { %v3005_v54 = vadd.f32 %v3004_v52, %v2730_v49  ;;  %v3046_v56 = vadd.f32 %v3045_v37, %v2738_v51  ;;  %v9059_v49 = vld [vmem:[%s11668_s21 + $0x160] sm:$0xff]   ;;  %v10597_v52 = vsub.s32 6, %v9746_v25 }
0x30d5   :  { %v3006_v58 = vpop.f32.mrf.mxu1  ;;  %v3047_v60 = vpop.f32.mrf.mxu0  ;;  %v9060_v51 = vld [vmem:[%s11668_s21 + $0x1e0] sm:$0xff]  }
0x30d6   :  { %v3007_v0 = vadd.f32 %v3006_v58, %v2734_v50  ;;  %v3048_v12 = vadd.f32 %v3047_v60, %v2742_v34  ;;  %v3298_v15 = vmax.f32 %v3005_v54, 0.0  ;;  %v3300_v16 = vmax.f32 %v3046_v56, 0.0  ;;  %v9061_v37 = vld [vmem:[%s11668_s21 + $0x120] sm:$0xff]   ;;  %v10608_v56 = vld [vmem:[%s11667_s20 + $0x8] sm:$0xff] }
0x30d7   :  { %v3008_v17 = vpop.f32.mrf.mxu1  ;;  %v3049_v19 = vpop.f32.mrf.mxu0  ;;  %v9062_v54 = vld [vmem:[%s11668_s21 + $0x1a0] sm:$0xff]  }
0x30d8   :  { %v3299_v9 = vmax.f32 %v3007_v0, 0.0  ;;  %v3301_v20 = vmax.f32 %v3048_v12, 0.0  ;;  %v3570_v30 = vpack.c.bf16 %v3298_v15, %v3298_v15  ;;  %v3572_v31 = vpack.c.bf16 %v3300_v16, %v3300_v16  ;;  %v9063_v0 = vld [vmem:[%s11668_s21 + $0x158] sm:$0xff]  }
0x30d9   :  { %v3009_v21 = vpop.f32.mrf.mxu1  ;;  %v3050_v22 = vpop.f32.mrf.mxu0  ;;  %v9064_v12 = vld [vmem:[%s11668_s21 + $0x1d8] sm:$0xff]   ;;  %v2786_v15 = vrot.slane %v10608_v56, %v10597_v52 }
0x30da   :  { %v3571_v23 = vpack.c.bf16 %v3299_v9, %v3299_v9  ;;  %v3573_v26 = vpack.c.bf16 %v3301_v20, %v3301_v20  ;;  %v9065_v19 = vld [vmem:[%s11668_s21 + $0x118] sm:$0xff]   ;;  %v10625_v20 = vsub.s32 4, %v9746_v25  ;;  %v9069_v25 = vld [vmem:[%s11668_s21 + $0x110] sm:$0xff]  }
0x30db   :  { %v10558_v32 = vpop.f32.mrf.mxu1  ;;  %v10560_v41 = vpop.f32.mrf.mxu0  ;;  %v9066_v9 = vld [vmem:[%s11668_s21 + $0x198] sm:$0xff]  }
0x30dc   :  { %4393 = vmatprep.mubr.bf16.mxu1 %v3571_v23  ;;  %4433 = vmatprep.mubr.bf16.mxu0 %v3573_v26  ;;  %v9067_v23 = vld [vmem:[%s11668_s21 + $0x150] sm:$0xff]  }
0x30dd   :  { %v3088_v53 = vpop.f32.mrf.mxu1  ;;  %v3129_v55 = vpop.f32.mrf.mxu0  ;;  %4394 = vmatmul.mubr.bf16.vlgmr.msra.gmra.mxu1 %v3570_v30  ;;  %4434 = vmatmul.mubr.bf16.vlgmr.msra.gmra.mxu0 %v3572_v31  ;;  %v9068_v26 = vld [vmem:[%s11668_s21 + $0x1d0] sm:$0xff]   ;;  %v2746_v30 = vrot.slane %v10529_v47, %v10625_v20  ;;  %v2754_v31 = vrot.slane %v10529_v47, %v10597_v52 }
0x30de   :  { %v3089_v57 = vadd.f32 %v3088_v53, %v2750_v63  ;;  %v3130_v59 = vadd.f32 %v3129_v55, %v2758_v24  ;;  %8433 = vmatpush3.bf16.msra.mxu1 %v9049_v28  ;;  %8455 = vmatpush3.bf16.msra.mxu0 %v9050_v29  ;;  %v9070_v29 = vld [vmem:[%s11668_s21 + $0x190] sm:$0xff]   ;;  %v9071_v53 = vld [vmem:[%s11668_s21 + $0x148] sm:$0xff]  }
0x30df   :  { %v3090_v10 = vpop.f32.mrf.mxu1  ;;  %v3131_v40 = vpop.f32.mrf.mxu0  ;;  %8434 = vmatprep.subr.bf16.mxu1 %v9051_v33  ;;  %8456 = vmatprep.subr.bf16.mxu0 %v9052_v61  ;;  %v9072_v55 = vld [vmem:[%s11668_s21 + $0x1c8] sm:$0xff]  }
0x30e0   :  { %v3303_v43 = vmax.f32 %v3089_v57, 0.0  ;;  %v3305_v1 = vmax.f32 %v3130_v59, 0.0  ;;  %v2766_v57 = vrot.slane %v10608_v56, %v9760_v35  ;;  %v2774_v59 = vrot.slane %v10608_v56, %v10532_v48  ;;  %v9074_v10 = vld [vmem:[%s11668_s21 + $0x188] sm:$0xff]  }
0x30e1   :  { %v3091_v44 = vpop.f32.mrf.mxu1  ;;  %v3132_v3 = vpop.f32.mrf.mxu0  ;;  %v3087_v40 = vadd.f32 %v10558_v32, %v2746_v30  ;;  %v9077_v32 = vld [vmem:[%s11668_s21 + $0x100] sm:$0xff]   ;;  %v9096_v30 = vld [vmem:[%s11668_s21 + $0x2d8] sm:$0xff]  }
0x30e2   :  { %v3575_v4 = vpack.c.bf16 %v3303_v43, %v3303_v43  ;;  %v3577_v5 = vpack.c.bf16 %v3305_v1, %v3305_v1  ;;  %8435 = vmatpush3.bf16.msra.mxu1 %v9053_v62  ;;  %8457 = vmatpush3.bf16.msra.mxu0 %v9054_v36  ;;  %v9073_v36 = vld [vmem:[%s11668_s21 + $0x108] sm:$0xff]   ;;  %v9076_v43 = vld [vmem:[%s11668_s21 + $0x1c0] sm:$0xff]  }
0x30e3   :  { %v10586_v8 = vpop.f32.mrf.mxu1  ;;  %v10588_v45 = vpop.f32.mrf.mxu0  ;;  %8436 = vmatprep.subr.bf16.mxu1 %v9055_v38  ;;  %8458 = vmatprep.subr.bf16.mxu0 %v9056_v42  ;;  %v3128_v38 = vadd.f32 %v10560_v41, %v2754_v31  ;;  %v9075_v42 = vld [vmem:[%s11668_s21 + $0x140] sm:$0xff]   ;;  %v3302_v3 = vmax.f32 %v3087_v40, 0.0  ;;  %v9097_v31 = vld [vmem:[%s11668_s21 + $0x218] sm:$0xff]   ;;  %v2790_v40 = vrot.slane %v10608_v56, %v10546_v14 }
0x30e4   :  { %4473 = vmatprep.mubr.bf16.mxu1 %v3575_v4  ;;  %4513 = vmatprep.mubr.bf16.mxu0 %v3577_v5  ;;  %v9078_v41 = vld [vmem:[%s11668_s21 + $0x180] sm:$0xff]   ;;  %v9079_v5 = vld [vmem:[%s11668_s21 + $0x278] sm:$0xff]  }
0x30e5   :  { %v3170_v50 = vpop.f32.mrf.mxu1  ;;  %v3211_v34 = vpop.f32.mrf.mxu0  ;;  %v3304_v4 = vmax.f32 %v3128_v38, 0.0  ;;  %v9105_v38 = vld [vmem:[%s11668_s21 + $0x208] sm:$0xff]  }
0x30e6   :  { %8437 = vmatpush3.bf16.msra.mxu1 %v9057_v6  ;;  %8459 = vmatpush3.bf16.msra.mxu0 %v9058_v7  ;;  %v3171_v1 = vadd.f32 %v3170_v50, %v2766_v57  ;;  %v3212_v44 = vadd.f32 %v3211_v34, %v2774_v59  ;;  %v9080_v6 = vld [vmem:[%s11668_s21 + $0x2f8] sm:$0xff]   ;;  %v3574_v50 = vpack.c.bf16 %v3302_v3, %v3302_v3  ;;  %v9102_v59 = vld [vmem:[%s11668_s21 + $0x290] sm:$0xff]   ;;  %v9109_v3 = vld [vmem:[%s11668_s21 + $0x200] sm:$0xff]  }
0x30e7   :  { %v3172_v58 = vpop.f32.mrf.mxu1  ;;  %v3213_v60 = vpop.f32.mrf.mxu0  ;;  %8438 = vmatprep.subr.bf16.mxu1 %v9059_v49  ;;  %8460 = vmatprep.subr.bf16.mxu0 %v9060_v51  ;;  %v9081_v51 = vld [vmem:[%s11668_s21 + $0x238] sm:$0xff]   ;;  %v3576_v34 = vpack.c.bf16 %v3304_v4, %v3304_v4  ;;  %v2762_v57 = vrot.slane %v10608_v56, %v9751_v27 }
0x30e8   :  { %v3307_v7 = vmax.f32 %v3171_v1, 0.0  ;;  %v3309_v49 = vmax.f32 %v3212_v44, 0.0  ;;  %v9083_v58 = vld [vmem:[%s11668_s21 + $0x270] sm:$0xff]   ;;  %v9107_v1 = vld [vmem:[%s11668_s21 + $0x240] sm:$0xff]  }
0x30e9   :  { %v3173_v16 = vpop.f32.mrf.mxu1  ;;  %v3214_v17 = vpop.f32.mrf.mxu0  ;;  %v9084_v60 = vld [vmem:[%s11668_s21 + $0x2f0] sm:$0xff]  }
0x30ea   :  { %8439 = vmatpush3.bf16.msra.mxu1 %v9061_v37  ;;  %8461 = vmatpush3.bf16.msra.mxu0 %v9062_v54  ;;  %v9082_v37 = vld [vmem:[%s11668_s21 + $0x2b8] sm:$0xff]   ;;  %v3579_v54 = vpack.c.bf16 %v3307_v7, %v3307_v7  ;;  %v9087_v16 = vld [vmem:[%s11668_s21 + $0x268] sm:$0xff]  }
0x30eb   :  { %v10627_v21 = vpop.f32.mrf.mxu1  ;;  %v3291_v22 = vpop.f32.mrf.mxu0  ;;  %8440 = vmatprep.subr.bf16.mxu1 %v9063_v0  ;;  %8462 = vmatprep.subr.bf16.mxu0 %v9064_v12  ;;  %v3581_v0 = vpack.c.bf16 %v3309_v49, %v3309_v49  ;;  %v9085_v12 = vld [vmem:[%s11668_s21 + $0x230] sm:$0xff]   ;;  %v9088_v17 = vld [vmem:[%s11668_s21 + $0x2e8] sm:$0xff]   ;;  %v9113_v49 = vld [vmem:[%s11668_s21 + $0x338] sm:$0xff]  }
0x30ec   :  { %v10635_v63 = vadd.f32 %v3291_v22, %v2786_v15  ;;  %v9086_v15 = vld [vmem:[%s11668_s21 + $0x2b0] sm:$0xff]   ;;  %v9091_v22 = vld [vmem:[%s11668_s21 + $0x260] sm:$0xff]  }
0x30ed   :  { %v10637_v24 = vpop.f32.mrf.mxu1  ;;  %v10639_v28 = vpop.f32.mrf.mxu0 }
0x30ee   :  { %8441 = vmatpush3.bf16.msra.mxu1 %v9065_v19  ;;  %8463 = vmatpush3.bf16.msra.mxu0 %v9066_v9  ;;  %v9089_v19 = vld [vmem:[%s11668_s21 + $0x228] sm:$0xff]  }
0x30ef   :  { %v3254_v33 = vpop.f32.mrf.mxu1  ;;  %v3295_v61 = vpop.f32.mrf.mxu0  ;;  %8442 = vmatprep.subr.bf16.mxu1 %v9067_v23  ;;  %8464 = vmatprep.subr.bf16.mxu0 %v9068_v26  ;;  %v9090_v9 = vld [vmem:[%s11668_s21 + $0x2a8] sm:$0xff]   ;;  %v9092_v23 = vld [vmem:[%s11668_s21 + $0x2e0] sm:$0xff]  }
0x30f0   :  { %v9093_v26 = vld [vmem:[%s11668_s21 + $0x220] sm:$0xff]   ;;  %v9098_v33 = vld [vmem:[%s11668_s21 + $0x298] sm:$0xff]   ;;  %v9099_v61 = vld [vmem:[%s11668_s21 + $0x250] sm:$0xff]  }
0x30f1   :  { %v3255_v62 = vpop.f32.mrf.mxu1  ;;  %v3296_v47 = vpop.f32.mrf.mxu0 }
0x30f2   :  { %8443 = vmatpush3.bf16.msra.mxu1 %v9069_v25  ;;  %8465 = vmatpush3.bf16.msra.mxu0 %v9070_v29  ;;  %v9094_v25 = vld [vmem:[%s11668_s21 + $0x2a0] sm:$0xff]   ;;  %v9095_v29 = vld [vmem:[%s11668_s21 + $0x258] sm:$0xff]   ;;  %v9103_v62 = vld [vmem:[%s11668_s21 + $0x248] sm:$0xff]   ;;  %v2770_v47 = vrot.slane %v10608_v56, %v10524_v46 }
0x30f3   :  { %8444 = vmatprep.subr.bf16.mxu1 %v9071_v53  ;;  %8466 = vmatprep.subr.bf16.mxu0 %v9072_v55  ;;  %v9100_v53 = vld [vmem:[%s11668_s21 + $0x2d0] sm:$0xff]  }
0x30f4   :  { %v9101_v55 = vld [vmem:[%s11668_s21 + $0x210] sm:$0xff]   ;;  %v3210_v44 = vadd.f32 %v10588_v45, %v2770_v47  ;;  %v9110_v45 = vld [vmem:[%s11668_s21 + $0x280] sm:$0xff]  }
0x30f6   :  { %8445 = vmatpush3.bf16.msra.mxu1 %v9073_v36  ;;  %8467 = vmatpush3.bf16.msra.mxu0 %v9074_v10  ;;  %v9104_v36 = vld [vmem:[%s11668_s21 + $0x2c8] sm:$0xff]   ;;  %v2782_v10 = vrot.slane %v10608_v56, %v10543_v13 }
0x30f7   :  { %8446 = vmatprep.subr.bf16.mxu1 %v9075_v42  ;;  %8468 = vmatprep.subr.bf16.mxu0 %v9076_v43  ;;  %v3169_v42 = vadd.f32 %v10586_v8, %v2762_v57  ;;  %v9106_v43 = vld [vmem:[%s11668_s21 + $0x288] sm:$0xff]   ;;  %v3294_v8 = vadd.f32 %v10639_v28, %v2790_v40  ;;  %v9134_v57 = vld [vmem:[%s11668_s21 + $0x390] sm:$0xff]   ;;  %v9140_v40 = vld [vmem:[%s11668_s21 + $0x3c0] sm:$0xff]  }
0x30f9   :  { %v3306_v4 = vmax.f32 %v3169_v42, 0.0  ;;  %v3313_v7 = vmax.f32 %v3294_v8, 0.0  ;;  %v9142_v42 = vld [vmem:[%s11668_s21 + $0x380] sm:$0xff]  }
0x30fa   :  { %8447 = vmatpush3.bf16.msra.mxu1 %v9077_v32  ;;  %8469 = vmatpush3.bf16.msra.mxu0 %v9078_v41  ;;  %v9108_v32 = vld [vmem:[%s11668_s21 + $0x2c0] sm:$0xff]   ;;  %v3253_v41 = vadd.f32 %v10637_v24, %v2782_v10  ;;  %v9112_v24 = vld [vmem:[%s11668_s21 + $0x3f8] sm:$0xff]  }
0x30fb   :  { %8476 = vmatprep.subr.bf16.mxu1 %v9079_v5  ;;  %8498 = vmatprep.subr.bf16.mxu0 %v9080_v6  ;;  %v9111_v5 = vld [vmem:[%s11668_s21 + $0x378] sm:$0xff]   ;;  %v3308_v6 = vmax.f32 %v3210_v44, 0.0  ;;  %v9139_v10 = vld [vmem:[%s11668_s21 + $0x340] sm:$0xff]  }
0x30fc   :  { %v3311_v28 = vmax.f32 %v3253_v41, 0.0 }
0x30fd   :  { %4474 = vmatmul.mubr.bf16.vlgmr.msra.gmra.mxu1 %v3574_v50  ;;  %4514 = vmatmul.mubr.bf16.vlgmr.msra.gmra.mxu0 %v3576_v34  ;;  %v9114_v50 = vld [vmem:[%s11668_s21 + $0x3b8] sm:$0xff]   ;;  %v3580_v34 = vpack.c.bf16 %v3308_v6, %v3308_v6 }
0x30fe   :  { %8477 = vmatpush3.bf16.msra.mxu1 %v9081_v51  ;;  %4553 = vmatprep.mubr.bf16.mxu1 %v3579_v54  ;;  %v3578_v51 = vpack.c.bf16 %v3306_v4, %v3306_v4  ;;  %v3583_v54 = vpack.c.bf16 %v3311_v28, %v3311_v28 }
0x30ff   :  { %8499 = vmatpush3.bf16.msra.mxu0 %v9082_v37  ;;  %4593 = vmatprep.mubr.bf16.mxu0 %v3581_v0  ;;  %v9115_v37 = vld [vmem:[%s11668_s21 + $0x370] sm:$0xff]  }
0x3100   :  { %8478 = vmatprep.subr.bf16.mxu1 %v9083_v58  ;;  %8500 = vmatprep.subr.bf16.mxu0 %v9084_v60  ;;  %v9116_v58 = vld [vmem:[%s11668_s21 + $0x3f0] sm:$0xff]   ;;  %v3585_v60 = vpack.c.bf16 %v3313_v7, %v3313_v7 }
0x3101   :  { %v9117_v0 = vld [vmem:[%s11668_s21 + $0x330] sm:$0xff]  }
0x3102   :  { %8479 = vmatpush3.bf16.msra.mxu1 %v9085_v12  ;;  %v9118_v12 = vld [vmem:[%s11668_s21 + $0x3b0] sm:$0xff]  }
0x3103   :  { %8501 = vmatpush3.bf16.msra.mxu0 %v9086_v15  ;;  %8480 = vmatprep.subr.bf16.mxu1 %v9087_v16  ;;  %v9119_v15 = vld [vmem:[%s11668_s21 + $0x368] sm:$0xff]  }
0x3104   :  { %8502 = vmatprep.subr.bf16.mxu0 %v9088_v17  ;;  %v9120_v16 = vld [vmem:[%s11668_s21 + $0x3e8] sm:$0xff]  }
0x3105   :  { %v9121_v17 = vld [vmem:[%s11668_s21 + $0x328] sm:$0xff]  }
0x3106   :  { %8481 = vmatpush3.bf16.msra.mxu1 %v9089_v19  ;;  %v9122_v19 = vld [vmem:[%s11668_s21 + $0x3a8] sm:$0xff]  }
0x3107   :  { %8503 = vmatpush3.bf16.msra.mxu0 %v9090_v9  ;;  %8482 = vmatprep.subr.bf16.mxu1 %v9091_v22  ;;  %v9123_v9 = vld [vmem:[%s11668_s21 + $0x360] sm:$0xff]  }
0x3108   :  { %8504 = vmatprep.subr.bf16.mxu0 %v9092_v23  ;;  %v9124_v22 = vld [vmem:[%s11668_s21 + $0x3e0] sm:$0xff]  }
0x3109   :  { %v9125_v23 = vld [vmem:[%s11668_s21 + $0x320] sm:$0xff]  }
0x310a   :  { %8483 = vmatpush3.bf16.msra.mxu1 %v9093_v26  ;;  %v9126_v26 = vld [vmem:[%s11668_s21 + $0x3a0] sm:$0xff]  }
0x310b   :  { %8505 = vmatpush3.bf16.msra.mxu0 %v9094_v25  ;;  %8484 = vmatprep.subr.bf16.mxu1 %v9095_v29  ;;  %v9127_v25 = vld [vmem:[%s11668_s21 + $0x358] sm:$0xff]  }
0x310c   :  { %8506 = vmatprep.subr.bf16.mxu0 %v9096_v30  ;;  %v9128_v29 = vld [vmem:[%s11668_s21 + $0x3d8] sm:$0xff]  }
0x310d   :  { %v9129_v30 = vld [vmem:[%s11668_s21 + $0x318] sm:$0xff]  }
0x310e   :  { %8485 = vmatpush3.bf16.msra.mxu1 %v9097_v31  ;;  %v9130_v31 = vld [vmem:[%s11668_s21 + $0x398] sm:$0xff]  }
0x310f   :  { %8507 = vmatpush3.bf16.msra.mxu0 %v9098_v33  ;;  %8486 = vmatprep.subr.bf16.mxu1 %v9099_v61  ;;  %v9131_v33 = vld [vmem:[%s11668_s21 + $0x350] sm:$0xff]  }
0x3110   :  { %8508 = vmatprep.subr.bf16.mxu0 %v9100_v53  ;;  %v9132_v61 = vld [vmem:[%s11668_s21 + $0x3d0] sm:$0xff]  }
0x3111   :  { %v9133_v53 = vld [vmem:[%s11668_s21 + $0x310] sm:$0xff]  }
0x3112   :  { %8487 = vmatpush3.bf16.msra.mxu1 %v9101_v55  ;;  %v2778_v55 = vrot.slane %v10608_v56, %v10625_v20  ;;  %v9137_v56 = vld [vmem:[%s11668_s21 + $0x308] sm:$0xff]  }
0x3113   :  { %8509 = vmatpush3.bf16.msra.mxu0 %v9102_v59  ;;  %8488 = vmatprep.subr.bf16.mxu1 %v9103_v62  ;;  %v9135_v59 = vld [vmem:[%s11668_s21 + $0x348] sm:$0xff]  }
0x3114   :  { %8510 = vmatprep.subr.bf16.mxu0 %v9104_v36  ;;  %v9136_v62 = vld [vmem:[%s11668_s21 + $0x3c8] sm:$0xff]   ;;  %v3251_v47 = vadd.f32 %v10627_v21, %v2778_v55  ;;  %v9141_v21 = vld [vmem:[%s11668_s21 + $0x300] sm:$0xff]  }
0x3115   :  { %v9138_v36 = vld [vmem:[%s11668_s21 + $0x388] sm:$0xff]  }
0x3116   :  { %8489 = vmatpush3.bf16.msra.mxu1 %v9105_v38  ;;  %v3310_v38 = vmax.f32 %v3251_v47, 0.0 }
0x3117   :  { %8511 = vmatpush3.bf16.msra.mxu0 %v9106_v43  ;;  %8490 = vmatprep.subr.bf16.mxu1 %v9107_v1  ;;  %v3312_v43 = vmax.f32 %v10635_v63, 0.0  ;;  %v7725_v63 = vld [vmem:[%s11669_s22] ss:$0 sm:$0xff] }
0x3118   :  { %8512 = vmatprep.subr.bf16.mxu0 %v9108_v32  ;;  %v3582_v1 = vpack.c.bf16 %v3310_v38, %v3310_v38 }
0x3119   :  { %v3584_v44 = vpack.c.bf16 %v3312_v43, %v3312_v43 }
0x311a   :  { %8491 = vmatpush3.bf16.msra.mxu1 %v9109_v3 }
0x311b   :  { %8513 = vmatpush3.bf16.msra.mxu0 %v9110_v45  ;;  %8520 = vmatprep.subr.bf16.mxu1 %v9111_v5 }
0x311c   :  { %8542 = vmatprep.subr.bf16.mxu0 %v9112_v24 }
0x311d   :  { %4554 = vmatmul.mubr.bf16.vlgmr.msra.gmra.mxu1 %v3578_v51 }
0x311e   :  { %4594 = vmatmul.mubr.bf16.vlgmr.msra.gmra.mxu0 %v3580_v34  ;;  %8521 = vmatpush3.bf16.msra.mxu1 %v9113_v49 }
0x311f   :  { %4633 = vmatprep.mubr.bf16.mxu1 %v3583_v54  ;;  %8543 = vmatpush3.bf16.msra.mxu0 %v9114_v50 }
0x3120   :  { %4673 = vmatprep.mubr.bf16.mxu0 %v3585_v60  ;;  %8522 = vmatprep.subr.bf16.mxu1 %v9115_v37 }
0x3121   :  { %8544 = vmatprep.subr.bf16.mxu0 %v9116_v58 }
0x3122   :  { %8523 = vmatpush3.bf16.msra.mxu1 %v9117_v0 }
0x3123   :  { %8545 = vmatpush3.bf16.msra.mxu0 %v9118_v12  ;;  %8524 = vmatprep.subr.bf16.mxu1 %v9119_v15 }
0x3124   :  { %8546 = vmatprep.subr.bf16.mxu0 %v9120_v16 }
0x3126   :  { %8525 = vmatpush3.bf16.msra.mxu1 %v9121_v17 }
0x3127   :  { %8547 = vmatpush3.bf16.msra.mxu0 %v9122_v19  ;;  %8526 = vmatprep.subr.bf16.mxu1 %v9123_v9 }
0x3128   :  { %8548 = vmatprep.subr.bf16.mxu0 %v9124_v22 }
0x312a   :  { %8527 = vmatpush3.bf16.msra.mxu1 %v9125_v23 }
0x312b   :  { %8549 = vmatpush3.bf16.msra.mxu0 %v9126_v26  ;;  %8528 = vmatprep.subr.bf16.mxu1 %v9127_v25 }
0x312c   :  { %8550 = vmatprep.subr.bf16.mxu0 %v9128_v29 }
0x312e   :  { %8529 = vmatpush3.bf16.msra.mxu1 %v9129_v30 }
0x312f   :  { %8551 = vmatpush3.bf16.msra.mxu0 %v9130_v31  ;;  %8530 = vmatprep.subr.bf16.mxu1 %v9131_v33 }
0x3130   :  { %8552 = vmatprep.subr.bf16.mxu0 %v9132_v61 }
0x3132   :  { %8531 = vmatpush3.bf16.msra.mxu1 %v9133_v53 }
0x3133   :  { %8553 = vmatpush3.bf16.msra.mxu0 %v9134_v57  ;;  %8532 = vmatprep.subr.bf16.mxu1 %v9135_v59 }
0x3134   :  { %8554 = vmatprep.subr.bf16.mxu0 %v9136_v62 }
0x3136   :  { %8533 = vmatpush3.bf16.msra.mxu1 %v9137_v56 }
0x3137   :  { %8555 = vmatpush3.bf16.msra.mxu0 %v9138_v36  ;;  %8534 = vmatprep.subr.bf16.mxu1 %v9139_v10 }
0x3138   :  { %8556 = vmatprep.subr.bf16.mxu0 %v9140_v40 }
0x313a   :  { %8535 = vmatpush3.bf16.msra.mxu1 %v9141_v21 }
0x313b   :  { %8557 = vmatpush3.bf16.msra.mxu0 %v9142_v42  ;;  %8868 = vmatprep.subr.bf16.mxu1 %v9537_v2 }
0x313c   :  { %8876 = vmatprep.subr.bf16.mxu0 %v9537_v2 }
0x313d   :  { %4634 = vmatmul.mubr.bf16.vlgmr.msra.gmra.mxu1 %v3582_v1 }
0x313e   :  { %4674 = vmatmul.mubr.bf16.vlgmr.msra.gmra.mxu0 %v3584_v44  ;;  %8872 = vmatprep.mubr.msk.bf16.mxu1 %vm9538_vm2, %v9537_v2 }
0x313f   :  { %8878 = vmatprep.mubr.msk.bf16.mxu0 %vm9538_vm2, %v9537_v2 }
0x319d   :  { %v8404_v32 = vpop.f32.mrf.mxu1  ;;  %v8426_v41 = vpop.f32.mrf.mxu0 }
0x319f   :  { %v8405_v8 = vpop.f32.mrf.mxu1  ;;  %v8427_v3 = vpop.f32.mrf.mxu0 }
0x31a0   :  { %v8406_v4 = vadd.f32 %v8405_v8, %v8404_v32  ;;  %v8428_v45 = vadd.f32 %v8427_v3, %v8426_v41  ;;  %v9143_v41 = vld [vmem:[%s11660_s13 + $0x18] sm:$0xff]  }
0x31a1   :  { %v8407_v5 = vpop.f32.mrf.mxu1  ;;  %v8429_v6 = vpop.f32.mrf.mxu0  ;;  %8869 = vmatpush3.bf16.msra.mxu1 %v9143_v41 }
0x31a2   :  { %v4396_v24 = vadd.f32 %v8406_v4, %v7725_v63  ;;  %v9144_v63 = vld [vmem:[%s11660_s13 + $0x10] sm:$0xff]   ;;  %8870 = vmatprep.subr.bf16.mxu1 %v9537_v2 }
0x31a3   :  { %v8408_v28 = vpop.f32.mrf.mxu1  ;;  %v8430_v7 = vpop.f32.mrf.mxu0 }
0x31a4   :  { %v4436_v49 = vadd.f32 %v8428_v45, %v4396_v24  ;;  %v7854_v7 = vld [vmem:[%s11670_s23] ss:$0 sm:$0xff] }
0x31a5   :  { %8871 = vmatpush3.bf16.msra.mxu1 %v9144_v63 }
0x31a6   :  { %8882 = vmatprep.subr.bf16.mxu1 %v9537_v2 }
0x31bd   :  { %v8448_v51 = vpop.f32.mrf.mxu1  ;;  %v8470_v50 = vpop.f32.mrf.mxu0 }
0x31bf   :  { %v8449_v34 = vpop.f32.mrf.mxu1  ;;  %v8471_v37 = vpop.f32.mrf.mxu0 }
0x31c0   :  { %v8450_v26 = vadd.f32 %v8449_v34, %v8448_v51  ;;  %v8472_v29 = vadd.f32 %v8471_v37, %v8470_v50  ;;  %v7855_v51 = vld [vmem:[%s11671_s24] ss:$0 sm:$0xff] }
0x31c1   :  { %v8451_v54 = vpop.f32.mrf.mxu1  ;;  %v8473_v58 = vpop.f32.mrf.mxu0 }
0x31c2   :  { %v4476_v25 = vadd.f32 %v8450_v26, %v4436_v49  ;;  %v7861_v54 = vld [vmem:[%s11661_s14 + $0x1] ss:$0 sm:$0xff]  ;;  %s11708_s14 = smov 80  }
0x31c3   :  { %v8452_v60 = vpop.f32.mrf.mxu1  ;;  %v8474_v0 = vpop.f32.mrf.mxu0 }
0x31c4   :  { %v4516_v31 = vadd.f32 %v8472_v29, %v4476_v25 }
0x31dd   :  { %v8492_v12 = vpop.f32.mrf.mxu1 }
0x31de   :  { %v8514_v15 = vpop.f32.mrf.mxu0 }
0x31df   :  { %v8493_v16 = vpop.f32.mrf.mxu1 }
0x31e0   :  { %v8515_v17 = vpop.f32.mrf.mxu0  ;;  %v8494_v30 = vadd.f32 %v8493_v16, %v8492_v12 }
0x31e1   :  { %v8495_v19 = vpop.f32.mrf.mxu1  ;;  %v8516_v53 = vadd.f32 %v8515_v17, %v8514_v15 }
0x31e2   :  { %v8517_v9 = vpop.f32.mrf.mxu0  ;;  %v4556_v33 = vadd.f32 %v8494_v30, %v4516_v31 }
0x31e3   :  { %v8496_v22 = vpop.f32.mrf.mxu1 }
0x31e4   :  { %v8518_v23 = vpop.f32.mrf.mxu0  ;;  %v4596_v59 = vadd.f32 %v8516_v53, %v4556_v33 }
0x31fd   :  { %v8536_v61 = vpop.f32.mrf.mxu1 }
0x31fe   :  { %v8558_v55 = vpop.f32.mrf.mxu0 }
0x31ff   :  { %v8537_v57 = vpop.f32.mrf.mxu1 }
0x3200   :  { %v8538_v62 = vadd.f32 %v8537_v57, %v8536_v61  ;;  %v8559_v56 = vpop.f32.mrf.mxu0 }
0x3201   :  { %v8539_v47 = vpop.f32.mrf.mxu1  ;;  %v8560_v10 = vadd.f32 %v8559_v56, %v8558_v55 }
0x3202   :  { %v4636_v36 = vadd.f32 %v8538_v62, %v4596_v59  ;;  %v8561_v40 = vpop.f32.mrf.mxu0 }
0x3203   :  { %v8540_v21 = vpop.f32.mrf.mxu1 }
0x3204   :  { %v4676_v38 = vadd.f32 %v8560_v10, %v4636_v36  ;;  %v8562_v42 = vpop.f32.mrf.mxu0 }
0x3206   :  { %v4681_v43 = vadd.f32 %v4676_v38, %v10345_v39 }
0x3208   :  { %v4684_v1 = vsel %vm2660_vm15, %v4681_v43, 0.0  ;;  %v4687_v44 = vmul.f32 %v4681_v43, %v4681_v43 }
0x3209   :  { %4685 = vadd.xlane.f32.xlu1 %v4684_v1 }
0x320a   :  { %v4688_v32 = vsel %vm2660_vm15, %v4687_v44, 0.0 }
0x320d   :  { %4689 = vadd.xlane.f32.xlu1 %v4688_v32 }
0x3292   :  { %v4686_v39 = vpop.xlane.xlu1 %4685 }
0x3293   :  { %v4691_v8 = vmul.f32 0.03125, %v4686_v39 }
0x3295   :  { %v4693_v4 = vmul.f32 %v4691_v8, %v4691_v8  ;;  %v4695_v24 = vsub.f32 %v4681_v43, %v4691_v8 }
0x3296   :  { %v4690_v3 = vpop.xlane.xlu1 %4689 }
0x3297   :  { %v4692_v45 = vmul.f32 0.03125, %v4690_v3 }
0x3299   :  { %v4694_v5 = vsub.f32 %v4692_v45, %v4693_v4 }
0x329b   :  { %v4696_v6 = vadd.f32 1e-05, %v4694_v5 }
0x329d   :  { %9485 = vrsqrt.f32 %v4696_v6 }
0x32aa   :  { %v9486_v28 = vpop.eup %9485 }
0x32ab   :  { %v4698_v49 = vmul.f32 %v9486_v28, %v4695_v24  ;;  %v7865_v28 = vld [vmem:[%s11662_s15 + $0x10] sm:$0xf] }
0x32ad   :  { %v4705_v50 = vmul.f32 %v7854_v7, %v4698_v49  ;;  %v5062_v7 = vsel %vm991_vm7, %v7865_v28, 0  ;;  %v7866_v49 = vld [vmem:[%s11662_s15 + $0x14] sm:$0xf] }
0x32af   :  { %v10915_v34 = vadd.f32 %v7855_v51, %v4705_v50  ;;  %v5016_v51 = vsel %vm991_vm7, %v7866_v49, 0 }
0x32b1   :  { %v4718_v37 = vpack.c.bf16 %v10915_v34, %v10915_v34 }
0x32b3   :  { %8873 = vmatmul.mubr.msk.bf16.vlgmr.msra.gmra.mxu1 %vm1963_vm11, %v4718_v37 }
0x32b4   :  { %8884 = vmatprep.mubr.msk.bf16.mxu1 %vm9538_vm2, %v9537_v2 }
0x3373   :  { %v4776_v58 = vpop.f32.mrf.mxu1 }
0x3374   :  { %v4777_v60 = vadd.f32 %v7861_v54, %v4776_v58 }
0x3375   :  { %v8874_v0 = vpop.f32.mrf.mxu1 }
0x3376   :  { %v4782_v12 = vmul.f32 0.35355338, %v4777_v60  ;;  %v10925_v15 = vpack.c.bf16 %v4777_v60, %v4777_v60 }
0x3377   :  { %v4779_v16 = vpop.f32.mrf.mxu1 }
0x3378   :  { %4903 = vrot.lane.b32.xlu0 %v10925_v15, %s9543_s30  ;;  %4791 = vrot.lane.b32.xlu1 %v10925_v15, %s9542_s3  ;;  %v10931_v19 = vpack.c.bf16 %v4782_v12, %v4782_v12 }
0x3379   :  { %v8875_v17 = vpop.f32.mrf.mxu1 }
0x337c   :  { %4901 = vrot.lane.b32.xlu0 %v10931_v19, %s9544_s29 }
0x33ea   :  { %v4792_v9 = vpop.permute.xlu1 %4791  ;;  %v4904_v23 = vpop.permute.xlu0 %4903 }
0x33eb   :  { %v4797_v22 = vsel %vm2017_vm12, %v4792_v9, 0  ;;  %v4909_v26 = vsel %vm2017_vm12, %v4904_v23, 0 }
0x33ec   :  { %8877 = vmatpush3.bf16.xpose.msra.mxu0 %v4797_v22 }
0x33ed   :  { %8888 = vmatprep.subr.bf16.mxu0 %v9537_v2 }
0x33ee   :  { %v4902_v25 = vpop.permute.xlu0 %4901 }
0x33f3   :  { %8879 = vmatmul.mubr.msk.bf16.vlgmr.msra.gmra.mxu0 %vm2017_vm12, %v10931_v19 }
0x33f4   :  { %8889 = vmatpush3.bf16.xpose.msra.mxu0 %v4909_v26  ;;  %8890 = vmatprep.mubr.msk.bf16.mxu0 %vm9538_vm2, %v9537_v2 }
0x33f5   :  { %8900 = vmatprep.subr.bf16.mxu0 %v9537_v2 }
0x33fb   :  { %8891 = vmatmul.mubr.msk.bf16.vlgmr.msra.gmra.mxu0 %vm2017_vm12, %v4902_v25 }
0x33fc   :  { %8902 = vmatprep.mubr.msk.bf16.mxu0 %vm9538_vm2, %v9537_v2  ;;  %8901 = vmatpush3.bf16.msra.mxu0 %v5016_v51 }
0x33fd   :  { %8912 = vmatprep.subr.bf16.mxu0 %v9537_v2 }
0x34b3   :  { %v4833_v29 = vpop.f32.mrf.mxu0 }
0x34b4   :  { %v4839_v30 = vsel %vm2064_vm13, %v4833_v29, -inf }
0x34b5   :  { %4840 = vmax.xlane.f32.xlu0 %v4839_v30  ;;  %v8880_v31 = vpop.f32.mrf.mxu0 }
0x34b7   :  { %v4836_v33 = vpop.f32.mrf.mxu0 }
0x34b9   :  { %v8881_v61 = vpop.f32.mrf.mxu0 }
0x34bb   :  { %v4945_v53 = vpop.f32.mrf.mxu0 }
0x34bc   :  { %v4951_v55 = vsel %vm2064_vm13, %v4945_v53, -inf }
0x34bd   :  { %4952 = vmax.xlane.f32.xlu1 %v4951_v55  ;;  %v8892_v57 = vpop.f32.mrf.mxu0 }
0x34bf   :  { %v4948_v59 = vpop.f32.mrf.mxu0 }
0x34c1   :  { %v8893_v62 = vpop.f32.mrf.mxu0 }
0x34ce   :  { %4963 = vrot.lane.b32.xlu1 %v10925_v15, %s9545_s5  ;;  %s11709_s5 = smov 48  }
0x34d2   :  { %5104 = vrot.lane.b32.xlu1 %v10931_v19, %s9546_s1  ;;  %s11710_s1 = smov 104  }
0x353e   :  { %v4841_v56 = vpop.xlane.xlu0 %4840 }
0x353f   :  { %v4842_v47 = vsub.f32 %v4833_v29, %v4841_v56 }
0x3541   :  { %v4843_v36 = vmul.f32 1.442695, %v4842_v47 }
0x3543   :  { %9487 = vpow2.f32 %v4843_v36 }
0x3546   :  { %v4953_v10 = vpop.xlane.xlu1 %4952 }
0x3547   :  { %v4954_v40 = vsub.f32 %v4945_v53, %v4953_v10 }
0x3549   :  { %v4955_v21 = vmul.f32 1.442695, %v4954_v40 }
0x354a   :  { %v4964_v8 = vpop.permute.xlu1 %4963 }
0x354b   :  { %9489 = vpow2.f32 %v4955_v21  ;;  %v4969_v45 = vand.u32 %v4964_v8, %v10210_v11 }
0x354e   :  { %v5105_v26 = vpop.permute.xlu1 %5104 }
0x3550   :  { %v9488_v38 = vpop.eup %9487 }
0x3551   :  { %v4845_v42 = vsel %vm2064_vm13, %v9488_v38, 0.0 }
0x3552   :  { %4846 = vadd.xlane.f32.xlu0 %v4845_v42 }
0x3558   :  { %v9490_v43 = vpop.eup %9489 }
0x3559   :  { %v4957_v1 = vsel %vm2064_vm13, %v9490_v43, 0.0 }
0x355a   :  { %4958 = vadd.xlane.f32.xlu0 %v4957_v1 }
0x3570   :  { %4851 = vrot.lane.b32.xlu0 %v10925_v15, %s9541_s28 }
0x3574   :  { %5106 = vrot.lane.b32.xlu0 %v10925_v15, %s11708_s14 }
0x35db   :  { %v4847_v44 = vpop.xlane.xlu0 %4846 }
0x35dc   :  { %9491 = vrcp.f32 %v4847_v44 }
0x35e3   :  { %v4959_v32 = vpop.xlane.xlu0 %4958 }
0x35e4   :  { %9493 = vrcp.f32 %v4959_v32 }
0x35e7   :  { %v4852_v41 = vpop.permute.xlu0 %4851 }
0x35e8   :  { %v4857_v63 = vand.u32 %v4852_v41, %v10210_v11 }
0x35e9   :  { %v9492_v39 = vpop.eup %9491 }
0x35ea   :  { %8883 = vmatpush3.bf16.msra.mxu1 %v4857_v63  ;;  %v4849_v3 = vmul.f32 %v9492_v39, %v9488_v38 }
0x35eb   :  { %8894 = vmatprep.subr.bf16.mxu1 %v9537_v2  ;;  %v5107_v0 = vpop.permute.xlu0 %5106 }
0x35ec   :  { %v4850_v4 = vpack.c.bf16 %v4849_v3, %v4849_v3  ;;  %v5112_v9 = vsel %vm2017_vm12, %v5107_v0, 0  ;;  %v7867_v3 = vld [vmem:[%s11662_s15 + $0x18] sm:$0xf] }
0x35ee   :  { %8885 = vmatmul.mubr.msk.bf16.vlgmr.msra.gmra.mxu1 %vm2079_vm14, %v4850_v4  ;;  %v5219_v4 = vsel %vm991_vm7, %v7867_v3, 0  ;;  %v7887_v3 = vld [vmem:[%s11666_s19 + $0x100] sm:$0xff] }
0x35ef   :  { %8895 = vmatpush3.bf16.msra.mxu1 %v4969_v45  ;;  %8896 = vmatprep.mubr.msk.bf16.mxu1 %vm9538_vm2, %v9537_v2 }
0x35f0   :  { %8906 = vmatprep.subr.bf16.mxu1 %v9537_v2 }
0x35f1   :  { %v9494_v5 = vpop.eup %9493 }
0x35f2   :  { %v4961_v6 = vmul.f32 %v9494_v5, %v9490_v43 }
0x35f4   :  { %v4962_v24 = vpack.c.bf16 %v4961_v6, %v4961_v6 }
0x35f6   :  { %8897 = vmatmul.mubr.msk.bf16.vlgmr.msra.gmra.mxu1 %vm2079_vm14, %v4962_v24 }
0x35f7   :  { %8908 = vmatprep.mubr.msk.bf16.mxu1 %vm9538_vm2, %v9537_v2  ;;  %8907 = vmatpush3.bf16.msra.mxu1 %v5062_v7 }
0x35f8   :  { %8918 = vmatprep.subr.bf16.mxu1 %v9537_v2 }
0x36ae   :  { %v4893_v50 = vpop.f32.mrf.mxu1 }
0x36af   :  { %v4899_v37 = vpack.c.bf16 %v4893_v50, %v4893_v50 }
0x36b0   :  { %v8886_v54 = vpop.f32.mrf.mxu1 }
0x36b1   :  { %8909 = vmatmul.mubr.msk.bf16.vlgmr.msra.gmra.mxu1 %vm2017_vm12, %v4899_v37 }
0x36b2   :  { %v4896_v58 = vpop.f32.mrf.mxu1  ;;  %8920 = vmatprep.mubr.msk.bf16.mxu1 %vm9538_vm2, %v9537_v2 }
0x36b4   :  { %v8887_v60 = vpop.f32.mrf.mxu1 }
0x36b6   :  { %v5005_v12 = vpop.f32.mrf.mxu1 }
0x36b7   :  { %v5011_v16 = vpack.c.bf16 %v5005_v12, %v5005_v12 }
0x36b8   :  { %v8898_v17 = vpop.f32.mrf.mxu1 }
0x36b9   :  { %8903 = vmatmul.mubr.msk.bf16.vlgmr.msra.gmra.mxu0 %vm2017_vm12, %v5011_v16  ;;  %v7868_v17 = vld [vmem:[%s11662_s15 + $0x1c] sm:$0xf] }
0x36ba   :  { %8913 = vmatpush3.bf16.xpose.msra.mxu0 %v5112_v9  ;;  %v5008_v22 = vpop.f32.mrf.mxu1  ;;  %8914 = vmatprep.mubr.msk.bf16.mxu0 %vm9538_vm2, %v9537_v2 }
0x36bb   :  { %8924 = vmatprep.subr.bf16.mxu0 %v9537_v2  ;;  %v5377_v22 = vsel %vm991_vm7, %v7868_v17, 0 }
0x36bc   :  { %v8899_v23 = vpop.f32.mrf.mxu1 }
0x36c1   :  { %8915 = vmatmul.mubr.msk.bf16.vlgmr.msra.gmra.mxu0 %vm2017_vm12, %v5105_v26 }
0x36c2   :  { %8926 = vmatprep.mubr.msk.bf16.mxu0 %vm9538_vm2, %v9537_v2  ;;  %8925 = vmatpush3.bf16.msra.mxu0 %v5219_v4  ;;  %v7895_v4 = vld [vmem:[%s11666_s19 + $0x140] sm:$0xff] }
0x36c3   :  { %8936 = vmatprep.subr.bf16.mxu0 %v9537_v2 }
0x3771   :  { %v5098_v25 = vpop.f32.mrf.mxu1 }
0x3773   :  { %v8910_v29 = vpop.f32.mrf.mxu1 }
0x3775   :  { %v5101_v30 = vpop.f32.mrf.mxu1 }
0x3777   :  { %v8911_v31 = vpop.f32.mrf.mxu1 }
0x3779   :  { %v5052_v33 = vpop.f32.mrf.mxu0 }
0x377a   :  { %v10989_v61 = vadd.f32 %v5098_v25, %v5052_v33 }
0x377b   :  { %v8904_v53 = vpop.f32.mrf.mxu0 }
0x377d   :  { %v5055_v55 = vpop.f32.mrf.mxu0 }
0x377f   :  { %v8905_v57 = vpop.f32.mrf.mxu0 }
0x3781   :  { %v5148_v59 = vpop.f32.mrf.mxu0 }
0x3782   :  { %v5154_v62 = vsel %vm2064_vm13, %v5148_v59, -inf }
0x3783   :  { %5155 = vmax.xlane.f32.xlu0 %v5154_v62  ;;  %v8916_v56 = vpop.f32.mrf.mxu0 }
0x3785   :  { %v5151_v47 = vpop.f32.mrf.mxu0 }
0x3787   :  { %v8917_v36 = vpop.f32.mrf.mxu0 }
0x3799   :  { %5166 = vrot.lane.b32.xlu0 %v10925_v15, %s11709_s5 }
0x379d   :  { %5262 = vrot.lane.b32.xlu0 %v10931_v19, %s11710_s1  ;;  %s9552_s1 = smov [#allocation3]  }
0x380c   :  { %v5156_v10 = vpop.xlane.xlu0 %5155 }
0x380d   :  { %v5157_v40 = vsub.f32 %v5148_v59, %v5156_v10 }
0x380f   :  { %v5158_v21 = vmul.f32 1.442695, %v5157_v40 }
0x3810   :  { %v5167_v38 = vpop.permute.xlu0 %5166 }
0x3811   :  { %9495 = vpow2.f32 %v5158_v21  ;;  %v5172_v42 = vand.u32 %v5167_v38, %v10210_v11 }
0x3813   :  { %8919 = vmatpush3.bf16.msra.mxu1 %v5172_v42 }
0x3814   :  { %8930 = vmatprep.subr.bf16.mxu1 %v9537_v2  ;;  %v5263_v8 = vpop.permute.xlu0 %5262 }
0x381e   :  { %v9496_v43 = vpop.eup %9495 }
0x381f   :  { %v5160_v1 = vsel %vm2064_vm13, %v9496_v43, 0.0 }
0x3820   :  { %5161 = vadd.xlane.f32.xlu1 %v5160_v1 }
0x3831   :  { %5264 = vrot.lane.b32.xlu1 %v10925_v15, %s11711_s0 }
0x38a9   :  { %v5162_v44 = vpop.xlane.xlu1 %5161 }
0x38aa   :  { %9497 = vrcp.f32 %v5162_v44  ;;  %v7903_v44 = vld [vmem:[%s11666_s19 + $0x180] sm:$0xff] }
0x38ad   :  { %v5265_v41 = vpop.permute.xlu1 %5264 }
0x38ae   :  { %v5270_v39 = vsel %vm2017_vm12, %v5265_v41, 0  ;;  %v7912_v41 = vld [vmem:[%s11666_s19 + $0x1c8] sm:$0xff] }
0x38b7   :  { %v9498_v19 = vpop.eup %9497 }
0x38b8   :  { %v5164_v32 = vmul.f32 %v9498_v19, %v9496_v43  ;;  %v7911_v19 = vld [vmem:[%s11666_s19 + $0x1c0] sm:$0xff] }
0x38ba   :  { %v5165_v63 = vpack.c.bf16 %v5164_v32, %v5164_v32  ;;  %v7938_v32 = vcombine.high %v7903_v44, %v7911_v19 }
0x38bc   :  { %8921 = vmatmul.mubr.msk.bf16.vlgmr.msra.gmra.mxu1 %vm2079_vm14, %v5165_v63  ;;  %v7937_v63 = vcombine.low %v7903_v44, %v7911_v19  ;;  %v7899_v44 = vld [vmem:[%s11666_s19 + $0x160] sm:$0xff]  ;;  %v7892_v19 = vld [vmem:[%s11666_s19 + $0x128] sm:$0xff] }
0x38bd   :  { %8931 = vmatpush3.bf16.xpose.msra.mxu1 %v5270_v39  ;;  %8932 = vmatprep.mubr.msk.bf16.mxu1 %vm9538_vm2, %v9537_v2 }
0x38be   :  { %8942 = vmatprep.subr.bf16.mxu1 %v9537_v2 }
0x38c4   :  { %8933 = vmatmul.mubr.msk.bf16.vlgmr.msra.gmra.mxu1 %vm2017_vm12, %v5263_v8 }
0x38c5   :  { %8944 = vmatprep.mubr.msk.bf16.mxu1 %vm9538_vm2, %v9537_v2  ;;  %8943 = vmatpush3.bf16.msra.mxu1 %v5377_v22 }
0x397c   :  { %v5208_v45 = vpop.f32.mrf.mxu1 }
0x397d   :  { %v5214_v5 = vpack.c.bf16 %v5208_v45, %v5208_v45  ;;  %v7888_v45 = vld [vmem:[%s11666_s19 + $0x108] sm:$0xff] }
0x397e   :  { %v8922_v6 = vpop.f32.mrf.mxu1 }
0x397f   :  { %8927 = vmatmul.mubr.msk.bf16.vlgmr.msra.gmra.mxu0 %vm2017_vm12, %v5214_v5  ;;  %v7922_v5 = vcombine.high %v7887_v3, %v7895_v4  ;;  %v7896_v6 = vld [vmem:[%s11666_s19 + $0x148] sm:$0xff] }
0x3980   :  { %v5211_v24 = vpop.f32.mrf.mxu1  ;;  %8938 = vmatprep.mubr.msk.bf16.mxu0 %vm9538_vm2, %v9537_v2 }
0x3981   :  { %v7921_v24 = vcombine.low %v7887_v3, %v7895_v4  ;;  %v7917_v3 = vld [vmem:[%s11666_s19 + $0x1f0] sm:$0xff]  ;;  %v7910_v4 = vld [vmem:[%s11666_s19 + $0x1b8] sm:$0xff] }
0x3982   :  { %v8923_v28 = vpop.f32.mrf.mxu1 }
0x3983   :  { %v7923_v28 = vcombine.low %v7888_v45, %v7896_v6 }
0x3984   :  { %v5306_v7 = vpop.f32.mrf.mxu1 }
0x3985   :  { %v5312_v49 = vsel %vm2064_vm13, %v5306_v7, -inf }
0x3986   :  { %5313 = vmax.xlane.f32.xlu1 %v5312_v49  ;;  %v8934_v51 = vpop.f32.mrf.mxu1  ;;  %v7905_v49 = vld [vmem:[%s11666_s19 + $0x190] sm:$0xff] }
0x3987   :  { %v7913_v51 = vld [vmem:[%s11666_s19 + $0x1d0] sm:$0xff] }
0x3988   :  { %v5309_v50 = vpop.f32.mrf.mxu1 }
0x3989   :  { %v7906_v50 = vld [vmem:[%s11666_s19 + $0x198] sm:$0xff] }
0x398a   :  { %v8935_v37 = vpop.f32.mrf.mxu1 }
0x398b   :  { %v7941_v37 = vcombine.low %v7905_v49, %v7913_v51 }
0x3a0f   :  { %v5314_v54 = vpop.xlane.xlu1 %5313 }
0x3a10   :  { %v5315_v58 = vsub.f32 %v5306_v7, %v5314_v54  ;;  %v7924_v7 = vcombine.high %v7888_v45, %v7896_v6  ;;  %v7942_v54 = vcombine.high %v7905_v49, %v7913_v51  ;;  %v7918_v45 = vld [vmem:[%s11666_s19 + $0x1f8] sm:$0xff]  ;;  %v7901_v49 = vld [vmem:[%s11666_s19 + $0x170] sm:$0xff] }
0x3a11   :  { %v7894_v51 = vld [vmem:[%s11666_s19 + $0x138] sm:$0xff] }
0x3a12   :  { %v5316_v60 = vmul.f32 1.442695, %v5315_v58  ;;  %v7914_v58 = vld [vmem:[%s11666_s19 + $0x1d8] sm:$0xff] }
0x3a14   :  { %9499 = vpow2.f32 %v5316_v60  ;;  %v7943_v60 = vcombine.low %v7906_v50, %v7914_v58 }
0x3a21   :  { %v9500_v0 = vpop.eup %9499 }
0x3a22   :  { %v5318_v12 = vsel %vm2064_vm13, %v9500_v0, 0.0 }
0x3a23   :  { %5319 = vadd.xlane.f32.xlu0 %v5318_v12 }
0x3a39   :  { %5324 = vrot.lane.b32.xlu0 %v10925_v15, %s11712_s8 }
0x3a3f   :  { %v5255_v16 = vpop.f32.mrf.mxu0 }
0x3a40   :  { %v5261_v9 = vadd.f32 %v5255_v16, %v10989_v61 }
0x3a41   :  { %v8928_v23 = vpop.f32.mrf.mxu0 }
0x3a43   :  { %v5258_v26 = vpop.f32.mrf.mxu0 }
0x3a45   :  { %v8929_v25 = vpop.f32.mrf.mxu0 }
0x3aac   :  { %v5320_v29 = vpop.xlane.xlu0 %5319 }
0x3aad   :  { %9501 = vrcp.f32 %v5320_v29 }
0x3ab0   :  { %v5325_v30 = vpop.permute.xlu0 %5324 }
0x3ab1   :  { %v5330_v31 = vand.u32 %v5325_v30, %v10210_v11  ;;  %v7882_v11 = vld [vmem:[%s11663_s16 + $0x1] ss:$0 sm:$0xff] }
0x3ab2   :  { %v7885_v30 = vld [vmem:[%s11664_s17 + $0x1] ss:$0 sm:$0xff] }
0x3ab3   :  { %8937 = vmatpush3.bf16.msra.mxu0 %v5330_v31 }
0x3ab4   :  { %5757 = vmatprep.subr.bf16.mxu0 %v7938_v32 }
0x3aba   :  { %v9502_v15 = vpop.eup %9501 }
0x3abb   :  { %v5322_v33 = vmul.f32 %v9502_v15, %v9500_v0  ;;  %v7944_v0 = vcombine.high %v7906_v50, %v7914_v58  ;;  %v7886_v15 = vld [vmem:[%s11665_s18 + $0x1] ss:$0 sm:$0xff]  ;;  %v7902_v50 = vld [vmem:[%s11666_s19 + $0x178] sm:$0xff] }
0x3abd   :  { %v5323_v53 = vpack.c.bf16 %v5322_v33, %v5322_v33 }
0x3abf   :  { %8939 = vmatmul.mubr.msk.bf16.vlgmr.msra.gmra.mxu0 %vm2079_vm14, %v5323_v53  ;;  %v7889_v53 = vld [vmem:[%s11666_s19 + $0x110] sm:$0xff] }
0x3ac0   :  { %5777 = vmatprep.mubr.bf16.mxu0 %v9540_v18  ;;  %5758 = vmatpush1.bf16.msra.mxu0 %v7937_v63 }
0x3ac1   :  { %5759 = vmatprep.subr.bf16.mxu0 %v7922_v5 }
0x3ac4   :  { %5760 = vmatpush1.bf16.msra.mxu0 %v7921_v24 }
0x3ac5   :  { %5839 = vmatprep.subr.bf16.mxu0 %v7942_v54  ;;  %v7951_v54 = vcombine.low %v7910_v4, %v7918_v45 }
0x3b7f   :  { %v5366_v61 = vpop.f32.mrf.mxu0 }
0x3b80   :  { %v5372_v55 = vpack.c.bf16 %v5366_v61, %v5366_v61  ;;  %v7897_v61 = vld [vmem:[%s11666_s19 + $0x150] sm:$0xff] }
0x3b81   :  { %v8940_v57 = vpop.f32.mrf.mxu0 }
0x3b82   :  { %8945 = vmatmul.mubr.msk.bf16.vlgmr.msra.gmra.mxu1 %vm2017_vm12, %v5372_v55  ;;  %v7890_v55 = vld [vmem:[%s11666_s19 + $0x118] sm:$0xff] }
0x3b83   :  { %v5369_v59 = vpop.f32.mrf.mxu0  ;;  %5818 = vmatprep.mubr.bf16.mxu1 %v9540_v18  ;;  %v7898_v57 = vld [vmem:[%s11666_s19 + $0x158] sm:$0xff] }
0x3b85   :  { %v8941_v62 = vpop.f32.mrf.mxu0 }
0x3c42   :  { %v5413_v56 = vpop.f32.mrf.mxu1 }
0x3c43   :  { %v5419_v47 = vadd.f32 %v5413_v56, %v5261_v9  ;;  %v7926_v56 = vcombine.high %v7889_v53, %v7897_v61 }
0x3c44   :  { %v8946_v36 = vpop.f32.mrf.mxu1 }
0x3c45   :  { %v5428_v10 = vadd.f32 %v7882_v11, %v5419_v47  ;;  %v7928_v11 = vcombine.high %v7890_v55, %v7898_v57  ;;  %v7907_v47 = vld [vmem:[%s11666_s19 + $0x1a0] sm:$0xff] }
0x3c46   :  { %v5416_v40 = vpop.f32.mrf.mxu1  ;;  %v7915_v36 = vld [vmem:[%s11666_s19 + $0x1e0] sm:$0xff] }
0x3c47   :  { %v5429_v21 = vadd.f32 %v5428_v10, %v10915_v34  ;;  %v7904_v34 = vld [vmem:[%s11666_s19 + $0x188] sm:$0xff]  ;;  %v7945_v32 = vcombine.low %v7907_v47, %v7915_v36 }
0x3c48   :  { %v8947_v38 = vpop.f32.mrf.mxu1  ;;  %v7939_v39 = vcombine.low %v7904_v34, %v7912_v41  ;;  %v7940_v8 = vcombine.high %v7904_v34, %v7912_v41  ;;  %v7908_v10 = vld [vmem:[%s11666_s19 + $0x1a8] sm:$0xff] }
0x3c49   :  { %v5434_v42 = vsel %vm2660_vm15, %v5429_v21, 0.0  ;;  %v5437_v43 = vmul.f32 %v5429_v21, %v5429_v21  ;;  %v7916_v40 = vld [vmem:[%s11666_s19 + $0x1e8] sm:$0xff]  ;;  %v7927_v38 = vcombine.low %v7890_v55, %v7898_v57  ;;  %v9160_v55 = vld [vmem:[%s11668_s21 + $0x4a0] sm:$0xff]   ;;  %v9161_v57 = vld [vmem:[%s11668_s21 + $0x458] sm:$0xff]  }
0x3c4a   :  { %5435 = vadd.xlane.f32.xlu1 %v5434_v42  ;;  %5798 = vmatprep.subr.bf16.mxu1 %v7940_v8  ;;  %v7946_v42 = vcombine.high %v7907_v47, %v7915_v36  ;;  %v7900_v34 = vld [vmem:[%s11666_s19 + $0x168] sm:$0xff]  ;;  %v7947_v41 = vcombine.low %v7908_v10, %v7916_v40  ;;  %v7909_v8 = vld [vmem:[%s11666_s19 + $0x1b0] sm:$0xff] }
0x3c4b   :  { %v5438_v1 = vsel %vm2660_vm15, %v5437_v43, 0.0  ;;  %5799 = vmatpush1.bf16.msra.mxu1 %v7939_v39  ;;  %v7948_v43 = vcombine.high %v7908_v10, %v7916_v40  ;;  %v7932_v39 = vcombine.high %v7892_v19, %v7900_v34  ;;  %v7931_v6 = vcombine.low %v7892_v19, %v7900_v34  ;;  %v9165_v47 = vld [vmem:[%s11668_s21 + $0x450] sm:$0xff]   ;;  %v9175_v19 = vld [vmem:[%s11668_s21 + $0x400] sm:$0xff]  }
0x3c4c   :  { %5800 = vmatprep.subr.bf16.mxu1 %v7924_v7  ;;  %v7950_v24 = vcombine.high %v7909_v8, %v7917_v3  ;;  %v7893_v7 = vld [vmem:[%s11666_s19 + $0x130] sm:$0xff]  ;;  %v9176_v34 = vld [vmem:[%s11668_s21 + $0x480] sm:$0xff]  }
0x3c4d   :  { %v7934_v58 = vcombine.high %v7893_v7, %v7901_v49  ;;  %v9166_v36 = vld [vmem:[%s11668_s21 + $0x4d0] sm:$0xff]  }
0x3c4e   :  { %5439 = vadd.xlane.f32.xlu1 %v5438_v1  ;;  %v7891_v1 = vld [vmem:[%s11666_s19 + $0x120] sm:$0xff]  ;;  %v9167_v10 = vld [vmem:[%s11668_s21 + $0x410] sm:$0xff]  }
0x3c4f   :  { %5801 = vmatpush1.bf16.msra.mxu1 %v7923_v28  ;;  %v7930_v63 = vcombine.high %v7891_v1, %v7899_v44  ;;  %v7929_v5 = vcombine.low %v7891_v1, %v7899_v44  ;;  %v7952_v28 = vcombine.high %v7910_v4, %v7918_v45  ;;  %v9168_v40 = vld [vmem:[%s11668_s21 + $0x490] sm:$0xff]   ;;  %v9173_v1 = vld [vmem:[%s11668_s21 + $0x440] sm:$0xff]  }
0x3c50   :  { %5880 = vmatprep.subr.bf16.mxu1 %v7944_v0  ;;  %v7933_v0 = vcombine.low %v7893_v7, %v7901_v49  ;;  %v9174_v44 = vld [vmem:[%s11668_s21 + $0x4c0] sm:$0xff]  }
0x3cd3   :  { %v5436_v12 = vpop.xlane.xlu1 %5435 }
0x3cd4   :  { %v5441_v16 = vmul.f32 0.03125, %v5436_v12  ;;  %v7935_v12 = vcombine.low %v7894_v51, %v7902_v50 }
0x3cd6   :  { %v5443_v9 = vmul.f32 %v5441_v16, %v5441_v16  ;;  %v5445_v25 = vsub.f32 %v5429_v21, %v5441_v16  ;;  %v7925_v21 = vcombine.low %v7889_v53, %v7897_v61  ;;  %v9145_v16 = vld [vmem:[%s11668_s21 + $0x478] sm:$0xff]   ;;  %v9158_v53 = vld [vmem:[%s11668_s21 + $0x4e0] sm:$0xff]  }
0x3cd7   :  { %v5440_v17 = vpop.xlane.xlu1 %5439  ;;  %v9159_v61 = vld [vmem:[%s11668_s21 + $0x420] sm:$0xff]  }
0x3cd8   :  { %v5442_v22 = vmul.f32 0.03125, %v5440_v17  ;;  %v9146_v17 = vld [vmem:[%s11668_s21 + $0x4f8] sm:$0xff]  }
0x3cda   :  { %v5444_v23 = vsub.f32 %v5442_v22, %v5443_v9  ;;  %v9147_v9 = vld [vmem:[%s11668_s21 + $0x438] sm:$0xff]  }
0x3cdb   :  { %v9148_v22 = vld [vmem:[%s11668_s21 + $0x4b8] sm:$0xff]  }
0x3cdc   :  { %v5446_v26 = vadd.f32 1e-05, %v5444_v23  ;;  %v9149_v23 = vld [vmem:[%s11668_s21 + $0x470] sm:$0xff]  }
0x3cde   :  { %9503 = vrsqrt.f32 %v5446_v26  ;;  %v9151_v26 = vld [vmem:[%s11668_s21 + $0x430] sm:$0xff]  }
0x3ceb   :  { %v9504_v29 = vpop.eup %9503 }
0x3cec   :  { %v5448_v31 = vmul.f32 %v9504_v29, %v5445_v25  ;;  %v9152_v25 = vld [vmem:[%s11668_s21 + $0x4b0] sm:$0xff]   ;;  %v9153_v29 = vld [vmem:[%s11668_s21 + $0x468] sm:$0xff]  }
0x3cee   :  { %v5455_v33 = vmul.f32 %v7885_v30, %v5448_v31  ;;  %v9154_v30 = vld [vmem:[%s11668_s21 + $0x4e8] sm:$0xff]  }
0x3cef   :  { %v9155_v31 = vld [vmem:[%s11668_s21 + $0x428] sm:$0xff]  }
0x3cf0   :  { %v11091_v59 = vadd.f32 %v7886_v15, %v5455_v33  ;;  %v9156_v15 = vld [vmem:[%s11668_s21 + $0x4a8] sm:$0xff]   ;;  %v9157_v33 = vld [vmem:[%s11668_s21 + $0x460] sm:$0xff]  }
0x3cf2   :  { %v11095_v62 = vpack.c.bf16 %v11091_v59, %v11091_v59 }
0x3cf4   :  { %7953 = vmatmul.mubr.msk.bf16.vlgmr.msra.gmra.mxu0 %vm1963_vm11, %v11095_v62  ;;  %7954 = vmatmul.mubr.msk.bf16.vlgmr.msra.gmra.mxu1 %vm1963_vm11, %v11095_v62 }
0x3cf5   :  { %5840 = vmatpush1.bf16.msra.mxu0 %v7941_v37  ;;  %5881 = vmatpush1.bf16.msra.mxu1 %v7943_v60  ;;  %v7949_v37 = vcombine.low %v7909_v8, %v7917_v3  ;;  %v7936_v60 = vcombine.high %v7894_v51, %v7902_v50 }
0x3cf6   :  { %5841 = vmatprep.subr.bf16.mxu0 %v7926_v56  ;;  %5882 = vmatprep.subr.bf16.mxu1 %v7928_v11  ;;  %v9163_v56 = vld [vmem:[%s11668_s21 + $0x418] sm:$0xff]  }
0x3cf7   :  { %5859 = vmatprep.mubr.bf16.mxu0 %v9540_v18  ;;  %5900 = vmatprep.mubr.bf16.mxu1 %v9540_v18  ;;  %v9164_v11 = vld [vmem:[%s11668_s21 + $0x498] sm:$0xff]  }
0x3cf9   :  { %5842 = vmatpush1.bf16.msra.mxu0 %v7925_v21  ;;  %5883 = vmatpush1.bf16.msra.mxu1 %v7927_v38  ;;  %v9169_v21 = vld [vmem:[%s11668_s21 + $0x448] sm:$0xff]  }
0x3cfa   :  { %5921 = vmatprep.subr.bf16.mxu0 %v7946_v42  ;;  %5962 = vmatprep.subr.bf16.mxu1 %v7948_v43  ;;  %v9170_v38 = vld [vmem:[%s11668_s21 + $0x4c8] sm:$0xff]  }
0x3cfb   :  { %v9171_v42 = vld [vmem:[%s11668_s21 + $0x408] sm:$0xff]  }
0x3cfc   :  { %7955 = vmatmul.mubr.msk.bf16.vlgmr.msra.gmra.mxu0 %vm1963_vm11, %v11095_v62  ;;  %7956 = vmatmul.mubr.msk.bf16.vlgmr.msra.gmra.mxu1 %vm1963_vm11, %v11095_v62  ;;  %v9172_v43 = vld [vmem:[%s11668_s21 + $0x488] sm:$0xff]  }
0x3cfd   :  { %5922 = vmatpush1.bf16.msra.mxu0 %v7945_v32  ;;  %5963 = vmatpush1.bf16.msra.mxu1 %v7947_v41  ;;  %v9177_v32 = vld [vmem:[%s11668_s21 + $0x578] sm:$0xff]  }
0x3cfe   :  { %5923 = vmatprep.subr.bf16.mxu0 %v7930_v63  ;;  %5964 = vmatprep.subr.bf16.mxu1 %v7932_v39  ;;  %v9178_v41 = vld [vmem:[%s11668_s21 + $0x5f8] sm:$0xff]   ;;  %v11272_v63 = vld [vmem:[%s11667_s20 + $0x10] sm:$0xff] }
0x3cff   :  { %5941 = vmatprep.mubr.bf16.mxu0 %v9540_v18  ;;  %5982 = vmatprep.mubr.bf16.mxu1 %v9540_v18  ;;  %v5505_v39 = vrot.slane %v11272_v63, %v9751_v27  ;;  %v5513_v8 = vrot.slane %v11272_v63, %v10524_v46  ;;  %v5509_v3 = vrot.slane %v11272_v63, %v9760_v35 }
0x3d00   :  { %v5517_v4 = vrot.slane %v11272_v63, %v10532_v48 }
0x3d01   :  { %5924 = vmatpush1.bf16.msra.mxu0 %v7929_v5  ;;  %5965 = vmatpush1.bf16.msra.mxu1 %v7931_v6 }
0x3d02   :  { %6003 = vmatprep.subr.bf16.mxu0 %v7950_v24  ;;  %6044 = vmatprep.subr.bf16.mxu1 %v7952_v28 }
0x3d04   :  { %7957 = vmatmul.mubr.msk.bf16.vlgmr.msra.gmra.mxu0 %vm1963_vm11, %v11095_v62  ;;  %7958 = vmatmul.mubr.msk.bf16.vlgmr.msra.gmra.mxu1 %vm1963_vm11, %v11095_v62 }
0x3d05   :  { %6004 = vmatpush1.bf16.msra.mxu0 %v7949_v37  ;;  %6045 = vmatpush1.bf16.msra.mxu1 %v7951_v54 }
0x3d06   :  { %6005 = vmatprep.subr.bf16.mxu0 %v7934_v58  ;;  %6046 = vmatprep.subr.bf16.mxu1 %v7936_v60 }
0x3d07   :  { %6023 = vmatprep.mubr.bf16.mxu0 %v9540_v18  ;;  %6064 = vmatprep.mubr.bf16.mxu1 %v9540_v18  ;;  %v9150_v18 = vld [vmem:[%s11668_s21 + $0x4f0] sm:$0xff]  }
0x3d09   :  { %6006 = vmatpush1.bf16.msra.mxu0 %v7933_v0  ;;  %6047 = vmatpush1.bf16.msra.mxu1 %v7935_v12 }
0x3d0a   :  { %8591 = vmatprep.subr.bf16.mxu0 %v9145_v16  ;;  %8613 = vmatprep.subr.bf16.mxu1 %v9146_v17 }
0x3d0c   :  { %7959 = vmatmul.mubr.msk.bf16.vlgmr.msra.gmra.mxu0 %vm1963_vm11, %v11095_v62  ;;  %7960 = vmatmul.mubr.msk.bf16.vlgmr.msra.gmra.mxu1 %vm1963_vm11, %v11095_v62  ;;  %v9162_v62 = vld [vmem:[%s11668_s21 + $0x4d8] sm:$0xff]  }
0x3d0d   :  { %8592 = vmatpush3.bf16.msra.mxu0 %v9147_v9  ;;  %8614 = vmatpush3.bf16.msra.mxu1 %v9148_v22  ;;  %v5525_v22 = vrot.slane %v11272_v63, %v10543_v13 }
0x3d0e   :  { %8593 = vmatprep.subr.bf16.mxu0 %v9149_v23  ;;  %8615 = vmatprep.subr.bf16.mxu1 %v9150_v18  ;;  %v5533_v23 = vrot.slane %v11272_v63, %v10546_v14  ;;  %v9179_v18 = vld [vmem:[%s11668_s21 + $0x538] sm:$0xff]  }
0x3d11   :  { %8594 = vmatpush3.bf16.msra.mxu0 %v9151_v26  ;;  %8616 = vmatpush3.bf16.msra.mxu1 %v9152_v25  ;;  %v9180_v26 = vld [vmem:[%s11668_s21 + $0x5b8] sm:$0xff]  }
0x3d12   :  { %8595 = vmatprep.subr.bf16.mxu0 %v9153_v29  ;;  %8617 = vmatprep.subr.bf16.mxu1 %v9154_v30 }
0x3d15   :  { %8596 = vmatpush3.bf16.msra.mxu0 %v9155_v31  ;;  %8618 = vmatpush3.bf16.msra.mxu1 %v9156_v15  ;;  %v9181_v15 = vld [vmem:[%s11668_s21 + $0x570] sm:$0xff]  }
0x3d16   :  { %8597 = vmatprep.subr.bf16.mxu0 %v9157_v33  ;;  %8619 = vmatprep.subr.bf16.mxu1 %v9158_v53  ;;  %v9182_v33 = vld [vmem:[%s11668_s21 + $0x5f0] sm:$0xff]  }
0x3d19   :  { %8598 = vmatpush3.bf16.msra.mxu0 %v9159_v61  ;;  %8620 = vmatpush3.bf16.msra.mxu1 %v9160_v55 }
0x3d1a   :  { %8599 = vmatprep.subr.bf16.mxu0 %v9161_v57  ;;  %8621 = vmatprep.subr.bf16.mxu1 %v9162_v62  ;;  %v9183_v62 = vld [vmem:[%s11668_s21 + $0x530] sm:$0xff]  }
0x3d1d   :  { %8600 = vmatpush3.bf16.msra.mxu0 %v9163_v56  ;;  %8622 = vmatpush3.bf16.msra.mxu1 %v9164_v11  ;;  %v9184_v56 = vld [vmem:[%s11668_s21 + $0x5b0] sm:$0xff]  }
0x3d1e   :  { %8601 = vmatprep.subr.bf16.mxu0 %v9165_v47  ;;  %8623 = vmatprep.subr.bf16.mxu1 %v9166_v36  ;;  %v9185_v36 = vld [vmem:[%s11668_s21 + $0x568] sm:$0xff]  }
0x3d21   :  { %8602 = vmatpush3.bf16.msra.mxu0 %v9167_v10  ;;  %8624 = vmatpush3.bf16.msra.mxu1 %v9168_v40  ;;  %v9186_v10 = vld [vmem:[%s11668_s21 + $0x5e8] sm:$0xff]  }
0x3d22   :  { %8603 = vmatprep.subr.bf16.mxu0 %v9169_v21  ;;  %8625 = vmatprep.subr.bf16.mxu1 %v9170_v38 }
0x3d25   :  { %8604 = vmatpush3.bf16.msra.mxu0 %v9171_v42  ;;  %8626 = vmatpush3.bf16.msra.mxu1 %v9172_v43 }
0x3d26   :  { %8605 = vmatprep.subr.bf16.mxu0 %v9173_v1  ;;  %8627 = vmatprep.subr.bf16.mxu1 %v9174_v44  ;;  %v9187_v44 = vld [vmem:[%s11668_s21 + $0x528] sm:$0xff]  }
0x3d29   :  { %8606 = vmatpush3.bf16.msra.mxu0 %v9175_v19  ;;  %8628 = vmatpush3.bf16.msra.mxu1 %v9176_v34  ;;  %v9188_v19 = vld [vmem:[%s11668_s21 + $0x5a8] sm:$0xff]  }
0x3d2a   :  { %8635 = vmatprep.subr.bf16.mxu0 %v9177_v32  ;;  %8657 = vmatprep.subr.bf16.mxu1 %v9178_v41  ;;  %v9189_v41 = vld [vmem:[%s11668_s21 + $0x560] sm:$0xff]  }
0x3db4   :  { %v5779_v45 = vpop.f32.mrf.mxu0  ;;  %v5820_v5 = vpop.f32.mrf.mxu1 }
0x3db5   :  { %v5780_v6 = vadd.f32 %v5779_v45, %v5505_v39  ;;  %v5821_v24 = vadd.f32 %v5820_v5, %v5513_v8  ;;  %v9190_v39 = vld [vmem:[%s11668_s21 + $0x5e0] sm:$0xff]   ;;  %v11339_v5 = vld [vmem:[%s11667_s20 + $0x18] sm:$0xff] }
0x3db6   :  { %v5781_v28 = vpop.f32.mrf.mxu0  ;;  %v5822_v7 = vpop.f32.mrf.mxu1  ;;  %v9192_v45 = vld [vmem:[%s11668_s21 + $0x5a0] sm:$0xff]  }
0x3db7   :  { %v5782_v49 = vadd.f32 %v5781_v28, %v5509_v3  ;;  %v5823_v51 = vadd.f32 %v5822_v7, %v5517_v4  ;;  %v6073_v50 = vmax.f32 %v5780_v6, 0.0  ;;  %v6075_v37 = vmax.f32 %v5821_v24, 0.0  ;;  %v9191_v4 = vld [vmem:[%s11668_s21 + $0x520] sm:$0xff]   ;;  %v9193_v28 = vld [vmem:[%s11668_s21 + $0x558] sm:$0xff]  }
0x3db8   :  { %v5783_v54 = vpop.f32.mrf.mxu0  ;;  %v5824_v58 = vpop.f32.mrf.mxu1  ;;  %v9194_v7 = vld [vmem:[%s11668_s21 + $0x5d8] sm:$0xff]  }
0x3db9   :  { %v6074_v60 = vmax.f32 %v5782_v49, 0.0  ;;  %v6076_v0 = vmax.f32 %v5823_v51, 0.0  ;;  %v6346_v25 = vpack.c.bf16 %v6073_v50, %v6073_v50  ;;  %v6348_v29 = vpack.c.bf16 %v6075_v37, %v6075_v37  ;;  %v9195_v37 = vld [vmem:[%s11668_s21 + $0x518] sm:$0xff]  }
0x3dba   :  { %v5784_v12 = vpop.f32.mrf.mxu0  ;;  %v5825_v16 = vpop.f32.mrf.mxu1  ;;  %v5561_v49 = vrot.slane %v11339_v5, %v10597_v52  ;;  %v9196_v54 = vld [vmem:[%s11668_s21 + $0x598] sm:$0xff]  }
0x3dbb   :  { %v6347_v17 = vpack.c.bf16 %v6074_v60, %v6074_v60  ;;  %v6349_v9 = vpack.c.bf16 %v6076_v0, %v6076_v0  ;;  %v9197_v0 = vld [vmem:[%s11668_s21 + $0x550] sm:$0xff]  }
0x3dbc   :  { %v11292_v30 = vpop.f32.mrf.mxu0  ;;  %v11294_v31 = vpop.f32.mrf.mxu1  ;;  %v9198_v12 = vld [vmem:[%s11668_s21 + $0x5d0] sm:$0xff]  }
0x3dbd   :  { %7170 = vmatprep.mubr.bf16.mxu0 %v6347_v17  ;;  %7210 = vmatprep.mubr.bf16.mxu1 %v6349_v9 }
0x3dbe   :  { %v5863_v53 = vpop.f32.mrf.mxu0  ;;  %v5904_v61 = vpop.f32.mrf.mxu1  ;;  %7171 = vmatmul.mubr.bf16.vlgmr.msra.gmra.mxu0 %v6346_v25  ;;  %7211 = vmatmul.mubr.bf16.vlgmr.msra.gmra.mxu1 %v6348_v29 }
0x3dbf   :  { %v5864_v55 = vadd.f32 %v5863_v53, %v5525_v22  ;;  %v5905_v57 = vadd.f32 %v5904_v61, %v5533_v23  ;;  %8636 = vmatpush3.bf16.msra.mxu0 %v9179_v18  ;;  %8658 = vmatpush3.bf16.msra.mxu1 %v9180_v26  ;;  %v9199_v22 = vld [vmem:[%s11668_s21 + $0x510] sm:$0xff]   ;;  %v5521_v18 = vrot.slane %v11272_v63, %v10625_v20 }
0x3dc0   :  { %v5865_v11 = vpop.f32.mrf.mxu0  ;;  %v5906_v47 = vpop.f32.mrf.mxu1  ;;  %8637 = vmatprep.subr.bf16.mxu0 %v9181_v15  ;;  %8659 = vmatprep.subr.bf16.mxu1 %v9182_v33  ;;  %v9200_v23 = vld [vmem:[%s11668_s21 + $0x590] sm:$0xff]   ;;  %v5529_v26 = vrot.slane %v11272_v63, %v10597_v52  ;;  %v9201_v15 = vld [vmem:[%s11668_s21 + $0x548] sm:$0xff]   ;;  %v5541_v53 = vrot.slane %v11339_v5, %v9760_v35  ;;  %v5549_v61 = vrot.slane %v11339_v5, %v10532_v48  ;;  %v9205_v35 = vld [vmem:[%s11668_s21 + $0x540] sm:$0xff]  }
0x3dc1   :  { %v6078_v40 = vmax.f32 %v5864_v55, 0.0  ;;  %v6080_v21 = vmax.f32 %v5905_v57, 0.0  ;;  %v9202_v33 = vld [vmem:[%s11668_s21 + $0x5c8] sm:$0xff]   ;;  %v9206_v48 = vld [vmem:[%s11668_s21 + $0x5c0] sm:$0xff]  }
0x3dc2   :  { %v5866_v38 = vpop.f32.mrf.mxu0  ;;  %v5907_v42 = vpop.f32.mrf.mxu1  ;;  %v9203_v63 = vld [vmem:[%s11668_s21 + $0x508] sm:$0xff]  }
0x3dc3   :  { %v6351_v43 = vpack.c.bf16 %v6078_v40, %v6078_v40  ;;  %v6353_v1 = vpack.c.bf16 %v6080_v21, %v6080_v21  ;;  %8638 = vmatpush3.bf16.msra.mxu0 %v9183_v62  ;;  %8660 = vmatpush3.bf16.msra.mxu1 %v9184_v56  ;;  %v9204_v57 = vld [vmem:[%s11668_s21 + $0x588] sm:$0xff]   ;;  %v5862_v62 = vadd.f32 %v11292_v30, %v5521_v18  ;;  %v9207_v30 = vld [vmem:[%s11668_s21 + $0x500] sm:$0xff]   ;;  %v9209_v40 = vld [vmem:[%s11668_s21 + $0x678] sm:$0xff]  }
0x3dc4   :  { %v11320_v34 = vpop.f32.mrf.mxu0  ;;  %v11322_v32 = vpop.f32.mrf.mxu1  ;;  %8639 = vmatprep.subr.bf16.mxu0 %v9185_v36  ;;  %8661 = vmatprep.subr.bf16.mxu1 %v9186_v10  ;;  %v5903_v56 = vadd.f32 %v11294_v31, %v5529_v26  ;;  %v9208_v31 = vld [vmem:[%s11668_s21 + $0x580] sm:$0xff]   ;;  %v9210_v21 = vld [vmem:[%s11668_s21 + $0x6f8] sm:$0xff]   ;;  %v9231_v18 = vld [vmem:[%s11668_s21 + $0x610] sm:$0xff]   ;;  %v5537_v26 = vrot.slane %v11339_v5, %v9751_v27  ;;  %v5557_v27 = vrot.slane %v11339_v5, %v10543_v13 }
0x3dc5   :  { %7250 = vmatprep.mubr.bf16.mxu0 %v6351_v43  ;;  %7290 = vmatprep.mubr.bf16.mxu1 %v6353_v1  ;;  %v6077_v36 = vmax.f32 %v5862_v62, 0.0  ;;  %v9211_v43 = vld [vmem:[%s11668_s21 + $0x638] sm:$0xff]   ;;  %v9237_v13 = vld [vmem:[%s11668_s21 + $0x640] sm:$0xff]  }
0x3dc6   :  { %v5945_v8 = vpop.f32.mrf.mxu0  ;;  %v5986_v3 = vpop.f32.mrf.mxu1  ;;  %v6079_v10 = vmax.f32 %v5903_v56, 0.0  ;;  %v9241_v56 = vld [vmem:[%s11668_s21 + $0x778] sm:$0xff]  }
0x3dc7   :  { %8640 = vmatpush3.bf16.msra.mxu0 %v9187_v44  ;;  %8662 = vmatpush3.bf16.msra.mxu1 %v9188_v19  ;;  %v5946_v11 = vadd.f32 %v5945_v8, %v5541_v53  ;;  %v5987_v47 = vadd.f32 %v5986_v3, %v5549_v61  ;;  %v6350_v1 = vpack.c.bf16 %v6077_v36, %v6077_v36  ;;  %v9212_v19 = vld [vmem:[%s11668_s21 + $0x6b8] sm:$0xff]   ;;  %v9214_v8 = vld [vmem:[%s11668_s21 + $0x6f0] sm:$0xff]   ;;  %v9235_v61 = vld [vmem:[%s11668_s21 + $0x608] sm:$0xff]  }
0x3dc8   :  { %v5947_v6 = vpop.f32.mrf.mxu0  ;;  %v5988_v24 = vpop.f32.mrf.mxu1  ;;  %8641 = vmatprep.subr.bf16.mxu0 %v9189_v41  ;;  %8663 = vmatprep.subr.bf16.mxu1 %v9190_v39  ;;  %v6352_v44 = vpack.c.bf16 %v6079_v10, %v6079_v10  ;;  %v9213_v39 = vld [vmem:[%s11668_s21 + $0x670] sm:$0xff]   ;;  %v5565_v53 = vrot.slane %v11339_v5, %v10546_v14  ;;  %v9238_v14 = vld [vmem:[%s11668_s21 + $0x6c0] sm:$0xff]  }
0x3dc9   :  { %v6082_v38 = vmax.f32 %v5946_v11, 0.0  ;;  %v6084_v42 = vmax.f32 %v5987_v47, 0.0  ;;  %v9217_v6 = vld [vmem:[%s11668_s21 + $0x668] sm:$0xff]   ;;  %v9243_v11 = vld [vmem:[%s11668_s21 + $0x738] sm:$0xff]   ;;  %v9245_v36 = vld [vmem:[%s11668_s21 + $0x770] sm:$0xff]  }
0x3dca   :  { %v5948_v51 = vpop.f32.mrf.mxu0  ;;  %v5989_v50 = vpop.f32.mrf.mxu1  ;;  %v9218_v24 = vld [vmem:[%s11668_s21 + $0x6e8] sm:$0xff]  }
0x3dcb   :  { %8642 = vmatpush3.bf16.msra.mxu0 %v9191_v4  ;;  %8664 = vmatpush3.bf16.msra.mxu1 %v9192_v45  ;;  %v6355_v41 = vpack.c.bf16 %v6082_v38, %v6082_v38  ;;  %v6357_v3 = vpack.c.bf16 %v6084_v42, %v6084_v42  ;;  %v9215_v4 = vld [vmem:[%s11668_s21 + $0x630] sm:$0xff]   ;;  %v9222_v51 = vld [vmem:[%s11668_s21 + $0x6e0] sm:$0xff]  }
0x3dcc   :  { %v11355_v58 = vpop.f32.mrf.mxu0  ;;  %v6066_v60 = vpop.f32.mrf.mxu1  ;;  %8643 = vmatprep.subr.bf16.mxu0 %v9193_v28  ;;  %8665 = vmatprep.subr.bf16.mxu1 %v9194_v7  ;;  %v9216_v45 = vld [vmem:[%s11668_s21 + $0x6b0] sm:$0xff]   ;;  %v9219_v28 = vld [vmem:[%s11668_s21 + $0x628] sm:$0xff]   ;;  %v9223_v50 = vld [vmem:[%s11668_s21 + $0x620] sm:$0xff]  }
0x3dcd   :  { %v11363_v16 = vadd.f32 %v6066_v60, %v5561_v49  ;;  %v9220_v7 = vld [vmem:[%s11668_s21 + $0x6a8] sm:$0xff]   ;;  %v9221_v49 = vld [vmem:[%s11668_s21 + $0x660] sm:$0xff]   ;;  %v9226_v60 = vld [vmem:[%s11668_s21 + $0x6d8] sm:$0xff]  }
0x3dce   :  { %v11365_v17 = vpop.f32.mrf.mxu0  ;;  %v11367_v9 = vpop.f32.mrf.mxu1  ;;  %v9247_v38 = vld [vmem:[%s11668_s21 + $0x730] sm:$0xff]  }
0x3dcf   :  { %8644 = vmatpush3.bf16.msra.mxu0 %v9195_v37  ;;  %8666 = vmatpush3.bf16.msra.mxu1 %v9196_v54  ;;  %v9224_v37 = vld [vmem:[%s11668_s21 + $0x6a0] sm:$0xff]   ;;  %v9225_v54 = vld [vmem:[%s11668_s21 + $0x658] sm:$0xff]   ;;  %v9248_v42 = vld [vmem:[%s11668_s21 + $0x7b0] sm:$0xff]  }
0x3dd0   :  { %v6029_v25 = vpop.f32.mrf.mxu0  ;;  %v6070_v29 = vpop.f32.mrf.mxu1  ;;  %8645 = vmatprep.subr.bf16.mxu0 %v9197_v0  ;;  %8667 = vmatprep.subr.bf16.mxu1 %v9198_v12  ;;  %v9227_v0 = vld [vmem:[%s11668_s21 + $0x618] sm:$0xff]  }
0x3dd1   :  { %v9228_v12 = vld [vmem:[%s11668_s21 + $0x698] sm:$0xff]   ;;  %v9232_v25 = vld [vmem:[%s11668_s21 + $0x690] sm:$0xff]   ;;  %v9233_v29 = vld [vmem:[%s11668_s21 + $0x648] sm:$0xff]  }
0x3dd2   :  { %v6030_v55 = vpop.f32.mrf.mxu0  ;;  %v6071_v52 = vpop.f32.mrf.mxu1 }
0x3dd3   :  { %8646 = vmatpush3.bf16.msra.mxu0 %v9199_v22  ;;  %8668 = vmatpush3.bf16.msra.mxu1 %v9200_v23  ;;  %v9229_v22 = vld [vmem:[%s11668_s21 + $0x650] sm:$0xff]   ;;  %v5944_v55 = vadd.f32 %v11320_v34, %v5537_v26  ;;  %v6069_v34 = vadd.f32 %v11367_v9, %v5565_v53 }
0x3dd4   :  { %8647 = vmatprep.subr.bf16.mxu0 %v9201_v15  ;;  %8669 = vmatprep.subr.bf16.mxu1 %v9202_v33  ;;  %v9230_v23 = vld [vmem:[%s11668_s21 + $0x6d0] sm:$0xff]   ;;  %v5545_v15 = vrot.slane %v11339_v5, %v10524_v46  ;;  %v9234_v33 = vld [vmem:[%s11668_s21 + $0x6c8] sm:$0xff]  }
0x3dd5   :  { %v9236_v46 = vld [vmem:[%s11668_s21 + $0x688] sm:$0xff]   ;;  %v6081_v62 = vmax.f32 %v5944_v55, 0.0 }
0x3dd6   :  { %v5985_v52 = vadd.f32 %v11322_v32, %v5545_v15  ;;  %v9240_v32 = vld [vmem:[%s11668_s21 + $0x680] sm:$0xff]  }
0x3dd7   :  { %8648 = vmatpush3.bf16.msra.mxu0 %v9203_v63  ;;  %8670 = vmatpush3.bf16.msra.mxu1 %v9204_v57  ;;  %v6028_v63 = vadd.f32 %v11365_v17, %v5557_v27  ;;  %v9239_v57 = vld [vmem:[%s11668_s21 + $0x600] sm:$0xff]   ;;  %v9242_v17 = vld [vmem:[%s11668_s21 + $0x7f8] sm:$0xff]   ;;  %v6354_v47 = vpack.c.bf16 %v6081_v62, %v6081_v62 }
0x3dd8   :  { %8649 = vmatprep.subr.bf16.mxu0 %v9205_v35  ;;  %8671 = vmatprep.subr.bf16.mxu1 %v9206_v48  ;;  %v6083_v35 = vmax.f32 %v5985_v52, 0.0  ;;  %v6088_v48 = vmax.f32 %v6069_v34, 0.0 }
0x3dd9   :  { %v6086_v9 = vmax.f32 %v6028_v63, 0.0 }
0x3ddb   :  { %8650 = vmatpush3.bf16.msra.mxu0 %v9207_v30  ;;  %8672 = vmatpush3.bf16.msra.mxu1 %v9208_v31  ;;  %v9244_v30 = vld [vmem:[%s11668_s21 + $0x7b8] sm:$0xff]   ;;  %v6356_v31 = vpack.c.bf16 %v6083_v35, %v6083_v35  ;;  %v6359_v10 = vpack.c.bf16 %v6086_v9, %v6086_v9 }
0x3ddc   :  { %8679 = vmatprep.subr.bf16.mxu0 %v9209_v40  ;;  %8701 = vmatprep.subr.bf16.mxu1 %v9210_v21  ;;  %v9246_v40 = vld [vmem:[%s11668_s21 + $0x7f0] sm:$0xff]   ;;  %v6361_v21 = vpack.c.bf16 %v6088_v48, %v6088_v48 }
0x3dde   :  { %7251 = vmatmul.mubr.bf16.vlgmr.msra.gmra.mxu0 %v6350_v1  ;;  %7291 = vmatmul.mubr.bf16.vlgmr.msra.gmra.mxu1 %v6352_v44  ;;  %v9250_v1 = vld [vmem:[%s11668_s21 + $0x7e8] sm:$0xff]  }
0x3ddf   :  { %8680 = vmatpush3.bf16.msra.mxu0 %v9211_v43  ;;  %7330 = vmatprep.mubr.bf16.mxu0 %v6355_v41  ;;  %v9249_v43 = vld [vmem:[%s11668_s21 + $0x768] sm:$0xff]   ;;  %v9253_v41 = vld [vmem:[%s11668_s21 + $0x760] sm:$0xff]  }
0x3de0   :  { %8702 = vmatpush3.bf16.msra.mxu1 %v9212_v19  ;;  %7370 = vmatprep.mubr.bf16.mxu1 %v6357_v3  ;;  %v9251_v44 = vld [vmem:[%s11668_s21 + $0x728] sm:$0xff]   ;;  %v9256_v3 = vld [vmem:[%s11668_s21 + $0x7a0] sm:$0xff]  }
0x3de1   :  { %8681 = vmatprep.subr.bf16.mxu0 %v9213_v39  ;;  %8703 = vmatprep.subr.bf16.mxu1 %v9214_v8  ;;  %v9252_v19 = vld [vmem:[%s11668_s21 + $0x7a8] sm:$0xff]   ;;  %v9254_v39 = vld [vmem:[%s11668_s21 + $0x7e0] sm:$0xff]  }
0x3de2   :  { %v9255_v8 = vld [vmem:[%s11668_s21 + $0x720] sm:$0xff]  }
0x3de3   :  { %8682 = vmatpush3.bf16.msra.mxu0 %v9215_v4  ;;  %v9257_v4 = vld [vmem:[%s11668_s21 + $0x758] sm:$0xff]  }
0x3de4   :  { %8704 = vmatpush3.bf16.msra.mxu1 %v9216_v45  ;;  %8683 = vmatprep.subr.bf16.mxu0 %v9217_v6  ;;  %v9258_v45 = vld [vmem:[%s11668_s21 + $0x7d8] sm:$0xff]  }
0x3de5   :  { %8705 = vmatprep.subr.bf16.mxu1 %v9218_v24  ;;  %v9259_v6 = vld [vmem:[%s11668_s21 + $0x718] sm:$0xff]  }
0x3de6   :  { %v9260_v24 = vld [vmem:[%s11668_s21 + $0x798] sm:$0xff]  }
0x3de7   :  { %8684 = vmatpush3.bf16.msra.mxu0 %v9219_v28  ;;  %v9261_v28 = vld [vmem:[%s11668_s21 + $0x750] sm:$0xff]  }
0x3de8   :  { %8706 = vmatpush3.bf16.msra.mxu1 %v9220_v7  ;;  %8685 = vmatprep.subr.bf16.mxu0 %v9221_v49  ;;  %v9262_v7 = vld [vmem:[%s11668_s21 + $0x7d0] sm:$0xff]  }
0x3de9   :  { %8707 = vmatprep.subr.bf16.mxu1 %v9222_v51  ;;  %v9263_v49 = vld [vmem:[%s11668_s21 + $0x710] sm:$0xff]   ;;  %v5553_v51 = vrot.slane %v11339_v5, %v10625_v20  ;;  %v9267_v20 = vld [vmem:[%s11668_s21 + $0x708] sm:$0xff]  }
0x3deb   :  { %8686 = vmatpush3.bf16.msra.mxu0 %v9223_v50  ;;  %v9264_v50 = vld [vmem:[%s11668_s21 + $0x790] sm:$0xff]   ;;  %v6026_v5 = vadd.f32 %v11355_v58, %v5553_v51  ;;  %v9271_v58 = vld [vmem:[%s11668_s21 + $0x700] sm:$0xff]  }
0x3dec   :  { %8708 = vmatpush3.bf16.msra.mxu1 %v9224_v37  ;;  %8687 = vmatprep.subr.bf16.mxu0 %v9225_v54  ;;  %v9265_v37 = vld [vmem:[%s11668_s21 + $0x748] sm:$0xff]  }
0x3ded   :  { %8709 = vmatprep.subr.bf16.mxu1 %v9226_v60  ;;  %v9266_v54 = vld [vmem:[%s11668_s21 + $0x7c8] sm:$0xff]  }
0x3dee   :  { %v9268_v60 = vld [vmem:[%s11668_s21 + $0x788] sm:$0xff]  }
0x3def   :  { %8688 = vmatpush3.bf16.msra.mxu0 %v9227_v0  ;;  %v9269_v0 = vld [vmem:[%s11668_s21 + $0x740] sm:$0xff]  }
0x3df0   :  { %8710 = vmatpush3.bf16.msra.mxu1 %v9228_v12  ;;  %8689 = vmatprep.subr.bf16.mxu0 %v9229_v22  ;;  %v9270_v12 = vld [vmem:[%s11668_s21 + $0x7c0] sm:$0xff]   ;;  %v6085_v22 = vmax.f32 %v6026_v5, 0.0 }
0x3df1   :  { %8711 = vmatprep.subr.bf16.mxu1 %v9230_v23  ;;  %v9272_v23 = vld [vmem:[%s11668_s21 + $0x780] sm:$0xff]  }
0x3df2   :  { %v6358_v26 = vpack.c.bf16 %v6085_v22, %v6085_v22 }
0x3df3   :  { %8690 = vmatpush3.bf16.msra.mxu0 %v9231_v18  ;;  %v6087_v18 = vmax.f32 %v11363_v16, 0.0 }
0x3df4   :  { %8712 = vmatpush3.bf16.msra.mxu1 %v9232_v25  ;;  %8691 = vmatprep.subr.bf16.mxu0 %v9233_v29 }
0x3df5   :  { %8713 = vmatprep.subr.bf16.mxu1 %v9234_v33  ;;  %v6360_v25 = vpack.c.bf16 %v6087_v18, %v6087_v18  ;;  %v8218_v33 = vld [vmem:[%s11669_s22 + $0x1] ss:$0 sm:$0xff] }
0x3df7   :  { %8692 = vmatpush3.bf16.msra.mxu0 %v9235_v61 }
0x3df8   :  { %8714 = vmatpush3.bf16.msra.mxu1 %v9236_v46  ;;  %8693 = vmatprep.subr.bf16.mxu0 %v9237_v13 }
0x3df9   :  { %8715 = vmatprep.subr.bf16.mxu1 %v9238_v14 }
0x3dfb   :  { %8694 = vmatpush3.bf16.msra.mxu0 %v9239_v57 }
0x3dfc   :  { %8716 = vmatpush3.bf16.msra.mxu1 %v9240_v32  ;;  %8723 = vmatprep.subr.bf16.mxu0 %v9241_v56 }
0x3dfd   :  { %8745 = vmatprep.subr.bf16.mxu1 %v9242_v17 }
0x3dfe   :  { %7331 = vmatmul.mubr.bf16.vlgmr.msra.gmra.mxu0 %v6354_v47 }
0x3dff   :  { %7371 = vmatmul.mubr.bf16.vlgmr.msra.gmra.mxu1 %v6356_v31  ;;  %8724 = vmatpush3.bf16.msra.mxu0 %v9243_v11 }
0x3e00   :  { %7410 = vmatprep.mubr.bf16.mxu0 %v6359_v10  ;;  %8746 = vmatpush3.bf16.msra.mxu1 %v9244_v30 }
0x3e01   :  { %7450 = vmatprep.mubr.bf16.mxu1 %v6361_v21  ;;  %8725 = vmatprep.subr.bf16.mxu0 %v9245_v36 }
0x3e02   :  { %8747 = vmatprep.subr.bf16.mxu1 %v9246_v40 }
0x3e03   :  { %8726 = vmatpush3.bf16.msra.mxu0 %v9247_v38 }
0x3e04   :  { %8748 = vmatpush3.bf16.msra.mxu1 %v9248_v42  ;;  %8727 = vmatprep.subr.bf16.mxu0 %v9249_v43 }
0x3e05   :  { %8749 = vmatprep.subr.bf16.mxu1 %v9250_v1 }
0x3e07   :  { %8728 = vmatpush3.bf16.msra.mxu0 %v9251_v44 }
0x3e08   :  { %8750 = vmatpush3.bf16.msra.mxu1 %v9252_v19  ;;  %8729 = vmatprep.subr.bf16.mxu0 %v9253_v41 }
0x3e09   :  { %8751 = vmatprep.subr.bf16.mxu1 %v9254_v39 }
0x3e0b   :  { %8730 = vmatpush3.bf16.msra.mxu0 %v9255_v8 }
0x3e0c   :  { %8752 = vmatpush3.bf16.msra.mxu1 %v9256_v3  ;;  %8731 = vmatprep.subr.bf16.mxu0 %v9257_v4 }
0x3e0d   :  { %8753 = vmatprep.subr.bf16.mxu1 %v9258_v45 }
0x3e0f   :  { %8732 = vmatpush3.bf16.msra.mxu0 %v9259_v6 }
0x3e10   :  { %8754 = vmatpush3.bf16.msra.mxu1 %v9260_v24  ;;  %8733 = vmatprep.subr.bf16.mxu0 %v9261_v28 }
0x3e11   :  { %8755 = vmatprep.subr.bf16.mxu1 %v9262_v7 }
0x3e13   :  { %8734 = vmatpush3.bf16.msra.mxu0 %v9263_v49 }
0x3e14   :  { %8756 = vmatpush3.bf16.msra.mxu1 %v9264_v50  ;;  %8735 = vmatprep.subr.bf16.mxu0 %v9265_v37 }
0x3e15   :  { %8757 = vmatprep.subr.bf16.mxu1 %v9266_v54 }
0x3e17   :  { %8736 = vmatpush3.bf16.msra.mxu0 %v9267_v20 }
0x3e18   :  { %8758 = vmatpush3.bf16.msra.mxu1 %v9268_v60  ;;  %8737 = vmatprep.subr.bf16.mxu0 %v9269_v0  ;;  %v9273_v60 = vld [vmem:[%s11672_s25 + $0x8] sm:$0xff]   ;;  %v9274_v0 = vld [vmem:[%s11672_s25] sm:$0xff]  }
0x3e19   :  { %8759 = vmatprep.subr.bf16.mxu1 %v9270_v12 }
0x3e1b   :  { %8738 = vmatpush3.bf16.msra.mxu0 %v9271_v58 }
0x3e1c   :  { %8760 = vmatpush3.bf16.msra.mxu1 %v9272_v23  ;;  %8948 = vmatprep.subr.bf16.mxu0 %v9537_v2 }
0x3e1e   :  { %7411 = vmatmul.mubr.bf16.vlgmr.msra.gmra.mxu0 %v6358_v26 }
0x3e1f   :  { %7451 = vmatmul.mubr.bf16.vlgmr.msra.gmra.mxu1 %v6360_v25  ;;  %8952 = vmatprep.mubr.msk.bf16.mxu0 %vm9538_vm2, %v9537_v2 }
0x3e20   :  { %8949 = vmatpush3.bf16.msra.mxu0 %v9273_v60 }
0x3e21   :  { %8950 = vmatprep.subr.bf16.mxu0 %v9537_v2  ;;  %v8350_v2 = vld [vmem:[%s11671_s24 + $0x1] ss:$0 sm:$0xff]  ;;  %s7570_s24 = sshll.u32 %s9552_s1, 4  ;;  %s7571_s24 = int_to_ptr.vmem [resolvable:$true] %s7570_s24 }
0x3e22   :  { %s9515_s0 = scalar_lea.vmem %s7571_s24, 16  ;;  %s9519_s11 = scalar_lea.vmem %s7571_s24, 32 }
0x3e23   :  { %p9516_p0 = scmp.ne.s32.totalorder %s7571_s24, %s9515_s0  ;;  %p9520_p1 = scmp.lt.s32.totalorder %s7571_s24, %s7571_s24 }
0x3e24   :  { %8951 = vmatpush3.bf16.msra.mxu0 %v9274_v0  ;;  %p9521_p2 = scmp.lt.s32.totalorder %s9519_s11, %s9515_s0 }
0x3e26   :  { %p9522_p3 = por %p9521_p2, %p9520_p1 }
0x3e28   :  { %p9523_p4 = pnand %p9522_p3, %p9516_p0 }
0x3e7e   :  { %v8607_v29 = vpop.f32.mrf.mxu0  ;;  %v8629_v15 = vpop.f32.mrf.mxu1 }
0x3e80   :  { %v8608_v27 = vpop.f32.mrf.mxu0  ;;  %v8630_v16 = vpop.f32.mrf.mxu1 }
0x3e81   :  { %v8609_v53 = vadd.f32 %v8608_v27, %v8607_v29  ;;  %v8631_v61 = vadd.f32 %v8630_v16, %v8629_v15  ;;  %v8349_v15 = vld [vmem:[%s11670_s23 + $0x1] ss:$0 sm:$0xff] }
0x3e82   :  { %v8610_v55 = vpop.f32.mrf.mxu0  ;;  %v8632_v46 = vpop.f32.mrf.mxu1 }
0x3e83   :  { %v7173_v13 = vadd.f32 %v8609_v53, %v8218_v33 }
0x3e84   :  { %v8611_v52 = vpop.f32.mrf.mxu0  ;;  %v8633_v14 = vpop.f32.mrf.mxu1 }
0x3e85   :  { %v7213_v63 = vadd.f32 %v8631_v61, %v7173_v13 }
0x3e9e   :  { %v8651_v34 = vpop.f32.mrf.mxu0  ;;  %v8673_v57 = vpop.f32.mrf.mxu1 }
0x3ea0   :  { %v8652_v62 = vpop.f32.mrf.mxu0  ;;  %v8674_v32 = vpop.f32.mrf.mxu1 }
0x3ea1   :  { %v8653_v21 = vadd.f32 %v8652_v62, %v8651_v34  ;;  %v8675_v42 = vadd.f32 %v8674_v32, %v8673_v57  ;;  %v7506_v57 = vld [vmem:[%s11673_s26] sm:$0x1] }
0x3ea2   :  { %v8654_v56 = vpop.f32.mrf.mxu0  ;;  %v8676_v35 = vpop.f32.mrf.mxu1 }
0x3ea3   :  { %v7253_v38 = vadd.f32 %v8653_v21, %v7213_v63 }
0x3ea4   :  { %v8655_v17 = vpop.f32.mrf.mxu0  ;;  %v8677_v9 = vpop.f32.mrf.mxu1 }
0x3ea5   :  { %v7293_v1 = vadd.f32 %v8675_v42, %v7253_v38 }
0x3ebe   :  { %v8695_v48 = vpop.f32.mrf.mxu0 }
0x3ebf   :  { %v8717_v11 = vpop.f32.mrf.mxu1 }
0x3ec0   :  { %v8696_v47 = vpop.f32.mrf.mxu0 }
0x3ec1   :  { %v8718_v30 = vpop.f32.mrf.mxu1  ;;  %v8697_v43 = vadd.f32 %v8696_v47, %v8695_v48 }
0x3ec2   :  { %v8698_v31 = vpop.f32.mrf.mxu0  ;;  %v8719_v41 = vadd.f32 %v8718_v30, %v8717_v11 }
0x3ec3   :  { %v8720_v36 = vpop.f32.mrf.mxu1  ;;  %v7333_v44 = vadd.f32 %v8697_v43, %v7293_v1 }
0x3ec4   :  { %v8699_v10 = vpop.f32.mrf.mxu0 }
0x3ec5   :  { %v8721_v40 = vpop.f32.mrf.mxu1  ;;  %v7373_v3 = vadd.f32 %v8719_v41, %v7333_v44 }
0x3ede   :  { %v8739_v19 = vpop.f32.mrf.mxu0 }
0x3edf   :  { %v8761_v39 = vpop.f32.mrf.mxu1 }
0x3ee0   :  { %v8740_v8 = vpop.f32.mrf.mxu0 }
0x3ee1   :  { %v8741_v4 = vadd.f32 %v8740_v8, %v8739_v19  ;;  %v8762_v45 = vpop.f32.mrf.mxu1 }
0x3ee2   :  { %v8742_v6 = vpop.f32.mrf.mxu0  ;;  %v8763_v28 = vadd.f32 %v8762_v45, %v8761_v39 }
0x3ee3   :  { %v7413_v24 = vadd.f32 %v8741_v4, %v7373_v3  ;;  %v8764_v7 = vpop.f32.mrf.mxu1 }
0x3ee4   :  { %v8743_v49 = vpop.f32.mrf.mxu0 }
0x3ee5   :  { %v7453_v51 = vadd.f32 %v8763_v28, %v7413_v24  ;;  %v8765_v50 = vpop.f32.mrf.mxu1 }
0x3ee7   :  { %v7458_v37 = vadd.f32 %v7453_v51, %v11091_v59 }
0x3ee9   :  { %v7463_v54 = vsel %vm2660_vm15, %v7458_v37, 0.0  ;;  %v7466_v20 = vmul.f32 %v7458_v37, %v7458_v37 }
0x3eea   :  { %7464 = vadd.xlane.f32.xlu1 %v7463_v54 }
0x3eeb   :  { %v7467_v5 = vsel %vm2660_vm15, %v7466_v20, 0.0 }
0x3eee   :  { %7468 = vadd.xlane.f32.xlu1 %v7467_v5 }
0x3f73   :  { %v7465_v59 = vpop.xlane.xlu1 %7464 }
0x3f74   :  { %v7470_v12 = vmul.f32 0.03125, %v7465_v59 }
0x3f76   :  { %v7472_v22 = vmul.f32 %v7470_v12, %v7470_v12  ;;  %v7474_v25 = vsub.f32 %v7458_v37, %v7470_v12 }
0x3f77   :  { %v7469_v58 = vpop.xlane.xlu1 %7468 }
0x3f78   :  { %v7471_v23 = vmul.f32 0.03125, %v7469_v58 }
0x3f7a   :  { %v7473_v18 = vsub.f32 %v7471_v23, %v7472_v22 }
0x3f7c   :  { %v7475_v26 = vadd.f32 1e-05, %v7473_v18 }
0x3f7e   :  { %9505 = vrsqrt.f32 %v7475_v26 }
0x3f8b   :  { %v9506_v29 = vpop.eup %9505 }
0x3f8c   :  { %v7477_v33 = vmul.f32 %v9506_v29, %v7474_v25 }
0x3f8e   :  { %v7484_v27 = vmul.f32 %v8349_v15, %v7477_v33 }
0x3f90   :  { %v7491_v16 = vadd.f32 %v8350_v2, %v7484_v27 }
0x3f92   :  { %v7492_v53 = vsel %vm2660_vm15, %v7491_v16, 0.0 }
0x3f93   :  { %v7493_v61 = vrot.slane %v7492_v53, 4 }
0x3f95   :  { %v7494_v55 = vadd.f32 %v7493_v61, %v7492_v53 }
0x3f97   :  { %v7495_v46 = vrot.slane %v7494_v55, 2 }
0x3f99   :  { %v7496_v13 = vadd.f32 %v7495_v46, %v7494_v55 }
0x3f9b   :  { %v7497_v52 = vrot.slane %v7496_v13, 1 }
0x3f9d   :  { %v7498_v14 = vadd.f32 %v7497_v52, %v7496_v13 }
0x3f9f   :  { %v7500_v63 = vmul.f32 0.2, %v7498_v14 }
0x3fa1   :  { %v7505_v34 = vpack.c.bf16 %v7500_v63, %v7500_v63 }
0x3fa3   :  { %8953 = vmatmul.mubr.msk.bf16.vlgmr.msra.gmra.mxu0 %vm1963_vm11, %v7505_v34 }
0x4063   :  { %v7556_v62 = vpop.f32.mrf.mxu0 }
0x4064   :  { %v7557_v32 = vadd.f32 %v7556_v62, %v7506_v57 }
0x4065   :  { %v8954_v56 = vpop.f32.mrf.mxu0 }
0x4066   :  { %7563 = vst.msk [vmem:[#allocation3] sm:$0x1] %vm7562_vm0, %v7557_v32 }
0x4067   :  { %v7559_v35 = vpop.f32.mrf.mxu0 }
0x4068   :  { %9526 = shalt.err (!%p9523_p4)
}
0x4069   :  { %7573 = dma.vmem_to_hbm [thread:$0]  %s7571_s24, 16, %s11674_s27, [#allocation4]   ;;  %v8955_v17 = vpop.f32.mrf.mxu0 }
0x406a   :  { %9535 = dma.done.wait [#allocation4], 16  }
0x406b   :  { %9536 = vsyncadd [#allocation4], 4294967280 }
0x406c   :  { %7577 = vsyncpa [#allocation4], 1 }

</bundles_post_ra>
